<compile_context>
chip_gen: v5e
topology: v5e:2x2
jax: 0.10.0
libtpu: 0.0.40
codegen_flags: <defaults>
</compile_context>

<pallas_src>
import functools

import jax
import jax.numpy as jnp
import numpy as np
from jax import lax
from jax.experimental import pallas as pl
from jax.experimental.pallas import tpu as pltpu


# ----------------------------------------------------------------------------
# Fused kernel: conv1(1x1)+bn1+relu -> conv2(3x3,stride,pad1)+bn2+relu
#               -> conv3(1x1)+bn3 -> (+ shortcut) -> relu
# Grid is (batch, output-row-tiles); one row tile of one image per step.
# ----------------------------------------------------------------------------
def _bottleneck_kernel(x_ref, w1_ref, w2_ref, w3_ref, ws_ref,
                       b1_ref, b2_ref, b3_ref, bs_ref,
                       o_ref, col_ref, *, stride, has_proj):
    # x_ref  : (1, H+2, W+2, Cin)  zero-padded NHWC input (bf16), whole image
    # o_ref  : (1, TH, Wo, Cout)   output row tile (f32)
    # col_ref: VMEM scratch (TH*Wo, 9*P) bf16 -- im2col patch matrix
    Hp, Wp, Cin = x_ref.shape[1], x_ref.shape[2], x_ref.shape[3]
    H, W = Hp - 2, Wp - 2
    P = w1_ref.shape[1]
    TH, Wo, Cout = o_ref.shape[1], o_ref.shape[2], o_ref.shape[3]
    TH_in = stride * (TH - 1) + 3           # padded input rows needed (halo)

    t = pl.program_id(1)
    row0 = t * (TH * stride)                # tile start row in padded coords

    # Overlapping input window for this row tile (dynamic offset on outer dim;
    # the whole padded image block is fetched once per batch index).
    x_tile = x_ref[0, pl.ds(row0, TH_in), :, :]         # (TH_in, Wp, Cin) bf16

    # --- conv1 (1x1) + bn1 + relu  (BN scale folded into w1, bias in f32) ---
    h1 = jnp.dot(x_tile.reshape(TH_in * Wp, Cin), w1_ref[...],
                 preferred_element_type=jnp.float32)
    h1 = jnp.maximum(h1 + b1_ref[...], 0.0).reshape(TH_in, Wp, P)

    # Zero the padding positions of h1: this IS the 3x3 conv's zero padding,
    # replacing the old pad-scratch zero-fill + misaligned interior store.
    ri = lax.broadcasted_iota(jnp.int32, (TH_in, Wp, P), 0) + row0
    ci = lax.broadcasted_iota(jnp.int32, (TH_in, Wp, P), 1)
    valid = (ri >= 1) & (ri <= H) & (ci >= 1) & (ci <= W)
    h1p = jnp.where(valid, h1, 0.0).astype(jnp.bfloat16)   # (TH_in, Wp, P)

    # --- conv2 (3x3, stride) + bn2 + relu : im2col + ONE MXU matmul (K=9P) ---
    for ky in range(3):
        for kx in range(3):
            blk = h1p[ky:ky + 1 + stride * (TH - 1):stride,
                      kx:kx + 1 + stride * (Wo - 1):stride, :]   # (TH, Wo, P)
            c0 = (ky * 3 + kx) * P
            col_ref[:, c0:c0 + P] = blk.reshape(TH * Wo, P)
    h2 = jnp.dot(col_ref[...], w2_ref[...],
                 preferred_element_type=jnp.float32)
    h2 = jnp.maximum(h2 + b2_ref[...], 0.0).astype(jnp.bfloat16)  # (TH*Wo, P)

    # --- conv3 (1x1) + bn3 ---
    h3 = jnp.dot(h2, w3_ref[...], preferred_element_type=jnp.float32)
    h3 = h3 + b3_ref[...]                                         # (TH*Wo, Cout)

    # --- shortcut: subsample the already-loaded tile (no extra ref reads) ---
    if stride == 1:
        xs = x_tile[1:TH + 1, 1:Wo + 1, :]
    else:
        xs = x_tile[1:2 + stride * (TH - 1):stride,
                    1:2 + stride * (Wo - 1):stride, :]            # (TH, Wo, Cin)
    xs = xs.reshape(TH * Wo, Cin)
    if has_proj:
        sc = jnp.dot(xs, ws_ref[...], preferred_element_type=jnp.float32)
        sc = sc + bs_ref[...]
    else:
        # identity: only valid when stride == 1 and Cin == Cout
        sc = xs.astype(jnp.float32)

    o_ref[0] = jnp.maximum(h3 + sc, 0.0).reshape(TH, Wo, Cout)


# ----------------------------------------------------------------------------
# Wrappers
# ----------------------------------------------------------------------------
def _pick_row_tile(Ho):
    for th in (8, 4, 2):
        if Ho % th == 0:
            return th
    return Ho


def bottleneck_forward_nhwc(x_nhwc, params, *, stride=1):
    """Core entry point: NHWC in, NHWC out (no layout transposes)."""
    N, H, W, Cin = x_nhwc.shape
    P = params["w1"].shape[1]
    Cout = params["w3"].shape[1]
    Ho = (H + 2 - 3) // stride + 1
    Wo = (W + 2 - 3) // stride + 1
    has_proj = (stride != 1) or (Cin != Cout)

    TH = _pick_row_tile(Ho)          # output rows per grid step
    T = Ho // TH

    # Zero-pad spatially once in HBM (XLA fuses this with the bf16 cast); the
    # kernel masks conv1 output at padding positions, so no in-kernel pad
    # buffer / zero-fill / misaligned store is needed.
    xp = jnp.pad(x_nhwc.astype(jnp.bfloat16),
                 ((0, 0), (1, 1), (1, 1), (0, 0)))

    kernel = functools.partial(_bottleneck_kernel, stride=stride,
                               has_proj=has_proj)

    def full_spec(shape):
        nd = len(shape)
        return pl.BlockSpec(shape, lambda n, t, _nd=nd: (0,) * _nd)

    in_specs = [
        pl.BlockSpec((1, H + 2, W + 2, Cin), lambda n, t: (n, 0, 0, 0)),  # x
        full_spec(params["w1"].shape),            # (Cin, P)     bf16, scale-folded
        full_spec(params["w2"].shape),            # (9P, P)      bf16, scale-folded
        full_spec(params["w3"].shape),            # (P, Cout)
        full_spec(params["ws"].shape),            # (Cin, Cout)
        full_spec(params["b1"].shape), full_spec(params["b2"].shape),
        full_spec(params["b3"].shape), full_spec(params["bs"].shape),
    ]

    return pl.pallas_call(
        kernel,
        out_shape=jax.ShapeDtypeStruct((N, Ho, Wo, Cout), jnp.float32),
        grid=(N, T),
        in_specs=in_specs,
        out_specs=pl.BlockSpec((1, TH, Wo, Cout), lambda n, t: (n, t, 0, 0)),
        scratch_shapes=[pltpu.VMEM((TH * Wo, 9 * P), jnp.bfloat16)],
        compiler_params=pltpu.CompilerParams(
            dimension_semantics=("parallel", "parallel"),
            # explicit limit with headroom for v7x's 64 MiB VMEM; per-step
            # usage here is far below this (toy channel widths).
            vmem_limit_bytes=48 * 1024 * 1024),
    )(xp, params["w1"], params["w2"], params["w3"], params["ws"],
      params["b1"], params["b2"], params["b3"], params["bs"])


def bottleneck_forward(x_nchw, params, *, stride=1):
    # NCHW adapter matching the PyTorch interface.  Each transpose is a full
    # HBM round-trip of the activation; a full NHWC network should call
    # bottleneck_forward_nhwc directly.
    x = jnp.transpose(x_nchw, (0, 2, 3, 1))
    y = bottleneck_forward_nhwc(x, params, stride=stride)
    return jnp.transpose(y, (0, 3, 1, 2))


# ----------------------------------------------------------------------------
# Deterministic parameter construction (eval-mode BN folded; scale folded
# into conv weights; matmul operands pre-cast to bf16; biases kept f32).
# ----------------------------------------------------------------------------
def make_params(key, in_planes, planes, stride):
    expansion = 4
    cout = expansion * planes
    keys = jax.random.split(key, 24)
    ki = iter(range(24))

    def conv_w(shape):
        return 0.1 * jax.random.normal(keys[next(ki)], shape, jnp.float32)

    def bn_params(c):
        gamma = 0.5 + jax.random.uniform(keys[next(ki)], (c,), jnp.float32)
        beta = 0.1 * jax.random.normal(keys[next(ki)], (c,), jnp.float32)
        mean = 0.1 * jax.random.normal(keys[next(ki)], (c,), jnp.float32)
        var = 0.5 + jax.random.uniform(keys[next(ki)], (c,), jnp.float32)
        return gamma, beta, mean, var

    def fold(gamma, beta, mean, var, eps=1e-5):
        s = gamma / jnp.sqrt(var + eps)
        return s, beta - mean * s

    # PyTorch OIHW conv weights (used by the pure-JAX reference)
    w1_oihw = conv_w((planes, in_planes, 1, 1))
    w2_oihw = conv_w((planes, planes, 3, 3))
    w3_oihw = conv_w((cout, planes, 1, 1))
    ws_oihw = conv_w((cout, in_planes, 1, 1))

    bn1 = bn_params(planes)
    bn2 = bn_params(planes)
    bn3 = bn_params(cout)
    bns = bn_params(cout)

    s1, b1 = fold(*bn1)
    s2, b2 = fold(*bn2)
    s3, b3 = fold(*bn3)
    ss, bs = fold(*bns)

    # Kernel layouts: fold the BN scale into the output-channel axis of each
    # conv weight, then cast to bf16 (MXU-native operands, f32 accumulation).
    w1k = jnp.transpose(w1_oihw[:, :, 0, 0], (1, 0)) * s1[None, :]        # (Cin, P)
    w2k = jnp.transpose(w2_oihw, (2, 3, 1, 0)) * s2[None, None, None, :]  # (3,3,P,P)
    w2k = w2k.reshape(9 * planes, planes)                                  # (9P, P)
    w3k = jnp.transpose(w3_oihw[:, :, 0, 0], (1, 0)) * s3[None, :]        # (P, Cout)
    wsk = jnp.transpose(ws_oihw[:, :, 0, 0], (1, 0)) * ss[None, :]        # (Cin, Cout)

    kernel_params = {
        "w1": w1k.astype(jnp.bfloat16),
        "w2": w2k.astype(jnp.bfloat16),     # row index = (ky*3 + kx)*P + cin
        "w3": w3k.astype(jnp.bfloat16),
        "ws": wsk.astype(jnp.bfloat16),
        "b1": b1.reshape(1, -1), "b2": b2.reshape(1, -1),
        "b3": b3.reshape(1, -1), "bs": bs.reshape(1, -1),
    }
    ref_params = {
        "w1": w1_oihw, "w2": w2_oihw, "w3": w3_oihw, "ws": ws_oihw,
        "bn1": bn1, "bn2": bn2, "bn3": bn3, "bns": bns,
    }
    return kernel_params, ref_params


# ----------------------------------------------------------------------------
# Pure-JAX f32 reference (mirrors the PyTorch forward, eval-mode BN)
# ----------------------------------------------------------------------------
def reference_forward(x, rp, *, stride, has_proj):
    def conv(x, w, stride=1, pad=0):
        return lax.conv_general_dilated(
            x, w, (stride, stride), [(pad, pad), (pad, pad)],
            dimension_numbers=("NCHW", "OIHW", "NCHW"))

    def bn(x, p, eps=1e-5):
        gamma, beta, mean, var = p
        s = gamma / jnp.sqrt(var + eps)
        return x * s[None, :, None, None] + (beta - mean * s)[None, :, None, None]

    out = jax.nn.relu(bn(conv(x, rp["w1"]), rp["bn1"]))
    out = jax.nn.relu(bn(conv(out, rp["w2"], stride=stride, pad=1), rp["bn2"]))
    out = bn(conv(out, rp["w3"]), rp["bn3"])
    if has_proj:
        sc = bn(conv(x, rp["ws"], stride=stride), rp["bns"])
    else:
        sc = x
    return jax.nn.relu(out + sc)


if __name__ == "__main__":
    # TODO(synk): PyTorch BatchNorm2d in training mode uses batch statistics and
    # updates running stats; this kernel implements eval-mode (folded) BN.
    in_planes, planes, stride = 4, 4, 1
    N, H, W = 2, 16, 16

    key = jax.random.PRNGKey(0)
    kx_, kp = jax.random.split(key)
    x = jax.random.normal(kx_, (N, in_planes, H, W), jnp.float32)

    kernel_params, ref_params = make_params(kp, in_planes, planes, stride)
    has_proj = (stride != 1) or (in_planes != 4 * planes)

    y = bottleneck_forward(x, kernel_params, stride=stride)
    y = jax.block_until_ready(y)

    y_ref = reference_forward(x, ref_params, stride=stride, has_proj=has_proj)
    y_ref = jax.block_until_ready(y_ref)

    assert y.shape == (N, 4 * planes, H // stride, W // stride)
    # Kernel matmuls use bf16 operands (f32 accumulation) on the MXU, so a
    # modest tolerance vs. the pure-f32 reference is expected.
    np.testing.assert_allclose(np.asarray(y), np.asarray(y_ref),
                               rtol=5e-2, atol=5e-2)
    print("KERNEL_OK")
</pallas_src>

<mosaic_0001>
module attributes {stable_mosaic.version = 11 : i64} {
  func.func @_bottleneck_kernel(%arg0: i32, %arg1: i32, %arg2: memref<1x18x18x4xbf16, #tpu.memory_space<vmem>>, %arg3: memref<4x4xbf16, #tpu.memory_space<vmem>>, %arg4: memref<36x4xbf16, #tpu.memory_space<vmem>>, %arg5: memref<4x16xbf16, #tpu.memory_space<vmem>>, %arg6: memref<4x16xbf16, #tpu.memory_space<vmem>>, %arg7: memref<1x4xf32, #tpu.memory_space<vmem>>, %arg8: memref<1x4xf32, #tpu.memory_space<vmem>>, %arg9: memref<1x16xf32, #tpu.memory_space<vmem>>, %arg10: memref<1x16xf32, #tpu.memory_space<vmem>>, %arg11: memref<1x8x16x16xf32, #tpu.memory_space<vmem>>, %arg12: memref<128x36xbf16, #tpu.memory_space<vmem>>) attributes {dimension_semantics = [#tpu.dimension_semantics<parallel>, #tpu.dimension_semantics<parallel>], iteration_bounds = array<i64: 2, 2>, scalar_prefetch = 0 : i64, scratch_operands = 1 : i64, tpu.core_type = #tpu.core_type<tc>, window_params = [{transform_indices = @transform_0, window_bounds = array<i64: 1, 18, 18, 4>}, {pipeline_mode = #tpu.pipeline_mode<synchronous>, transform_indices = @transform_1, window_bounds = array<i64: 4, 4>}, {pipeline_mode = #tpu.pipeline_mode<synchronous>, transform_indices = @transform_2, window_bounds = array<i64: 36, 4>}, {pipeline_mode = #tpu.pipeline_mode<synchronous>, transform_indices = @transform_3, window_bounds = array<i64: 4, 16>}, {pipeline_mode = #tpu.pipeline_mode<synchronous>, transform_indices = @transform_4, window_bounds = array<i64: 4, 16>}, {pipeline_mode = #tpu.pipeline_mode<synchronous>, transform_indices = @transform_5, window_bounds = array<i64: 1, 4>}, {pipeline_mode = #tpu.pipeline_mode<synchronous>, transform_indices = @transform_6, window_bounds = array<i64: 1, 4>}, {pipeline_mode = #tpu.pipeline_mode<synchronous>, transform_indices = @transform_7, window_bounds = array<i64: 1, 16>}, {pipeline_mode = #tpu.pipeline_mode<synchronous>, transform_indices = @transform_8, window_bounds = array<i64: 1, 16>}, {transform_indices = @transform_9, window_bounds = array<i64: 1, 8, 16, 16>}]} {
    %c8_i32 = arith.constant 8 : i32
    %0 = arith.muli %arg1, %c8_i32 : i32
    %c0 = arith.constant 0 : index
    %1 = arith.index_cast %0 : i32 to index
    %c0_0 = arith.constant 0 : index
    %c0_1 = arith.constant 0 : index
    %2 = vector.load %arg2[%c0, %1, %c0_0, %c0_1] : memref<1x18x18x4xbf16, #tpu.memory_space<vmem>>, vector<1x10x18x4xbf16>
    %3 = vector.shape_cast %2 : vector<1x10x18x4xbf16> to vector<10x18x4xbf16>
    %4 = vector.shape_cast %3 : vector<10x18x4xbf16> to vector<180x4xbf16>
    %c0_2 = arith.constant 0 : index
    %c0_3 = arith.constant 0 : index
    %5 = vector.load %arg3[%c0_2, %c0_3] : memref<4x4xbf16, #tpu.memory_space<vmem>>, vector<4x4xbf16>
    %cst = arith.constant dense<0.000000e+00> : vector<180x4xf32>
    %6 = tpu.matmul %4, %5, %cst {dimension_numbers = #tpu.dot_dimension_numbers<[1], [0], [0], [1], [0, 0, 1, 1], [], []>} : vector<180x4xbf16>, vector<4x4xbf16>, vector<180x4xf32> -> vector<180x4xf32>
    %c0_4 = arith.constant 0 : index
    %c0_5 = arith.constant 0 : index
    %7 = vector.load %arg7[%c0_4, %c0_5] : memref<1x4xf32, #tpu.memory_space<vmem>>, vector<1x4xf32>
    %8 = vector.broadcast %7 : vector<1x4xf32> to vector<180x4xf32>
    %9 = arith.addf %6, %8 : vector<180x4xf32>
    %cst_6 = arith.constant 0.000000e+00 : f32
    %10 = vector.broadcast %cst_6 : f32 to vector<180x4xf32>
    %11 = arith.maximumf %9, %10 : vector<180x4xf32>
    %12 = vector.shape_cast %11 : vector<180x4xf32> to vector<10x18x4xf32>
    %13 = tpu.iota {dimensions = array<i32: 0>} : vector<10x18x4xi32>
    %14 = vector.broadcast %0 : i32 to vector<10x18x4xi32>
    %15 = arith.addi %13, %14 : vector<10x18x4xi32>
    %16 = tpu.iota {dimensions = array<i32: 1>} : vector<10x18x4xi32>
    %c1_i32 = arith.constant 1 : i32
    %17 = vector.broadcast %c1_i32 : i32 to vector<10x18x4xi32>
    %18 = arith.cmpi sge, %15, %17 : vector<10x18x4xi32>
    %c16_i32 = arith.constant 16 : i32
    %19 = vector.broadcast %c16_i32 : i32 to vector<10x18x4xi32>
    %20 = arith.cmpi sle, %15, %19 : vector<10x18x4xi32>
    %21 = arith.andi %18, %20 : vector<10x18x4xi1>
    %c1_i32_7 = arith.constant 1 : i32
    %22 = vector.broadcast %c1_i32_7 : i32 to vector<10x18x4xi32>
    %23 = arith.cmpi sge, %16, %22 : vector<10x18x4xi32>
    %24 = arith.andi %21, %23 : vector<10x18x4xi1>
    %c16_i32_8 = arith.constant 16 : i32
    %25 = vector.broadcast %c16_i32_8 : i32 to vector<10x18x4xi32>
    %26 = arith.cmpi sle, %16, %25 : vector<10x18x4xi32>
    %27 = arith.andi %24, %26 : vector<10x18x4xi1>
    %cst_9 = arith.constant 0.000000e+00 : f32
    %28 = vector.broadcast %cst_9 : f32 to vector<10x18x4xf32>
    %29 = arith.select %27, %12, %28 : vector<10x18x4xi1>, vector<10x18x4xf32>
    %30 = arith.truncf %29 : vector<10x18x4xf32> to vector<10x18x4xbf16>
    %31 = vector.extract_strided_slice %30 {offsets = [0, 0, 0], sizes = [8, 16, 4], strides = [1, 1, 1]} : vector<10x18x4xbf16> to vector<8x16x4xbf16>
    %32 = vector.shape_cast %31 : vector<8x16x4xbf16> to vector<128x4xbf16>
    %c0_10 = arith.constant 0 : index
    %c0_11 = arith.constant 0 : index
    %33 = vector.load %arg12[%c0_10, %c0_11] : memref<128x36xbf16, #tpu.memory_space<vmem>>, vector<128x4xbf16>
    tpu.vector_store %arg12[%c0_10, %c0_11], %32 {strides = array<i32>} : memref<128x36xbf16, #tpu.memory_space<vmem>>, vector<128x4xbf16>,
    %34 = vector.extract_strided_slice %30 {offsets = [0, 1, 0], sizes = [8, 16, 4], strides = [1, 1, 1]} : vector<10x18x4xbf16> to vector<8x16x4xbf16>
    %35 = vector.shape_cast %34 : vector<8x16x4xbf16> to vector<128x4xbf16>
    %c0_12 = arith.constant 0 : index
    %c4 = arith.constant 4 : index
    %36 = vector.load %arg12[%c0_12, %c4] : memref<128x36xbf16, #tpu.memory_space<vmem>>, vector<128x4xbf16>
    tpu.vector_store %arg12[%c0_12, %c4], %35 {strides = array<i32>} : memref<128x36xbf16, #tpu.memory_space<vmem>>, vector<128x4xbf16>,
    %37 = vector.extract_strided_slice %30 {offsets = [0, 2, 0], sizes = [8, 16, 4], strides = [1, 1, 1]} : vector<10x18x4xbf16> to vector<8x16x4xbf16>
    %38 = vector.shape_cast %37 : vector<8x16x4xbf16> to vector<128x4xbf16>
    %c0_13 = arith.constant 0 : index
    %c8 = arith.constant 8 : index
    %39 = vector.load %arg12[%c0_13, %c8] : memref<128x36xbf16, #tpu.memory_space<vmem>>, vector<128x4xbf16>
    tpu.vector_store %arg12[%c0_13, %c8], %38 {strides = array<i32>} : memref<128x36xbf16, #tpu.memory_space<vmem>>, vector<128x4xbf16>,
    %40 = vector.extract_strided_slice %30 {offsets = [1, 0, 0], sizes = [8, 16, 4], strides = [1, 1, 1]} : vector<10x18x4xbf16> to vector<8x16x4xbf16>
    %41 = vector.shape_cast %40 : vector<8x16x4xbf16> to vector<128x4xbf16>
    %c0_14 = arith.constant 0 : index
    %c12 = arith.constant 12 : index
    %42 = vector.load %arg12[%c0_14, %c12] : memref<128x36xbf16, #tpu.memory_space<vmem>>, vector<128x4xbf16>
    tpu.vector_store %arg12[%c0_14, %c12], %41 {strides = array<i32>} : memref<128x36xbf16, #tpu.memory_space<vmem>>, vector<128x4xbf16>,
    %43 = vector.extract_strided_slice %30 {offsets = [1, 1, 0], sizes = [8, 16, 4], strides = [1, 1, 1]} : vector<10x18x4xbf16> to vector<8x16x4xbf16>
    %44 = vector.shape_cast %43 : vector<8x16x4xbf16> to vector<128x4xbf16>
    %c0_15 = arith.constant 0 : index
    %c16 = arith.constant 16 : index
    %45 = vector.load %arg12[%c0_15, %c16] : memref<128x36xbf16, #tpu.memory_space<vmem>>, vector<128x4xbf16>
    tpu.vector_store %arg12[%c0_15, %c16], %44 {strides = array<i32>} : memref<128x36xbf16, #tpu.memory_space<vmem>>, vector<128x4xbf16>,
    %46 = vector.extract_strided_slice %30 {offsets = [1, 2, 0], sizes = [8, 16, 4], strides = [1, 1, 1]} : vector<10x18x4xbf16> to vector<8x16x4xbf16>
    %47 = vector.shape_cast %46 : vector<8x16x4xbf16> to vector<128x4xbf16>
    %c0_16 = arith.constant 0 : index
    %c20 = arith.constant 20 : index
    %48 = vector.load %arg12[%c0_16, %c20] : memref<128x36xbf16, #tpu.memory_space<vmem>>, vector<128x4xbf16>
    tpu.vector_store %arg12[%c0_16, %c20], %47 {strides = array<i32>} : memref<128x36xbf16, #tpu.memory_space<vmem>>, vector<128x4xbf16>,
    %49 = vector.extract_strided_slice %30 {offsets = [2, 0, 0], sizes = [8, 16, 4], strides = [1, 1, 1]} : vector<10x18x4xbf16> to vector<8x16x4xbf16>
    %50 = vector.shape_cast %49 : vector<8x16x4xbf16> to vector<128x4xbf16>
    %c0_17 = arith.constant 0 : index
    %c24 = arith.constant 24 : index
    %51 = vector.load %arg12[%c0_17, %c24] : memref<128x36xbf16, #tpu.memory_space<vmem>>, vector<128x4xbf16>
    tpu.vector_store %arg12[%c0_17, %c24], %50 {strides = array<i32>} : memref<128x36xbf16, #tpu.memory_space<vmem>>, vector<128x4xbf16>,
    %52 = vector.extract_strided_slice %30 {offsets = [2, 1, 0], sizes = [8, 16, 4], strides = [1, 1, 1]} : vector<10x18x4xbf16> to vector<8x16x4xbf16>
    %53 = vector.shape_cast %52 : vector<8x16x4xbf16> to vector<128x4xbf16>
    %c0_18 = arith.constant 0 : index
    %c28 = arith.constant 28 : index
    %54 = vector.load %arg12[%c0_18, %c28] : memref<128x36xbf16, #tpu.memory_space<vmem>>, vector<128x4xbf16>
    tpu.vector_store %arg12[%c0_18, %c28], %53 {strides = array<i32>} : memref<128x36xbf16, #tpu.memory_space<vmem>>, vector<128x4xbf16>,
    %55 = vector.extract_strided_slice %30 {offsets = [2, 2, 0], sizes = [8, 16, 4], strides = [1, 1, 1]} : vector<10x18x4xbf16> to vector<8x16x4xbf16>
    %56 = vector.shape_cast %55 : vector<8x16x4xbf16> to vector<128x4xbf16>
    %c0_19 = arith.constant 0 : index
    %c32 = arith.constant 32 : index
    %57 = vector.load %arg12[%c0_19, %c32] : memref<128x36xbf16, #tpu.memory_space<vmem>>, vector<128x4xbf16>
    tpu.vector_store %arg12[%c0_19, %c32], %56 {strides = array<i32>} : memref<128x36xbf16, #tpu.memory_space<vmem>>, vector<128x4xbf16>,
    %c0_20 = arith.constant 0 : index
    %c0_21 = arith.constant 0 : index
    %58 = vector.load %arg12[%c0_20, %c0_21] : memref<128x36xbf16, #tpu.memory_space<vmem>>, vector<128x36xbf16>
    %c0_22 = arith.constant 0 : index
    %c0_23 = arith.constant 0 : index
    %59 = vector.load %arg4[%c0_22, %c0_23] : memref<36x4xbf16, #tpu.memory_space<vmem>>, vector<36x4xbf16>
    %cst_24 = arith.constant dense<0.000000e+00> : vector<128x4xf32>
    %60 = tpu.matmul %58, %59, %cst_24 {dimension_numbers = #tpu.dot_dimension_numbers<[1], [0], [0], [1], [0, 0, 1, 1], [], []>} : vector<128x36xbf16>, vector<36x4xbf16>, vector<128x4xf32> -> vector<128x4xf32>
    %c0_25 = arith.constant 0 : index
    %c0_26 = arith.constant 0 : index
    %61 = vector.load %arg8[%c0_25, %c0_26] : memref<1x4xf32, #tpu.memory_space<vmem>>, vector<1x4xf32>
    %62 = vector.broadcast %61 : vector<1x4xf32> to vector<128x4xf32>
    %63 = arith.addf %60, %62 : vector<128x4xf32>
    %cst_27 = arith.constant 0.000000e+00 : f32
    %64 = vector.broadcast %cst_27 : f32 to vector<128x4xf32>
    %65 = arith.maximumf %63, %64 : vector<128x4xf32>
    %66 = arith.truncf %65 : vector<128x4xf32> to vector<128x4xbf16>
    %c0_28 = arith.constant 0 : index
    %c0_29 = arith.constant 0 : index
    %67 = vector.load %arg5[%c0_28, %c0_29] : memref<4x16xbf16, #tpu.memory_space<vmem>>, vector<4x16xbf16>
    %cst_30 = arith.constant dense<0.000000e+00> : vector<128x16xf32>
    %68 = tpu.matmul %66, %67, %cst_30 {dimension_numbers = #tpu.dot_dimension_numbers<[1], [0], [0], [1], [0, 0, 1, 1], [], []>} : vector<128x4xbf16>, vector<4x16xbf16>, vector<128x16xf32> -> vector<128x16xf32>
    %c0_31 = arith.constant 0 : index
    %c0_32 = arith.constant 0 : index
    %69 = vector.load %arg9[%c0_31, %c0_32] : memref<1x16xf32, #tpu.memory_space<vmem>>, vector<1x16xf32>
    %70 = vector.broadcast %69 : vector<1x16xf32> to vector<128x16xf32>
    %71 = arith.addf %68, %70 : vector<128x16xf32>
    %72 = vector.extract_strided_slice %3 {offsets = [1, 1, 0], sizes = [8, 16, 4], strides = [1, 1, 1]} : vector<10x18x4xbf16> to vector<8x16x4xbf16>
    %73 = vector.shape_cast %72 : vector<8x16x4xbf16> to vector<128x4xbf16>
    %c0_33 = arith.constant 0 : index
    %c0_34 = arith.constant 0 : index
    %74 = vector.load %arg6[%c0_33, %c0_34] : memref<4x16xbf16, #tpu.memory_space<vmem>>, vector<4x16xbf16>
    %cst_35 = arith.constant dense<0.000000e+00> : vector<128x16xf32>
    %75 = tpu.matmul %73, %74, %cst_35 {dimension_numbers = #tpu.dot_dimension_numbers<[1], [0], [0], [1], [0, 0, 1, 1], [], []>} : vector<128x4xbf16>, vector<4x16xbf16>, vector<128x16xf32> -> vector<128x16xf32>
    %c0_36 = arith.constant 0 : index
    %c0_37 = arith.constant 0 : index
    %76 = vector.load %arg10[%c0_36, %c0_37] : memref<1x16xf32, #tpu.memory_space<vmem>>, vector<1x16xf32>
    %77 = vector.broadcast %76 : vector<1x16xf32> to vector<128x16xf32>
    %78 = arith.addf %75, %77 : vector<128x16xf32>
    %79 = arith.addf %71, %78 : vector<128x16xf32>
    %cst_38 = arith.constant 0.000000e+00 : f32
    %80 = vector.broadcast %cst_38 : f32 to vector<128x16xf32>
    %81 = arith.maximumf %79, %80 : vector<128x16xf32>
    %82 = vector.shape_cast %81 : vector<128x16xf32> to vector<8x16x16xf32>
    %c0_39 = arith.constant 0 : index
    %c0_40 = arith.constant 0 : index
    %c0_41 = arith.constant 0 : index
    %c0_42 = arith.constant 0 : index
    %83 = vector.load %arg11[%c0_39, %c0_40, %c0_41, %c0_42] : memref<1x8x16x16xf32, #tpu.memory_space<vmem>>, vector<1x8x16x16xf32>
    %84 = vector.shape_cast %83 : vector<1x8x16x16xf32> to vector<8x16x16xf32>
    %85 = vector.shape_cast %82 : vector<8x16x16xf32> to vector<1x8x16x16xf32>
    tpu.vector_store %arg11[%c0_39, %c0_40, %c0_41, %c0_42], %85 {strides = array<i32>} : memref<1x8x16x16xf32, #tpu.memory_space<vmem>>, vector<1x8x16x16xf32>,
    return
  }
  func.func @transform_0(%arg0: i32, %arg1: i32) -> (i32, i32, i32, i32) {
    %c0_i32 = arith.constant 0 : i32
    %c0_i32_0 = arith.constant 0 : i32
    %c0_i32_1 = arith.constant 0 : i32
    %c0_i32_2 = arith.constant 0 : i32
    return %arg0, %c0_i32, %c0_i32_0, %c0_i32_1 : i32, i32, i32, i32
  }
  func.func @transform_1(%arg0: i32, %arg1: i32) -> (i32, i32) {
    %c0_i32 = arith.constant 0 : i32
    %c0_i32_0 = arith.constant 0 : i32
    %c0_i32_1 = arith.constant 0 : i32
    return %c0_i32, %c0_i32_0 : i32, i32
  }
  func.func @transform_2(%arg0: i32, %arg1: i32) -> (i32, i32) {
    %c0_i32 = arith.constant 0 : i32
    %c0_i32_0 = arith.constant 0 : i32
    %c0_i32_1 = arith.constant 0 : i32
    return %c0_i32, %c0_i32_0 : i32, i32
  }
  func.func @transform_3(%arg0: i32, %arg1: i32) -> (i32, i32) {
    %c0_i32 = arith.constant 0 : i32
    %c0_i32_0 = arith.constant 0 : i32
    %c0_i32_1 = arith.constant 0 : i32
    return %c0_i32, %c0_i32_0 : i32, i32
  }
  func.func @transform_4(%arg0: i32, %arg1: i32) -> (i32, i32) {
    %c0_i32 = arith.constant 0 : i32
    %c0_i32_0 = arith.constant 0 : i32
    %c0_i32_1 = arith.constant 0 : i32
    return %c0_i32, %c0_i32_0 : i32, i32
  }
  func.func @transform_5(%arg0: i32, %arg1: i32) -> (i32, i32) {
    %c0_i32 = arith.constant 0 : i32
    %c0_i32_0 = arith.constant 0 : i32
    %c0_i32_1 = arith.constant 0 : i32
    return %c0_i32, %c0_i32_0 : i32, i32
  }
  func.func @transform_6(%arg0: i32, %arg1: i32) -> (i32, i32) {
    %c0_i32 = arith.constant 0 : i32
    %c0_i32_0 = arith.constant 0 : i32
    %c0_i32_1 = arith.constant 0 : i32
    return %c0_i32, %c0_i32_0 : i32, i32
  }
  func.func @transform_7(%arg0: i32, %arg1: i32) -> (i32, i32) {
    %c0_i32 = arith.constant 0 : i32
    %c0_i32_0 = arith.constant 0 : i32
    %c0_i32_1 = arith.constant 0 : i32
    return %c0_i32, %c0_i32_0 : i32, i32
  }
  func.func @transform_8(%arg0: i32, %arg1: i32) -> (i32, i32) {
    %c0_i32 = arith.constant 0 : i32
    %c0_i32_0 = arith.constant 0 : i32
    %c0_i32_1 = arith.constant 0 : i32
    return %c0_i32, %c0_i32_0 : i32, i32
  }
  func.func @transform_9(%arg0: i32, %arg1: i32) -> (i32, i32, i32, i32) {
    %c0_i32 = arith.constant 0 : i32
    %c0_i32_0 = arith.constant 0 : i32
    %c0_i32_1 = arith.constant 0 : i32
    return %arg0, %arg1, %c0_i32, %c0_i32_0 : i32, i32, i32, i32
  }
}

</mosaic_0001>

<bundles_post_ra>
// kernel: tpu_custom_call.1
= control target key start
LH: loop header
LB: loop body
LE: loop exit
PB: predicated region body
PF: predicated region fallthrough
CT: control target
= control target key end

     0   :  { %s4628_s0 = inlined_call_operand.vmem [shape: bf16[2,18,18,4], index: 0, kind: input, shape index: {}]   ;;  %s4629_s1 = inlined_call_operand.vmem [shape: bf16[4,4], index: 1, kind: input, shape index: {}]   ;;  %s4630_s2 = inlined_call_operand.vmem [shape: bf16[36,4], index: 2, kind: input, shape index: {}]   ;;  %s4631_s3 = inlined_call_operand.vmem [shape: bf16[4,16], index: 3, kind: input, shape index: {}]   ;;  %s4632_s4 = inlined_call_operand.vmem [shape: bf16[4,16], index: 4, kind: input, shape index: {}]   ;;  %s4633_s5 = inlined_call_operand.vmem [shape: f32[1,4], index: 5, kind: input, shape index: {}]   ;;  %s4634_s6 = inlined_call_operand.vmem [shape: f32[1,4], index: 6, kind: input, shape index: {}]   ;;  %s4635_s7 = inlined_call_operand.vmem [shape: f32[1,16], index: 7, kind: input, shape index: {}]   ;;  %s4636_s8 = inlined_call_operand.vmem [shape: f32[1,16], index: 8, kind: input, shape index: {}]   ;;  %s4637_s9 = inlined_call_operand.hbm [shape: f32[2,16,16,16], index: 9, kind: output, shape index: {}]  }
   0x1   :  { %4655 = sst [smem:[#allocation7_spill]] %s4628_s0 }
   0x2   :  { %14 = vsyncpa [#allocation4], 0 }
   0x3   :  { %16 = vsyncpa [#allocation4 + $0x1], 0  ;;  %s3371_s30 = smov 0   ;;  %s3373_s10 = smov 0  }
   0x4   :  { %s3375_s11 = smov 0   ;;  %s3377_s12 = smov 0  }
   0x5   :  { %s3379_s13 = smov 0   ;;  %s3381_s14 = smov 0  }
   0x6   :  { %s3383_s15 = smov 0   ;;  %s3385_s16 = smov 0  }
   0x7 LB: > { %s2990_s17 = sadd.s32 4294967295, %s3310_s16   ;;  %s2991_s18 = sadd.s32 4294967294, %s3310_s16   ;;  %s3310_s16 = sphi %s3385_s16, %s22_s16   ;;  %s3306_s15 = sphi %s3383_s15, %s4742_s15   ;;  %s3302_s14 = sphi %s3381_s14, %s4741_s14   ;;  %s3298_s13 = sphi %s3379_s13, %s4740_s13   ;;  %s3294_s12 = sphi %s3377_s12, %s4739_s12   ;;  %s3290_s11 = sphi %s3375_s11, %s4738_s11   ;;  %s3286_s10 = sphi %s3373_s10, %s4737_s10   ;;  %s3282_s30 = sphi %s3371_s30, %s4736_s30  }
   0x8   : > { %s31_s19 = sadd.s32 1, %s3302_s14  ;;  %s34_s20 = sadd.s32 1, %s3306_s15 }
   0x9   : > { %p32_p0 = scmp.ge.s32.totalorder %s31_s19, 2  ;;  %p247_p1 = scmp.ne.s32.totalorder %s3290_s11, %s3286_s10 }
   0xa   : > { %p248_p2 = scmp.eq.s32.totalorder %s2990_s17, 3  ;;  %p253_p5 = scmp.ne.s32.totalorder %s3286_s10, %s3282_s30 }
   0xb   : > { %s4744_s19 = smov (%p32_p0, %s31_s19), 0  ;;  %s4746_s20 = smov (!%p32_p0, %s34_s20), %s3306_s15 }
   0xc   : > { %s233_s21 = ssub.s32 %s3302_s14, %s4744_s19  ;;  %p3422_p3 = por %p248_p2, %p247_p1 }
   0xd   : > { %p36_p4 = scmp.ge.s32.totalorder %s4746_s20, 2  ;;  %p254_p6 = scmp.eq.s32.totalorder %s2991_s18, 3 }
   0xe   : > { %p2994_p7 = scmp.ge.s32.totalorder %s3310_s16, 1  ;;  %p304_p9 = scmp.lt.s32.totalorder %s3310_s16, 5 }
   0xf   : > { %s4748_s20 = smov (%p36_p4, %s4746_s20), 0  ;;  %p3431_p8 = por %p254_p6, %p253_p5 }
  0x10   : > { %4657 = sst [smem:[#allocation6_spill]] %s4748_s20  ;;  %s232_s24 = ssub.s32 %s3306_s15, %s4748_s20 }
  0x11   : > { %s237_s25 = sadd.s32 1, %s3290_s11  ;;  %s234_s26 = sor.u32 %s233_s21, %s232_s24 }
  0x12   : > { %p305_p10 = pnand %p2994_p7, %p304_p9  ;;  %p235_p11 = scmp.eq.s32.totalorder %s234_s26, 0 }
  0x13   : > { %p340_p12 = scmp.lt.s32.totalorder (!%p305_p10), %s3298_s13, 1  ;;  %s3093_s18 = smul.u32 (!%p305_p10), 96, %s3294_s12 }
  0x14   : > { %s3440_s27 = scalar_select %p235_p11, %s3290_s11, %s237_s25  }
  0x15   : > { %308 = sbr.rel (%p305_p10) target bundleno = 983 (0x3d7), region = 56  ;;  %s4659_s0 = sld [smem:[#allocation7_spill]] (!%p305_p10) }
  0x16   : > { %s4643_s24 = smov (!%p305_p10), 4   ;;  %s3315_s25 = smov (!%p305_p10), 20  }
  0x17   : > { %s4641_s28 = smov (!%p305_p10), 24   ;;  %s4639_s29 = smov (!%p305_p10), 32  }
  0x1a   : > { %v715_v0 = vld [vmem:[%s4629_s1] sm:$0x3]  ;;  %vm4650_vm0 = vcmask 1041408   ;;  %s341_s17 = scalar_select %p340_p12, %s3298_s13, 1  ;;  %vm441_vm1 = vcmask 1040384   ;;  %vm445_vm2 = vcmask 1041409  }
  0x1b   : > { %v916_v1 = vsel %vm4650_vm0, %v715_v0, 0  ;;  %vm449_vm3 = vcmask 1042434   ;;  %vm453_vm4 = vcmask 1043459   ;;  %vm4649_vm5 = vcmask 31744  }
  0x1c   : > { %925 = vmatpush.bf16.msra.mxu0 %v916_v1  ;;  %3105 = vmatpush.bf16.msra.mxu2 %v916_v1  ;;  %s3106_s21 = smul.u32 216, %s341_s17  ;;  %s2997_s17 = sshll.u32 %s3294_s12, 3  ;;  %vm1426_vm12 = vcmask 27648   ;;  %vm1727_vm15 = vcmask 1042432  }
  0x1e   : > { %s344_s26 = scalar_lea.vmem %s4659_s0, %s3106_s21  ;;  %s3313_s21 = smov 12  }
  0x1f   : > { %s3452_s20 = scalar_lea.vmem %s344_s26, %s3093_s18  ;;  %s4654_s18 = smov 8  }
  0x20   : > { %v351_v2 = vld [vmem:[%s3452_s20] sm:$0xf]  ;;  %v352_v3 = vld [vmem:[%s3452_s20 + $0x4] sm:$0xf]  ;;  %v354_v20 = vld [vmem:[%s3452_s20 + $0xc] sm:$0xf] }
  0x21   : > { %v411_v4 = vrot.slane %v351_v2, 3  ;;  %v412_v5 = vrot.slane %v352_v3, 3  ;;  %v353_v21 = vld [vmem:[%s3452_s20 + $0x8] sm:$0x1]  ;;  %v414_v22 = vrot.slane %v354_v20, 3  ;;  %s4645_s26 = smov 16  }
  0x22   : > { %v355_v23 = vld [vmem:[%s3452_s20 + $0x10] sm:$0xf]  ;;  %v413_v24 = vrot.slane %v353_v21, 3  ;;  %v357_v40 = vld [vmem:[%s3452_s20 + $0x18] sm:$0xf]  ;;  %s3089_s0 = sshll.u32 %s3298_s13, 5 }
  0x23   : > { %v444_v6 = vsel %vm441_vm1, %v351_v2, %v411_v4  ;;  %v446_v7 = vsel %vm445_vm2, %v351_v2, %v411_v4  ;;  %v450_v8 = vsel %vm449_vm3, %v351_v2, %v411_v4  ;;  %v454_v9 = vsel %vm453_vm4, %v351_v2, %v411_v4  ;;  %v356_v41 = vld [vmem:[%s3452_s20 + $0x14] sm:$0x1]  ;;  %v358_v43 = vld [vmem:[%s3452_s20 + $0x1c] sm:$0xf]  ;;  %v360_v60 = vld [vmem:[%s3452_s20 + $0x24] sm:$0xf] }
  0x24   : > { %v448_v10 = vrot.slane %v446_v7, 1  ;;  %v452_v11 = vrot.slane %v450_v8, 2  ;;  %v456_v12 = vrot.slane %v454_v9, 3  ;;  %v459_v13 = vsel %vm441_vm1, %v352_v3, %v412_v5  ;;  %720 = vst [vmem:[#allocation1] ss:$9 sm:$0xff] %v444_v6 }
  0x25   : > { %v460_v14 = vsel %vm445_vm2, %v352_v3, %v412_v5  ;;  %v463_v15 = vsel %vm449_vm3, %v352_v3, %v412_v5  ;;  %v466_v16 = vsel %vm453_vm4, %v352_v3, %v412_v5  ;;  %731 = vst [vmem:[#allocation1 + $0x4] ss:$9 sm:$0xff] %v459_v13  ;;  %v415_v25 = vrot.slane %v355_v23, 3  ;;  %v359_v61 = vld [vmem:[%s3452_s20 + $0x20] sm:$0x1] }
  0x26   : > { %v462_v17 = vrot.slane %v460_v14, 1  ;;  %v465_v18 = vrot.slane %v463_v15, 2  ;;  %723 = vst [vmem:[#allocation1 + $0x1] ss:$9 sm:$0xff] %v448_v10  ;;  %v468_v19 = vrot.slane %v466_v16, 3  ;;  %v475_v26 = vsel %vm445_vm2, %v354_v20, %v414_v22 }
  0x27   : > { %726 = vst [vmem:[#allocation1 + $0x2] ss:$9 sm:$0xff] %v452_v11  ;;  %v478_v27 = vsel %vm449_vm3, %v354_v20, %v414_v22  ;;  %v471_v28 = vsel %vm441_vm1, %v353_v21, %v413_v24  ;;  %v481_v29 = vsel %vm453_vm4, %v354_v20, %v414_v22  ;;  %v474_v30 = vsel %vm441_vm1, %v354_v20, %v414_v22  ;;  %v361_v3 = vld [vmem:[%s3452_s20 + $0x28] sm:$0xf]  ;;  %v363_v16 = vld [vmem:[%s3452_s20 + $0x30] sm:$0xf] }
  0x28   : > { %729 = vst [vmem:[#allocation1 + $0x3] ss:$9 sm:$0xff] %v456_v12  ;;  %v477_v31 = vrot.slane %v475_v26, 1  ;;  %v480_v33 = vrot.slane %v478_v27, 2  ;;  %v487_v34 = vsel %vm445_vm2, %v355_v23, %v415_v25  ;;  %v483_v35 = vrot.slane %v481_v29, 3 }
  0x29   : > { %734 = vst [vmem:[#allocation1 + $0x5] ss:$9 sm:$0xff] %v462_v17  ;;  %v490_v36 = vsel %vm449_vm3, %v355_v23, %v415_v25  ;;  %v486_v37 = vsel %vm441_vm1, %v355_v23, %v415_v25  ;;  %v489_v38 = vrot.slane %v487_v34, 1  ;;  %v417_v42 = vrot.slane %v357_v40, 3  ;;  %v362_v17 = vld [vmem:[%s3452_s20 + $0x2c] sm:$0x1] }
  0x2a   : > { %737 = vst [vmem:[#allocation1 + $0x6] ss:$9 sm:$0xff] %v465_v18  ;;  %v492_v39 = vrot.slane %v490_v36, 2  ;;  %v493_v44 = vsel %vm453_vm4, %v355_v23, %v415_v25  ;;  %v416_v45 = vrot.slane %v356_v41, 3  ;;  %v418_v46 = vrot.slane %v358_v43, 3 }
  0x2b   : > { %740 = vst [vmem:[#allocation1 + $0x7] ss:$9 sm:$0xff] %v468_v19  ;;  %v495_v47 = vrot.slane %v493_v44, 3  ;;  %v502_v48 = vsel %vm445_vm2, %v357_v40, %v417_v42  ;;  %v505_v49 = vsel %vm449_vm3, %v357_v40, %v417_v42  ;;  %v508_v51 = vsel %vm453_vm4, %v357_v40, %v417_v42  ;;  %v364_v34 = vld [vmem:[%s3452_s20 + $0x34] sm:$0xf] }
  0x2c   : > { %v498_v50 = vsel %vm441_vm1, %v356_v41, %v416_v45  ;;  %v501_v53 = vsel %vm441_vm1, %v357_v40, %v417_v42  ;;  %v504_v54 = vrot.slane %v502_v48, 1  ;;  %v507_v55 = vrot.slane %v505_v49, 2 }
  0x2d   : > { %v514_v56 = vsel %vm445_vm2, %v358_v43, %v418_v46  ;;  %v510_v57 = vrot.slane %v508_v51, 3  ;;  %v513_v58 = vsel %vm441_vm1, %v358_v43, %v418_v46  ;;  %v420_v62 = vrot.slane %v360_v60, 3 }
  0x2e   : > { %v516_v59 = vrot.slane %v514_v56, 1  ;;  %v517_v63 = vsel %vm449_vm3, %v358_v43, %v418_v46  ;;  %v520_v0 = vsel %vm453_vm4, %v358_v43, %v418_v46  ;;  %v419_v1 = vrot.slane %v359_v61, 3 }
  0x2f   : > { %v519_v2 = vrot.slane %v517_v63, 2  ;;  %v522_v4 = vrot.slane %v520_v0, 3  ;;  %v529_v5 = vsel %vm445_vm2, %v360_v60, %v420_v62  ;;  %v532_v6 = vsel %vm449_vm3, %v360_v60, %v420_v62 }
  0x30   : > { %v525_v8 = vsel %vm441_vm1, %v359_v61, %v419_v1  ;;  %v535_v9 = vsel %vm453_vm4, %v360_v60, %v420_v62  ;;  %v421_v10 = vrot.slane %v361_v3, 3  ;;  %v528_v11 = vsel %vm441_vm1, %v360_v60, %v420_v62 }
  0x31   : > { %v531_v12 = vrot.slane %v529_v5, 1  ;;  %v534_v13 = vrot.slane %v532_v6, 2  ;;  %v537_v14 = vrot.slane %v535_v9, 3  ;;  %v423_v19 = vrot.slane %v363_v16, 3 }
  0x32   : > { %v741_v32 = vld [vmem:[#allocation1] sm:$0xff]  ;;  %v540_v15 = vsel %vm441_vm1, %v361_v3, %v421_v10  ;;  %v541_v18 = vsel %vm445_vm2, %v361_v3, %v421_v10  ;;  %v544_v20 = vsel %vm449_vm3, %v361_v3, %v421_v10  ;;  %v547_v21 = vsel %vm453_vm4, %v361_v3, %v421_v10 }
  0x33   : > { %3000 = vmatmul.msk.bf16.vlgmr.msra.gmra.mxu0 %vm4649_vm5, %v741_v32  ;;  %742 = vst [vmem:[#allocation1] ss:$9 sm:$0xff] %v471_v28  ;;  %v422_v22 = vrot.slane %v362_v17, 3  ;;  %v543_v23 = vrot.slane %v541_v18, 1  ;;  %v546_v24 = vrot.slane %v544_v20, 2  ;;  %v549_v25 = vrot.slane %v547_v21, 3 }
  0x34   : > { %743 = vst [vmem:[#allocation1 + $0x1] ss:$9 sm:$0xff] %v474_v30  ;;  %v556_v26 = vsel %vm445_vm2, %v363_v16, %v423_v19  ;;  %v559_v28 = vsel %vm449_vm3, %v363_v16, %v423_v19  ;;  %v562_v30 = vsel %vm453_vm4, %v363_v16, %v423_v19  ;;  %v424_v36 = vrot.slane %v364_v34, 3  ;;  %v372_v18 = vld [vmem:[%s3452_s20 + $0x54] sm:$0xf] }
  0x35   : > { %745 = vst [vmem:[#allocation1 + $0x2] ss:$9 sm:$0xff] %v477_v31  ;;  %v552_v29 = vsel %vm441_vm1, %v362_v17, %v422_v22  ;;  %v555_v31 = vsel %vm441_vm1, %v363_v16, %v423_v19  ;;  %v558_v32 = vrot.slane %v556_v26, 1  ;;  %v432_v26 = vrot.slane %v372_v18, 3 }
  0x36   : > { %747 = vst [vmem:[#allocation1 + $0x3] ss:$9 sm:$0xff] %v480_v33  ;;  %v561_v33 = vrot.slane %v559_v28, 2  ;;  %v571_v41 = vsel %vm449_vm3, %v364_v34, %v424_v36  ;;  %v574_v42 = vsel %vm453_vm4, %v364_v34, %v424_v36  ;;  %v567_v44 = vsel %vm441_vm1, %v364_v34, %v424_v36 }
  0x37   : > { %749 = vst [vmem:[#allocation1 + $0x4] ss:$9 sm:$0xff] %v483_v35  ;;  %v564_v35 = vrot.slane %v562_v30, 3  ;;  %v573_v46 = vrot.slane %v571_v41, 2  ;;  %v576_v48 = vrot.slane %v574_v42, 3  ;;  %v636_v30 = vsel %vm441_vm1, %v372_v18, %v432_v26 }
  0x38   : > { %750 = vst [vmem:[#allocation1 + $0x5] ss:$9 sm:$0xff] %v486_v37  ;;  %v366_v37 = vld [vmem:[%s3452_s20 + $0x3c] sm:$0xf] }
  0x39   : > { %752 = vst [vmem:[#allocation1 + $0x6] ss:$9 sm:$0xff] %v489_v38  ;;  %v365_v38 = vld [vmem:[%s3452_s20 + $0x38] sm:$0x1]  ;;  %v426_v40 = vrot.slane %v366_v37, 3 }
  0x3a   : > { %754 = vst [vmem:[#allocation1 + $0x7] ss:$9 sm:$0xff] %v492_v39  ;;  %v568_v39 = vsel %vm445_vm2, %v364_v34, %v424_v36  ;;  %v425_v43 = vrot.slane %v365_v38, 3  ;;  %v640_v34 = vsel %vm449_vm3, %v372_v18, %v432_v26 }
  0x3b   : > { %v570_v45 = vrot.slane %v568_v39, 1  ;;  %v583_v49 = vsel %vm445_vm2, %v366_v37, %v426_v40 }
  0x3c   : > { %v579_v51 = vsel %vm441_vm1, %v365_v38, %v425_v43  ;;  %v642_v38 = vrot.slane %v640_v34, 2 }
  0x41   : > { %v755_v52 = vld [vmem:[#allocation1] sm:$0xff] }
  0x42   : > { %757 = vst [vmem:[#allocation1] ss:$9 sm:$0xff] %v495_v47 }
  0x43   : > { %3001 = vmatmul.msk.bf16.gmra.mxu0 %vm4649_vm5, %v755_v52  ;;  %758 = vst [vmem:[#allocation1 + $0x1] ss:$9 sm:$0xff] %v498_v50  ;;  %v586_v50 = vsel %vm449_vm3, %v366_v37, %v426_v40  ;;  %v582_v52 = vsel %vm441_vm1, %v366_v37, %v426_v40 }
  0x44   : > { %759 = vst [vmem:[#allocation1 + $0x2] ss:$9 sm:$0xff] %v501_v53  ;;  %v585_v53 = vrot.slane %v583_v49, 1 }
  0x45   : > { %761 = vst [vmem:[#allocation1 + $0x3] ss:$9 sm:$0xff] %v504_v54  ;;  %v588_v54 = vrot.slane %v586_v50, 2 }
  0x46   : > { %763 = vst [vmem:[#allocation1 + $0x4] ss:$9 sm:$0xff] %v507_v55  ;;  %v367_v55 = vld [vmem:[%s3452_s20 + $0x40] sm:$0xf] }
  0x47   : > { %765 = vst [vmem:[#allocation1 + $0x5] ss:$9 sm:$0xff] %v510_v57  ;;  %v427_v56 = vrot.slane %v367_v55, 3  ;;  %v369_v57 = vld [vmem:[%s3452_s20 + $0x48] sm:$0xf] }
  0x48   : > { %766 = vst [vmem:[#allocation1 + $0x6] ss:$9 sm:$0xff] %v513_v58  ;;  %v589_v58 = vsel %vm453_vm4, %v366_v37, %v426_v40  ;;  %v429_v61 = vrot.slane %v369_v57, 3  ;;  %v374_v37 = vld [vmem:[%s3452_s20 + $0x5c] sm:$0x1] }
  0x49   : > { %768 = vst [vmem:[#allocation1 + $0x7] ss:$9 sm:$0xff] %v516_v59  ;;  %v368_v59 = vld [vmem:[%s3452_s20 + $0x44] sm:$0x1]  ;;  %v595_v60 = vsel %vm445_vm2, %v367_v55, %v427_v56  ;;  %v591_v62 = vrot.slane %v589_v58, 3  ;;  %v598_v63 = vsel %vm449_vm3, %v367_v55, %v427_v56  ;;  %v601_v0 = vsel %vm453_vm4, %v367_v55, %v427_v56 }
  0x4a   : > { %v428_v1 = vrot.slane %v368_v59, 3  ;;  %v597_v3 = vrot.slane %v595_v60, 1  ;;  %v600_v5 = vrot.slane %v598_v63, 2  ;;  %v603_v6 = vrot.slane %v601_v0, 3 }
  0x4b   : > { %v609_v9 = vsel %vm441_vm1, %v369_v57, %v429_v61 }
  0x50   : > { %v769_v7 = vld [vmem:[#allocation1] sm:$0xff] }
  0x51   : > { %771 = vst [vmem:[#allocation1] ss:$9 sm:$0xff] %v519_v2  ;;  %v594_v2 = vsel %vm441_vm1, %v367_v55, %v427_v56 }
  0x52   : > { %773 = vst [vmem:[#allocation1 + $0x1] ss:$9 sm:$0xff] %v522_v4 }
  0x53   : > { %3002 = vmatmul.msk.bf16.gmra.mxu0 %vm4649_vm5, %v769_v7  ;;  %774 = vst [vmem:[#allocation1 + $0x2] ss:$9 sm:$0xff] %v525_v8  ;;  %v610_v7 = vsel %vm445_vm2, %v369_v57, %v429_v61  ;;  %v606_v8 = vsel %vm441_vm1, %v368_v59, %v428_v1 }
  0x54   : > { %775 = vst [vmem:[#allocation1 + $0x3] ss:$9 sm:$0xff] %v528_v11  ;;  %v612_v10 = vrot.slane %v610_v7, 1  ;;  %v370_v11 = vld [vmem:[%s3452_s20 + $0x4c] sm:$0xf] }
  0x55   : > { %777 = vst [vmem:[#allocation1 + $0x4] ss:$9 sm:$0xff] %v531_v12  ;;  %v430_v12 = vrot.slane %v370_v11, 3  ;;  %v377_v7 = vld [vmem:[%s3452_s20 + $0x68] sm:$0x1] }
  0x56   : > { %779 = vst [vmem:[#allocation1 + $0x5] ss:$9 sm:$0xff] %v534_v13  ;;  %v613_v13 = vsel %vm449_vm3, %v369_v57, %v429_v61 }
  0x57   : > { %781 = vst [vmem:[#allocation1 + $0x6] ss:$9 sm:$0xff] %v537_v14  ;;  %v616_v14 = vsel %vm453_vm4, %v369_v57, %v429_v61  ;;  %v615_v16 = vrot.slane %v613_v13, 2  ;;  %v622_v17 = vsel %vm445_vm2, %v370_v11, %v430_v12  ;;  %v625_v20 = vsel %vm449_vm3, %v370_v11, %v430_v12 }
  0x58   : > { %782 = vst [vmem:[#allocation1 + $0x7] ss:$9 sm:$0xff] %v540_v15  ;;  %v371_v15 = vld [vmem:[%s3452_s20 + $0x50] sm:$0x1]  ;;  %v618_v19 = vrot.slane %v616_v14, 3  ;;  %v628_v21 = vsel %vm453_vm4, %v370_v11, %v430_v12 }
  0x59   : > { %v630_v28 = vrot.slane %v628_v21, 3 }
  0x5f   : > { %v783_v27 = vld [vmem:[#allocation1] sm:$0xff] }
  0x60   : > { %785 = vst [vmem:[#allocation1] ss:$9 sm:$0xff] %v543_v23  ;;  %v431_v23 = vrot.slane %v371_v15, 3 }
  0x61   : > { %787 = vst [vmem:[#allocation1 + $0x1] ss:$9 sm:$0xff] %v546_v24  ;;  %v621_v24 = vsel %vm441_vm1, %v370_v11, %v430_v12 }
  0x62   : > { %789 = vst [vmem:[#allocation1 + $0x2] ss:$9 sm:$0xff] %v549_v25  ;;  %v624_v25 = vrot.slane %v622_v17, 1 }
  0x63   : > { %3003 = vmatmul.msk.bf16.gmra.mxu0 %vm4649_vm5, %v783_v27  ;;  %790 = vst [vmem:[#allocation1 + $0x3] ss:$9 sm:$0xff] %v552_v29  ;;  %v627_v27 = vrot.slane %v625_v20, 2  ;;  %v633_v29 = vsel %vm441_vm1, %v371_v15, %v431_v23 }
  0x64   : > { %791 = vst [vmem:[#allocation1 + $0x4] ss:$9 sm:$0xff] %v555_v31  ;;  %v373_v31 = vld [vmem:[%s3452_s20 + $0x58] sm:$0xf] }
  0x65   : > { %793 = vst [vmem:[#allocation1 + $0x5] ss:$9 sm:$0xff] %v558_v32  ;;  %v433_v32 = vrot.slane %v373_v31, 3 }
  0x66   : > { %795 = vst [vmem:[#allocation1 + $0x6] ss:$9 sm:$0xff] %v561_v33  ;;  %v637_v33 = vsel %vm445_vm2, %v372_v18, %v432_v26 }
  0x67   : > { %797 = vst [vmem:[#allocation1 + $0x7] ss:$9 sm:$0xff] %v564_v35  ;;  %v643_v35 = vsel %vm453_vm4, %v372_v18, %v432_v26  ;;  %v639_v36 = vrot.slane %v637_v33, 1  ;;  %v649_v39 = vsel %vm445_vm2, %v373_v31, %v433_v32  ;;  %v652_v41 = vsel %vm449_vm3, %v373_v31, %v433_v32 }
  0x68   : > { %v645_v40 = vrot.slane %v643_v35, 3  ;;  %v655_v42 = vsel %vm453_vm4, %v373_v31, %v433_v32 }
  0x69   : > { %v657_v49 = vrot.slane %v655_v42, 3 }
  0x6e   : > { %v798_v47 = vld [vmem:[#allocation1] sm:$0xff] }
  0x6f   : > { %799 = vst [vmem:[#allocation1] ss:$9 sm:$0xff] %v567_v44  ;;  %v434_v44 = vrot.slane %v374_v37, 3 }
  0x70   : > { %801 = vst [vmem:[#allocation1 + $0x1] ss:$9 sm:$0xff] %v570_v45  ;;  %v648_v45 = vsel %vm441_vm1, %v373_v31, %v433_v32 }
  0x71   : > { %803 = vst [vmem:[#allocation1 + $0x2] ss:$9 sm:$0xff] %v573_v46  ;;  %v651_v46 = vrot.slane %v649_v39, 1  ;;  %v660_v50 = vsel %vm441_vm1, %v374_v37, %v434_v44 }
  0x72   : > { %805 = vst [vmem:[#allocation1 + $0x3] ss:$9 sm:$0xff] %v576_v48  ;;  %v375_v48 = vld [vmem:[%s3452_s20 + $0x60] sm:$0xf] }
  0x73   : > { %3004 = vmatmul.msk.bf16.gmra.mxu0 %vm4649_vm5, %v798_v47  ;;  %806 = vst [vmem:[#allocation1 + $0x4] ss:$9 sm:$0xff] %v579_v51  ;;  %v654_v47 = vrot.slane %v652_v41, 2  ;;  %v435_v51 = vrot.slane %v375_v48, 3 }
  0x74   : > { %807 = vst [vmem:[#allocation1 + $0x5] ss:$9 sm:$0xff] %v582_v52  ;;  %v376_v52 = vld [vmem:[%s3452_s20 + $0x64] sm:$0xf] }
  0x75   : > { %809 = vst [vmem:[#allocation1 + $0x6] ss:$9 sm:$0xff] %v585_v53  ;;  %v436_v53 = vrot.slane %v376_v52, 3  ;;  %v667_v55 = vsel %vm449_vm3, %v375_v48, %v435_v51  ;;  %v670_v56 = vsel %vm453_vm4, %v375_v48, %v435_v51  ;;  %v663_v57 = vsel %vm441_vm1, %v375_v48, %v435_v51 }
  0x76   : > { %811 = vst [vmem:[#allocation1 + $0x7] ss:$9 sm:$0xff] %v588_v54  ;;  %v664_v54 = vsel %vm445_vm2, %v375_v48, %v435_v51  ;;  %v669_v59 = vrot.slane %v667_v55, 2  ;;  %v672_v61 = vrot.slane %v670_v56, 3 }
  0x77   : > { %v666_v58 = vrot.slane %v664_v54, 1  ;;  %v676_v60 = vsel %vm445_vm2, %v376_v52, %v436_v53  ;;  %v682_v0 = vsel %vm453_vm4, %v376_v52, %v436_v53  ;;  %v675_v1 = vsel %vm441_vm1, %v376_v52, %v436_v53 }
  0x7d   : > { %v812_v4 = vld [vmem:[#allocation1] sm:$0xff] }
  0x7e   : > { %814 = vst [vmem:[#allocation1] ss:$9 sm:$0xff] %v591_v62  ;;  %v679_v62 = vsel %vm449_vm3, %v376_v52, %v436_v53 }
  0x7f   : > { %815 = vst [vmem:[#allocation1 + $0x1] ss:$9 sm:$0xff] %v594_v2  ;;  %v678_v2 = vrot.slane %v676_v60, 1 }
  0x80   : > { %817 = vst [vmem:[#allocation1 + $0x2] ss:$9 sm:$0xff] %v597_v3  ;;  %v681_v3 = vrot.slane %v679_v62, 2 }
  0x81   : > { %819 = vst [vmem:[#allocation1 + $0x3] ss:$9 sm:$0xff] %v600_v5  ;;  %v684_v5 = vrot.slane %v682_v0, 3 }
  0x82   : > { %821 = vst [vmem:[#allocation1 + $0x4] ss:$9 sm:$0xff] %v603_v6 }
  0x83   : > { %3005 = vmatmul.msk.bf16.gmra.mxu0 %vm4649_vm5, %v812_v4  ;;  %822 = vst [vmem:[#allocation1 + $0x5] ss:$9 sm:$0xff] %v606_v8  ;;  %v378_v4 = vld [vmem:[%s3452_s20 + $0x6c] sm:$0xf] }
  0x84   : > { %823 = vst [vmem:[#allocation1 + $0x6] ss:$9 sm:$0xff] %v609_v9  ;;  %v438_v8 = vrot.slane %v378_v4, 3  ;;  %v379_v9 = vld [vmem:[%s3452_s20 + $0x70] sm:$0xf] }
  0x85   : > { %825 = vst [vmem:[#allocation1 + $0x7] ss:$9 sm:$0xff] %v612_v10  ;;  %v437_v10 = vrot.slane %v377_v7, 3  ;;  %v439_v11 = vrot.slane %v379_v9, 3 }
  0x86   : > { %v691_v12 = vsel %vm445_vm2, %v378_v4, %v438_v8  ;;  %v694_v13 = vsel %vm449_vm3, %v378_v4, %v438_v8  ;;  %v697_v15 = vsel %vm453_vm4, %v378_v4, %v438_v8  ;;  %v690_v17 = vsel %vm441_vm1, %v378_v4, %v438_v8 }
  0x87   : > { %v687_v14 = vsel %vm441_vm1, %v377_v7, %v437_v10  ;;  %v693_v18 = vrot.slane %v691_v12, 1  ;;  %v703_v20 = vsel %vm445_vm2, %v379_v9, %v439_v11  ;;  %v706_v23 = vsel %vm449_vm3, %v379_v9, %v439_v11 }
  0x88   : > { %v708_v26 = vrot.slane %v706_v23, 2  ;;  %v709_v31 = vsel %vm453_vm4, %v379_v9, %v439_v11  ;;  %vm1443_vm2 = vsmask.f32 3328  ;;  %vm1444_vm3 = vsmask.f32 7440 }
  0x89   : > { %v711_v34 = vrot.slane %v709_v31, 3 }
  0x8c   : > { %v826_v22 = vld [vmem:[#allocation1] sm:$0xff] }
  0x8d   : > { %828 = vst [vmem:[#allocation1] ss:$9 sm:$0xff] %v615_v16 }
  0x8e   : > { %830 = vst [vmem:[#allocation1 + $0x1] ss:$9 sm:$0xff] %v618_v19  ;;  %v696_v19 = vrot.slane %v694_v13, 2 }
  0x8f   : > { %831 = vst [vmem:[#allocation1 + $0x2] ss:$9 sm:$0xff] %v621_v24  ;;  %v702_v24 = vsel %vm441_vm1, %v379_v9, %v439_v11 }
  0x90   : > { %833 = vst [vmem:[#allocation1 + $0x3] ss:$9 sm:$0xff] %v624_v25  ;;  %v705_v25 = vrot.slane %v703_v20, 1 }
  0x91   : > { %835 = vst [vmem:[#allocation1 + $0x4] ss:$9 sm:$0xff] %v627_v27  ;;  %v3583_v27 = vld [vmem:[%s4633_s5] ss:$0 sm:$0xff] }
  0x92   : > { %837 = vst [vmem:[#allocation1 + $0x5] ss:$9 sm:$0xff] %v630_v28 }
  0x93   : > { %3006 = vmatmul.msk.bf16.gmra.mxu0 %vm4649_vm5, %v826_v22  ;;  %838 = vst [vmem:[#allocation1 + $0x6] ss:$9 sm:$0xff] %v633_v29  ;;  %v699_v22 = vrot.slane %v697_v15, 3  ;;  %v380_v29 = vld [vmem:[%s3452_s20 + $0x74] sm:$0x1] }
  0x94   : > { %839 = vst [vmem:[#allocation1 + $0x7] ss:$9 sm:$0xff] %v636_v30  ;;  %v440_v32 = vrot.slane %v380_v29, 3 }
  0x9b   : > { %v840_v43 = vld [vmem:[#allocation1] sm:$0xff] }
  0x9c   : > { %842 = vst [vmem:[#allocation1] ss:$9 sm:$0xff] %v639_v36  ;;  %v714_v36 = vsel %vm441_vm1, %v380_v29, %v440_v32  ;;  %vm1728_vm1 = vcmask 1046532  }
  0x9d   : > { %844 = vst [vmem:[#allocation1 + $0x1] ss:$9 sm:$0xff] %v642_v38 }
  0x9e   : > { %846 = vst [vmem:[#allocation1 + $0x2] ss:$9 sm:$0xff] %v645_v40 }
  0x9f   : > { %847 = vst [vmem:[#allocation1 + $0x3] ss:$9 sm:$0xff] %v648_v45 }
  0xa0   : > { %849 = vst [vmem:[#allocation1 + $0x4] ss:$9 sm:$0xff] %v651_v46  ;;  %v3594_v46 = vstv %s2997_s17  ;;  %s4647_s17 = smov 28  }
  0xa1   : > { %851 = vst [vmem:[#allocation1 + $0x5] ss:$9 sm:$0xff] %v654_v47  ;;  %v1109_v47 = vlaneseq  ;;  %vm1113_vm6 = vcmp.ge.s32.totalorder %v3594_v46, 1  ;;  %vm1123_vm7 = vcmp.le.s32.totalorder %v3594_v46, 16 }
  0xa2   : > { %853 = vst [vmem:[#allocation1 + $0x6] ss:$9 sm:$0xff] %v657_v49  ;;  %vm3604_vm8 = vmand %vm1113_vm6, %vm1123_vm7 }
  0xa3   : > { %854 = vst [vmem:[#allocation1 + $0x7] ss:$9 sm:$0xff] %v660_v50  ;;  %3007 = vmatmul.msk.bf16.gmra.mxu0 %vm4649_vm5, %v840_v43  ;;  %v3599_v55 = vshrl.u32 %v1109_v47, 7  ;;  %vm3640_vm6 = vmor %vm1727_vm15, %vm1728_vm1 }
  0xa5   : > { %vm1143_vm9 = vcmp.ge.s32.totalorder %v3599_v55, 1 }
  0xa6   : > { %vm1146_vm13 = vmand %vm3604_vm8, %vm1143_vm9 }
  0xaa   : > { %v855_v63 = vld [vmem:[#allocation1] sm:$0xff] }
  0xab   : > { %856 = vst [vmem:[#allocation1] ss:$9 sm:$0xff] %v663_v57  ;;  %v1100_v57 = vadd.s32 1, %v3594_v46 }
  0xac   : > { %858 = vst [vmem:[#allocation1 + $0x1] ss:$9 sm:$0xff] %v666_v58 }
  0xad   : > { %860 = vst [vmem:[#allocation1 + $0x2] ss:$9 sm:$0xff] %v669_v59  ;;  %vm1114_vm10 = vcmp.ge.s32.totalorder %v1100_v57, 1  ;;  %vm1124_vm11 = vcmp.le.s32.totalorder %v1100_v57, 16 }
  0xae   : > { %862 = vst [vmem:[#allocation1 + $0x3] ss:$9 sm:$0xff] %v672_v61  ;;  %vm3627_vm14 = vmand %vm1114_vm10, %vm1124_vm11 }
  0xaf   : > { %863 = vst [vmem:[#allocation1 + $0x4] ss:$9 sm:$0xff] %v675_v1  ;;  %vm1149_vm4 = vmand %vm3627_vm14, %vm1143_vm9 }
  0xb0   : > { %v927_v6 = vpop.f32.mrf.mxu0  ;;  %865 = vst [vmem:[#allocation1 + $0x5] ss:$9 sm:$0xff] %v678_v2  ;;  %v3625_v2 = vadd.s32 16, %v3599_v55 }
  0xb1   : > { %867 = vst [vmem:[#allocation1 + $0x6] ss:$9 sm:$0xff] %v681_v3  ;;  %v928_v35 = vadd.f32 %v3583_v27, %v927_v6 }
  0xb2   : > { %869 = vst [vmem:[#allocation1 + $0x7] ss:$9 sm:$0xff] %v684_v5  ;;  %vm1178_vm7 = vcmp.le.s32.totalorder %v3625_v2, 16 }
  0xb3   : > { %3008 = vmatmul.msk.bf16.gmra.mxu0 %vm4649_vm5, %v855_v63  ;;  %v986_v43 = vmax.f32 %v928_v35, 0.0  ;;  %vm1181_vm10 = vmand %vm3604_vm8, %vm1178_vm7 }
  0xb4   : > { %vm1184_vm15 = vmand %vm3627_vm14, %vm1178_vm7 }
  0xb5   : > { %v1032_v45 = vrot.slane %v986_v43, 2  ;;  %v1033_v48 = vrot.slane %v986_v43, 4  ;;  %v1034_v50 = vrot.slane %v986_v43, 6 }
  0xb8   : > { %v929_v16 = vpop.f32.mrf.mxu0 }
  0xb9   : > { %v870_v21 = vld [vmem:[#allocation1] sm:$0xff]  ;;  %v930_v28 = vadd.f32 %v3583_v27, %v929_v16 }
  0xba   : > { %871 = vst [vmem:[#allocation1] ss:$9 sm:$0xff] %v687_v14 }
  0xbb   : > { %872 = vst [vmem:[#allocation1 + $0x1] ss:$9 sm:$0xff] %v690_v17  ;;  %v987_v33 = vmax.f32 %v930_v28, 0.0 }
  0xbc   : > { %874 = vst [vmem:[#allocation1 + $0x2] ss:$9 sm:$0xff] %v693_v18 }
  0xbd   : > { %876 = vst [vmem:[#allocation1 + $0x3] ss:$9 sm:$0xff] %v696_v19  ;;  %v1035_v37 = vrot.slane %v987_v33, 2  ;;  %v1036_v40 = vrot.slane %v987_v33, 4  ;;  %v1037_v41 = vrot.slane %v987_v33, 6 }
  0xbe   : > { %878 = vst [vmem:[#allocation1 + $0x4] ss:$9 sm:$0xff] %v699_v22 }
  0xbf   : > { %879 = vst [vmem:[#allocation1 + $0x5] ss:$9 sm:$0xff] %v702_v24 }
  0xc0   : > { %881 = vst [vmem:[#allocation1 + $0x6] ss:$9 sm:$0xff] %v705_v25  ;;  %v932_v30 = vpop.f32.mrf.mxu0 }
  0xc1   : > { %883 = vst [vmem:[#allocation1 + $0x7] ss:$9 sm:$0xff] %v708_v26  ;;  %v933_v42 = vadd.f32 %v3583_v27, %v932_v30 }
  0xc3   : > { %3009 = vmatmul.msk.bf16.gmra.mxu0 %vm4649_vm5, %v870_v21  ;;  %v988_v44 = vmax.f32 %v933_v42, 0.0 }
  0xc5   : > { %v1038_v53 = vrot.slane %v988_v44, 2  ;;  %v1039_v54 = vrot.slane %v988_v44, 4  ;;  %v1040_v56 = vrot.slane %v988_v44, 6 }
  0xc8   : > { %v884_v38 = vld [vmem:[#allocation1] sm:$0xff]  ;;  %v934_v39 = vpop.f32.mrf.mxu0 }
  0xc9   : > { %886 = vst [vmem:[#allocation1] ss:$9 sm:$0xff] %v711_v34  ;;  %3010 = vmatmul.msk.bf16.vlgmr.msra.gmra.mxu2 %vm4649_vm5, %v884_v38  ;;  %v935_v52 = vadd.f32 %v3583_v27, %v934_v39 }
  0xca   : > { %887 = vst [vmem:[#allocation1 + $0x1] ss:$9 sm:$0xff] %v714_v36 }
  0xcb   : > { %1217 = vst [vmem:[#allocation1 + $0x20] ss:$4 sm:$0xff] %v987_v33  ;;  %v3602_v59 = vmax.f32 %v935_v52, 0.0 }
  0xcc   : > { %1219 = vst [vmem:[#allocation1 + $0x21] ss:$4 sm:$0xff] %v1035_v37 }
  0xcd   : > { %1221 = vst [vmem:[#allocation1 + $0x22] ss:$4 sm:$0xff] %v1036_v40  ;;  %v1041_v10 = vrot.slane %v3602_v59, 2  ;;  %v1042_v11 = vrot.slane %v3602_v59, 4  ;;  %v1043_v28 = vrot.slane %v3602_v59, 6 }
  0xce   : > { %1223 = vst [vmem:[#allocation1 + $0x23] ss:$4 sm:$0xff] %v1037_v41 }
  0xd0   : > { %v937_v49 = vpop.f32.mrf.mxu0 }
  0xd1   : > { %v888_v51 = vld [vmem:[#allocation1] sm:$0xff]  ;;  %v938_v61 = vadd.f32 %v3583_v27, %v937_v49 }
  0xd2   : > { %1209 = vst [vmem:[#allocation1] ss:$4 sm:$0xff] %v986_v43 }
  0xd3   : > { %1211 = vst [vmem:[#allocation1 + $0x1] ss:$4 sm:$0xff] %v1032_v45  ;;  %v3615_v1 = vmax.f32 %v938_v61, 0.0 }
  0xd4   : > { %1213 = vst [vmem:[#allocation1 + $0x2] ss:$4 sm:$0xff] %v1033_v48 }
  0xd5   : > { %1215 = vst [vmem:[#allocation1 + $0x3] ss:$4 sm:$0xff] %v1034_v50  ;;  %v1225_v58 = vld.sshfl [vmem:[#allocation1 + $0x20] sm:$0xff pattern:$0x73625140]  ;;  %v1044_v6 = vrot.slane %v3615_v1, 2 }
  0xd6   : > { %1228 = vst [vmem:[#allocation1 + $0x20] ss:$4 sm:$0xff] %v1038_v53  ;;  %v1367_v62 = vsel %vm3604_vm8, %v1225_v58, 0.0  ;;  %vm3667_vm8 = vmor %vm1443_vm2, %vm1444_vm3  ;;  %v1101_v53 = vadd.s32 2, %v3594_v46  ;;  %v1046_v61 = vrot.slane %v3615_v1, 6 }
  0xd7   : > { %1229 = vst [vmem:[#allocation1 + $0x21] ss:$4 sm:$0xff] %v1039_v54  ;;  %v3612_v63 = vpack.c.bf16 %v1367_v62, %v1367_v62 }
  0xd8   : > { %1230 = vst [vmem:[#allocation1 + $0x22] ss:$4 sm:$0xff] %v1040_v56  ;;  %v939_v0 = vpop.f32.mrf.mxu0  ;;  %v1045_v56 = vrot.slane %v3615_v1, 4  ;;  %vm1115_vm11 = vcmp.ge.s32.totalorder %v1101_v53, 1 }
  0xd9   : > { %1231 = vst [vmem:[#allocation1 + $0x23] ss:$4 sm:$0xff] %v3602_v59  ;;  %3011 = vmatmul.msk.bf16.gmra.mxu2 %vm4649_vm5, %v888_v51  ;;  %v940_v7 = vadd.f32 %v3583_v27, %v939_v0  ;;  %v1732_v9 = vrot.slane %v3612_v63, 5  ;;  %v1456_v13 = vshll.u32 %v3612_v63, 16  ;;  %v1460_v19 = vshrl.u32 %v3612_v63, 16 }
  0xda   : > { %1428 = vst.msk [vmem:[#allocation2 + $0x4] sm:$0xf] %vm1426_vm12, %v3612_v63  ;;  %vm2292_vm5 = vcmask 290048  }
  0xdb   : > { %v3647_v20 = vmax.f32 %v940_v7, 0.0  ;;  %v1458_v32 = vrot.slane %v1456_v13, 5  ;;  %v1462_v35 = vrot.slane %v1460_v19, 4  ;;  %v1734_v40 = vrot.slane %v1732_v9, 4 }
  0xdc   : > { %v1224_v4 = vld.sshfl [vmem:[#allocation1] sm:$0xff pattern:$0x73625140] }
  0xdd   : > { %1226 = vst [vmem:[#allocation1] ss:$4 sm:$0xff] %v988_v44  ;;  %v1366_v5 = vsel %vm1146_vm13, %v1224_v4, 0.0  ;;  %v1048_v36 = vrot.slane %v3647_v20, 4  ;;  %v1049_v39 = vrot.slane %v3647_v20, 6  ;;  %v1463_v47 = vor.u32 %v1462_v35, %v1458_v32 }
  0xde   : > { %v1396_v8 = vpack.c.bf16 %v1366_v5, %v1366_v5  ;;  %v1047_v63 = vrot.slane %v3647_v20, 2  ;;  %vm1125_vm13 = vcmp.le.s32.totalorder %v1101_v53, 16 }
  0xdf   : > { %v1464_v57 = vrot.slane %v1463_v47, 4  ;;  %vm3709_vm1 = vmand %vm1115_vm11, %vm1125_vm13 }
  0xe0   : > { %v1232_v14 = vld.sshfl [vmem:[#allocation1 + $0x20] sm:$0xff pattern:$0x73625140]  ;;  %v3012_v15 = vrot.slane %v1396_v8, 9  ;;  %v1447_v16 = vshrl.u32 %v1396_v8, 16  ;;  %v1450_v17 = vshll.u32 %v1396_v8, 16  ;;  %v942_v18 = vpop.f32.mrf.mxu0  ;;  %vm1187_vm11 = vmand %vm3709_vm1, %vm1178_vm7 }
  0xe1   : > { %1237 = vst [vmem:[#allocation1 + $0x20] ss:$4 sm:$0xff] %v1044_v6  ;;  %v1369_v21 = vsel %vm1149_vm4, %v1232_v14, 0.0  ;;  %v943_v22 = vadd.f32 %v3583_v27, %v942_v18 }
  0xe2   : > { %v1733_v23 = vsel %vm3640_vm6, %v3012_v15, %v1732_v9  ;;  %v1449_v24 = vrot.slane %v1447_v16, 4  ;;  %v1452_v25 = vrot.slane %v1450_v17, 5  ;;  %v3656_v26 = vpack.c.bf16 %v1369_v21, %v1369_v21  ;;  %1427 = vst.msk [vmem:[#allocation2] sm:$0xf] %vm1426_vm12, %v1396_v8 }
  0xe3   : > { %1786 = vrot.lane.b32.xlu1 %v1733_v23, %s4654_s18  ;;  %v3661_v29 = vmax.f32 %v943_v22, 0.0 }
  0xe4   : > { %v1227_v30 = vld.sshfl [vmem:[#allocation1] sm:$0xff pattern:$0x73625140]  ;;  %v1453_v31 = vor.u32 %v1452_v25, %v1449_v24  ;;  %1853 = vrot.lane.b32.xlu2 %v3656_v26, %s3313_s21  ;;  %v1471_v50 = vshrl.u32 %v3656_v26, 16  ;;  %v1474_v51 = vshll.u32 %v3656_v26, 16  ;;  %v3013_v15 = vrot.slane %v3656_v26, 9 }
  0xe5   : > { %1233 = vst [vmem:[#allocation1] ss:$4 sm:$0xff] %v1041_v10  ;;  %v1368_v34 = vsel %vm1181_vm10, %v1227_v30, 0.0  ;;  %v1050_v41 = vrot.slane %v3661_v29, 2  ;;  %v1052_v4 = vrot.slane %v3661_v29, 6  ;;  %v1051_v23 = vrot.slane %v3661_v29, 4 }
  0xe6   : > { %1234 = vst [vmem:[#allocation1 + $0x1] ss:$4 sm:$0xff] %v1042_v11  ;;  %v1454_v37 = vrot.slane %v1453_v31, 4  ;;  %v1398_v38 = vpack.c.bf16 %v1368_v34, %v1368_v34  ;;  %v1473_v58 = vrot.slane %v1471_v50, 4  ;;  %v1476_v59 = vrot.slane %v1474_v51, 5 }
  0xe7   : > { %1235 = vst [vmem:[#allocation1 + $0x2] ss:$4 sm:$0xff] %v1043_v28 }
  0xe8   : > { %v1459_v42 = vsel %vm3667_vm8, %v1454_v37, %v1458_v32  ;;  %1236 = vst [vmem:[#allocation1 + $0x3] ss:$4 sm:$0xff] %v3615_v1  ;;  %v1239_v43 = vld.sshfl [vmem:[#allocation1 + $0x20] sm:$0xff pattern:$0x73625140]  ;;  %v1735_v44 = vrot.slane %v1398_v38, 5  ;;  %v944_v45 = vpop.f32.mrf.mxu0  ;;  %v1477_v1 = vor.u32 %v1476_v59, %v1473_v58 }
  0xe9   : > { %1638 = vrot.lane.b32.xlu0 %v1459_v42, %s4643_s24  ;;  %v1466_v48 = vshll.u32 %v1398_v38, 16  ;;  %1244 = vst [vmem:[#allocation1 + $0x20] ss:$4 sm:$0xff] %v1048_v36  ;;  %v945_v52 = vadd.f32 %v3583_v27, %v944_v45  ;;  %v1371_v18 = vsel %vm1184_vm15, %v1239_v43, 0.0 }
  0xea   : > { %v1736_v49 = vsel %vm3640_vm6, %v1734_v40, %v1735_v44  ;;  %1245 = vst [vmem:[#allocation1 + $0x21] ss:$4 sm:$0xff] %v1049_v39  ;;  %v1478_v21 = vrot.slane %v1477_v1, 4  ;;  %v1401_v30 = vpack.c.bf16 %v1371_v18, %v1371_v18 }
  0xeb   : > { %1788 = vrot.lane.b32.xlu1 %v1736_v49, %s4654_s18  ;;  %1246 = vst [vmem:[#allocation1 + $0x22] ss:$4 sm:$0xff] %v3661_v29  ;;  %v1468_v54 = vrot.slane %v1466_v48, 5  ;;  %v3689_v60 = vmax.f32 %v945_v52, 0.0 }
  0xec   : > { %1247 = vst [vmem:[#allocation1 + $0x23] ss:$4 sm:$0xff] %v1050_v41  ;;  %v1742_v37 = vrot.slane %v1401_v30, 5  ;;  %v1490_v38 = vshll.u32 %v1401_v30, 16 }
  0xed   : > { %1429 = vst.msk [vmem:[#allocation2 + $0x8] sm:$0xf] %vm1426_vm12, %v3656_v26  ;;  %v1469_v0 = vsel %vm3667_vm8, %v1464_v57, %v1468_v54  ;;  %v1053_v8 = vrot.slane %v3689_v60, 2  ;;  %v1054_v9 = vrot.slane %v3689_v60, 4  ;;  %v1102_v26 = vadd.s32 3, %v3594_v46 }
  0xee   : > { %v1055_v43 = vrot.slane %v3689_v60, 6  ;;  %v1492_v45 = vrot.slane %v1490_v38, 5 }
  0xef   : > { %v1238_v62 = vld.sshfl [vmem:[#allocation1] sm:$0xff pattern:$0x73625140]  ;;  %vm1116_vm2 = vcmp.ge.s32.totalorder %v1102_v26, 1  ;;  %vm1126_vm3 = vcmp.le.s32.totalorder %v1102_v26, 16  ;;  %v1103_v26 = vadd.s32 4, %v3594_v46 }
  0xf0   : > { %1240 = vst [vmem:[#allocation1] ss:$4 sm:$0xff] %v1045_v56  ;;  %v1370_v5 = vsel %vm3627_vm14, %v1238_v62, 0.0  ;;  %v947_v6 = vpop.f32.mrf.mxu0  ;;  %vm1152_vm14 = vmand %vm3709_vm1, %vm1143_vm9 }
  0xf1   : > { %1241 = vst [vmem:[#allocation1 + $0x1] ss:$4 sm:$0xff] %v1046_v61  ;;  %1640 = vrot.lane.b32.xlu0 %v1469_v0, %s4643_s24  ;;  %v1400_v7 = vpack.c.bf16 %v1370_v5, %v1370_v5  ;;  %v948_v13 = vadd.f32 %v3583_v27, %v947_v6  ;;  %vm3737_vm4 = vmand %vm1116_vm2, %vm1126_vm3  ;;  %vm1117_vm13 = vcmp.ge.s32.totalorder %v1103_v26, 1  ;;  %vm1127_vm15 = vcmp.le.s32.totalorder %v1103_v26, 16 }
  0xf2   : > { %1242 = vst [vmem:[#allocation1 + $0x2] ss:$4 sm:$0xff] %v3647_v20  ;;  %vm1155_vm10 = vmand %vm3737_vm4, %vm1143_vm9 }
  0xf3   : > { %1243 = vst [vmem:[#allocation1 + $0x3] ss:$4 sm:$0xff] %v1047_v63  ;;  %v1249_v10 = vld.sshfl [vmem:[#allocation1 + $0x20] sm:$0xff pattern:$0x73625140]  ;;  %1855 = vrot.lane.b32.xlu2 %v1400_v7, %s3313_s21  ;;  %v1739_v11 = vrot.slane %v1400_v7, 5 }
  0xf4   : > { %1252 = vst [vmem:[#allocation1 + $0x20] ss:$4 sm:$0xff] %v1052_v4  ;;  %v1480_v16 = vshll.u32 %v1400_v7, 16  ;;  %v1484_v17 = vshrl.u32 %v1400_v7, 16  ;;  %v1373_v3 = vsel %vm3709_vm1, %v1249_v10, 0.0  ;;  %v994_v24 = vmax.f32 %v948_v13, 0.0  ;;  %vm1190_vm1 = vmand %vm3737_vm4, %vm1178_vm7 }
  0xf5   : > { %1253 = vst [vmem:[#allocation1 + $0x21] ss:$4 sm:$0xff] %v3689_v60  ;;  %v3717_v19 = vpack.c.bf16 %v1373_v3, %v1373_v3  ;;  %v1740_v20 = vsel %vm3640_vm6, %v3013_v15, %v1739_v11  ;;  %v1741_v36 = vrot.slane %v1739_v11, 4 }
  0xf6   : > { %v1482_v22 = vrot.slane %v1480_v16, 5  ;;  %1254 = vst [vmem:[#allocation1 + $0x22] ss:$4 sm:$0xff] %v1053_v8  ;;  %v1486_v25 = vrot.slane %v1484_v17, 4  ;;  %v1058_v34 = vrot.slane %v994_v24, 6  ;;  %v1056_v47 = vrot.slane %v994_v24, 2 }
  0xf7   : > { %1255 = vst [vmem:[#allocation1 + $0x23] ss:$4 sm:$0xff] %v1054_v9  ;;  %v1743_v44 = vsel %vm3640_vm6, %v1741_v36, %v1742_v37  ;;  %v1057_v50 = vrot.slane %v994_v24, 4  ;;  %v1746_v3 = vrot.slane %v3717_v19, 5 }
  0xf8   : > { %v1483_v28 = vsel %vm3667_vm8, %v1478_v21, %v1482_v22  ;;  %1430 = vst.msk [vmem:[#allocation2 + $0xc] sm:$0xf] %vm1426_vm12, %v1400_v7  ;;  %v949_v29 = vpop.f32.mrf.mxu0  ;;  %v1487_v32 = vor.u32 %v1486_v25, %v1482_v22 }
  0xf9   : > { %1790 = vrot.lane.b32.xlu0 %v1740_v20, %s4654_s18  ;;  %1642 = vrot.lane.b32.xlu1 %v1483_v28, %s4643_s24  ;;  %1432 = vst.msk [vmem:[#allocation2 + $0x14] sm:$0xf] %vm1426_vm12, %v3717_v19  ;;  %v950_v53 = vadd.f32 %v3583_v27, %v949_v29 }
  0xfa   : > { %v1248_v31 = vld.sshfl [vmem:[#allocation1] sm:$0xff pattern:$0x73625140]  ;;  %v1488_v41 = vrot.slane %v1487_v32, 4 }
  0xfb   : > { %1250 = vst [vmem:[#allocation1] ss:$4 sm:$0xff] %v1051_v23  ;;  %2015 = vrot.lane.b32.xlu2 %v1740_v20, %s3315_s25  ;;  %v1372_v35 = vsel %vm1152_vm14, %v1248_v31, 0.0  ;;  %v995_v59 = vmax.f32 %v950_v53, 0.0  ;;  %v1504_v23 = vshll.u32 %v3717_v19, 16  ;;  %vm3797_vm14 = vmand %vm1117_vm13, %vm1127_vm15  ;;  %vm4652_vm13 = vcmask 60448  }
  0xfc   : > { %v3735_v39 = vpack.c.bf16 %v1372_v35, %v1372_v35  ;;  %v1493_v51 = vsel %vm3667_vm8, %v1488_v41, %v1492_v45  ;;  %vm1158_vm2 = vmand %vm3797_vm14, %vm1143_vm9  ;;  %v1508_v35 = vshrl.u32 %v3717_v19, 16  ;;  %vm4651_vm15 = vcmask 93248  }
  0xfd   : > { %v1059_v4 = vrot.slane %v995_v59, 2  ;;  %v1060_v5 = vrot.slane %v995_v59, 4  ;;  %v1061_v1 = vrot.slane %v995_v59, 6 }
  0xfe   : > { %v1256_v40 = vld.sshfl [vmem:[#allocation1 + $0x20] sm:$0xff pattern:$0x73625140]  ;;  %1431 = vst.msk [vmem:[#allocation2 + $0x10] sm:$0xf] %vm1426_vm12, %v3735_v39  ;;  %v1495_v16 = vshrl.u32 %v3735_v39, 16 }
  0xff   : > { %1261 = vst [vmem:[#allocation1 + $0x20] ss:$4 sm:$0xff] %v1058_v34  ;;  %v1375_v56 = vsel %vm1155_vm10, %v1256_v40, 0.0  ;;  %v1498_v17 = vshll.u32 %v3735_v39, 16  ;;  %v3014_v18 = vrot.slane %v3735_v39, 9  ;;  %v1510_v40 = vrot.slane %v1508_v35, 4 }
 0x100   : > { %v952_v48 = vpop.f32.mrf.mxu0  ;;  %v3761_v62 = vpack.c.bf16 %v1375_v56, %v1375_v56  ;;  %v1497_v20 = vrot.slane %v1495_v16, 4 }
 0x101   : > { %1942 = vrot.lane.b32.xlu0 %v1483_v28, %s4645_s26  ;;  %1792 = vrot.lane.b32.xlu1 %v1743_v44, %s4654_s18  ;;  %v953_v52 = vadd.f32 %v3583_v27, %v952_v48  ;;  %v1500_v21 = vrot.slane %v1498_v17, 5  ;;  %v1747_v22 = vsel %vm3640_vm6, %v3014_v18, %v1746_v3  ;;  %v1506_v28 = vrot.slane %v1504_v23, 5 }
 0x102   : > { %v3752_v49 = vld.sshfl [vmem:[#allocation1] sm:$0xff pattern:$0x73625140]  ;;  %1433 = vst.msk [vmem:[#allocation2 + $0x18] sm:$0xf] %vm1426_vm12, %v3761_v62 }
 0x103   : > { %1257 = vst [vmem:[#allocation1] ss:$4 sm:$0xff] %v1055_v43  ;;  %1644 = vrot.lane.b32.xlu2 %v1493_v51, %s4643_s24  ;;  %v996_v54 = vmax.f32 %v953_v52, 0.0  ;;  %v1501_v25 = vor.u32 %v1500_v21, %v1497_v20  ;;  %v1374_v32 = vsel %vm1187_vm11, %v3752_v49, 0.0  ;;  %v1511_v43 = vor.u32 %v1510_v40, %v1506_v28 }
 0x104   : > { %1258 = vst [vmem:[#allocation1 + $0x1] ss:$4 sm:$0xff] %v994_v24  ;;  %v1404_v38 = vpack.c.bf16 %v1374_v32, %v1374_v32  ;;  %v1104_v21 = vadd.s32 5, %v3594_v46 }
 0x105   : > { %1259 = vst [vmem:[#allocation1 + $0x2] ss:$4 sm:$0xff] %v1056_v47  ;;  %v1062_v58 = vrot.slane %v996_v54, 2  ;;  %v1063_v60 = vrot.slane %v996_v54, 4  ;;  %v1064_v61 = vrot.slane %v996_v54, 6  ;;  %v1502_v29 = vrot.slane %v1501_v25, 4 }
 0x106   : > { %1260 = vst [vmem:[#allocation1 + $0x3] ss:$4 sm:$0xff] %v1057_v50  ;;  %v3759_v57 = vld.sshfl [vmem:[#allocation1 + $0x20] sm:$0xff pattern:$0x73625140]  ;;  %v1512_v47 = vrot.slane %v1511_v43, 4 }
 0x107   : > { %1268 = vst [vmem:[#allocation1 + $0x20] ss:$4 sm:$0xff] %v996_v54  ;;  %v1507_v14 = vsel %vm3667_vm8, %v1502_v29, %v1506_v28  ;;  %v1377_v16 = vsel %vm1190_vm1, %v3759_v57, 0.0  ;;  %vm1118_vm3 = vcmp.ge.s32.totalorder %v1104_v21, 1  ;;  %vm1193_vm1 = vmand %vm3797_vm14, %vm1178_vm7 }
 0x108   : > { %1269 = vst [vmem:[#allocation1 + $0x21] ss:$4 sm:$0xff] %v1062_v58  ;;  %v954_v63 = vpop.f32.mrf.mxu0 }
 0x109   : > { %2017 = vrot.lane.b32.xlu0 %v1743_v44, %s3315_s25  ;;  %1944 = vrot.lane.b32.xlu1 %v1493_v51, %s4645_s26  ;;  %1270 = vst [vmem:[#allocation1 + $0x22] ss:$4 sm:$0xff] %v1063_v60  ;;  %v955_v0 = vadd.f32 %v3583_v27, %v954_v63  ;;  %v1514_v44 = vshll.u32 %v1404_v38, 16  ;;  %v1519_v63 = vshrl.u32 %v3761_v62, 16 }
 0x10a   : > { %1271 = vst [vmem:[#allocation1 + $0x23] ss:$4 sm:$0xff] %v1064_v61 }
 0x10b   : > { %1857 = vrot.lane.b32.xlu2 %v3735_v39, %s3313_s21  ;;  %v997_v6 = vmax.f32 %v955_v0, 0.0  ;;  %v1516_v49 = vrot.slane %v1514_v44, 5  ;;  %v1522_v0 = vshll.u32 %v3761_v62, 16 }
 0x10d   : > { %v1262_v7 = vld.sshfl [vmem:[#allocation1] sm:$0xff pattern:$0x73625140]  ;;  %v1065_v8 = vrot.slane %v997_v6, 2  ;;  %v1066_v10 = vrot.slane %v997_v6, 4  ;;  %v1067_v11 = vrot.slane %v997_v6, 6  ;;  %v1517_v51 = vsel %vm3667_vm8, %v1512_v47, %v1516_v49 }
 0x10e   : > { %1264 = vst [vmem:[#allocation1] ss:$4 sm:$0xff] %v995_v59  ;;  %v1376_v9 = vsel %vm3737_vm4, %v1262_v7, 0.0  ;;  %v1521_v7 = vrot.slane %v1519_v63, 4  ;;  %vm1128_vm4 = vcmp.le.s32.totalorder %v1104_v21, 16 }
 0x10f   : > { %1265 = vst [vmem:[#allocation1 + $0x1] ss:$4 sm:$0xff] %v1059_v4  ;;  %v3776_v15 = vpack.c.bf16 %v1376_v9, %v1376_v9  ;;  %vm3869_vm10 = vmand %vm1118_vm3, %vm1128_vm4 }
 0x110   : > { %1266 = vst [vmem:[#allocation1 + $0x2] ss:$4 sm:$0xff] %v1060_v5  ;;  %v957_v45 = vpop.f32.mrf.mxu0  ;;  %vm1161_vm11 = vmand %vm3869_vm10, %vm1143_vm9 }
 0x111   : > { %1859 = vrot.lane.b32.xlu0 %v3717_v19, %s3313_s21  ;;  %2082 = vrot.lane.b32.xlu1 %v3735_v39, %s4641_s28  ;;  %1267 = vst [vmem:[#allocation1 + $0x3] ss:$4 sm:$0xff] %v1061_v1  ;;  %v1273_v13 = vld.sshfl [vmem:[#allocation1 + $0x20] sm:$0xff pattern:$0x73625140]  ;;  %v1748_v39 = vrot.slane %v1746_v3, 4  ;;  %v958_v48 = vadd.f32 %v3583_v27, %v957_v45  ;;  %v1407_v3 = vpack.c.bf16 %v1377_v16, %v1377_v16 }
 0x112   : > { %1276 = vst [vmem:[#allocation1 + $0x20] ss:$4 sm:$0xff] %v1065_v8  ;;  %v1379_v31 = vsel %vm3797_vm14, %v1273_v13, 0.0  ;;  %v1753_v5 = vrot.slane %v3776_v15, 5  ;;  %v1524_v1 = vrot.slane %v1522_v0, 5  ;;  %v1528_v9 = vshll.u32 %v3776_v15, 16 }
 0x113   : > { %2084 = vrot.lane.b32.xlu2 %v3717_v19, %s4641_s28  ;;  %1277 = vst [vmem:[#allocation1 + $0x21] ss:$4 sm:$0xff] %v1066_v10  ;;  %v3808_v34 = vpack.c.bf16 %v1379_v31, %v1379_v31  ;;  %v1749_v19 = vrot.slane %v1404_v38, 5  ;;  %v998_v50 = vmax.f32 %v958_v48, 0.0  ;;  %v1532_v20 = vshrl.u32 %v3776_v15, 16 }
 0x114   : > { %1278 = vst [vmem:[#allocation1 + $0x22] ss:$4 sm:$0xff] %v1067_v11  ;;  %v1525_v10 = vor.u32 %v1524_v1, %v1521_v7  ;;  %v1530_v13 = vrot.slane %v1528_v9, 5  ;;  %v1756_v26 = vrot.slane %v1407_v3, 5  ;;  %v1538_v43 = vshll.u32 %v1407_v3, 16 }
 0x115   : > { %1434 = vst.msk [vmem:[#allocation2 + $0x1c] sm:$0xf] %vm1426_vm12, %v3776_v15  ;;  %v1750_v41 = vsel %vm3640_vm6, %v1748_v39, %v1749_v19  ;;  %v1068_v52 = vrot.slane %v998_v50, 2  ;;  %v1069_v53 = vrot.slane %v998_v50, 4  ;;  %v1070_v54 = vrot.slane %v998_v50, 6 }
 0x116   : > { %1436 = vst.msk [vmem:[#allocation2 + $0x24] sm:$0xf] %vm1426_vm12, %v3808_v34  ;;  %v1534_v28 = vrot.slane %v1532_v20, 4  ;;  %v1540_v49 = vrot.slane %v1538_v43, 5  ;;  %v1105_v16 = vadd.s32 6, %v3594_v46  ;;  %vm1990_vm14 = vcmask 158848  }
 0x117   : > { %1279 = vst [vmem:[#allocation1 + $0x23] ss:$4 sm:$0xff] %v998_v50 }
 0x118   : > { %v1272_v24 = vld.sshfl [vmem:[#allocation1] sm:$0xff pattern:$0x73625140]  ;;  %v959_v58 = vpop.f32.mrf.mxu0  ;;  %v1535_v35 = vor.u32 %v1534_v28, %v1530_v13  ;;  %vm1119_vm3 = vcmp.ge.s32.totalorder %v1105_v16, 1  ;;  %vm1129_vm4 = vcmp.le.s32.totalorder %v1105_v16, 16 }
 0x119   : > { %2019 = vrot.lane.b32.xlu0 %v1747_v22, %s3315_s25  ;;  %1794 = vrot.lane.b32.xlu1 %v1747_v22, %s4654_s18  ;;  %1274 = vst [vmem:[#allocation1] ss:$4 sm:$0xff] %v997_v6  ;;  %v1378_v36 = vsel %vm1158_vm2, %v1272_v24, 0.0  ;;  %v960_v59 = vadd.f32 %v3583_v27, %v959_v58  ;;  %v3015_v6 = vrot.slane %v3761_v62, 9  ;;  %vm1901_vm2 = vcmask 126048   ;;  %v3102_v16 = vld [vmem:[%s4630_s2] sm:$0xff] }
 0x11a   : > { %v3815_v37 = vpack.c.bf16 %v1378_v36, %v1378_v36  ;;  %v1536_v45 = vrot.slane %v1535_v35, 4 }
 0x11b   : > { %2244 = vrot.lane.b32.xlu2 %v1747_v22, %s4639_s29  ;;  %v999_v60 = vmax.f32 %v960_v59, 0.0  ;;  %v1754_v8 = vsel %vm3640_vm6, %v3015_v6, %v1753_v5  ;;  %v1755_v22 = vrot.slane %v1753_v5, 4  ;;  %v1760_v6 = vrot.slane %v3808_v34, 5 }
 0x11c   : > { %1435 = vst.msk [vmem:[#allocation2 + $0x20] sm:$0xf] %vm1426_vm12, %v3815_v37  ;;  %v1543_v59 = vshrl.u32 %v3815_v37, 16  ;;  %v3016_v5 = vrot.slane %v3815_v37, 9 }
 0x11d   : > { %v1071_v4 = vrot.slane %v999_v60, 2  ;;  %v1072_v18 = vrot.slane %v999_v60, 4  ;;  %v1073_v42 = vrot.slane %v999_v60, 6  ;;  %v1757_v32 = vsel %vm3640_vm6, %v1755_v22, %v1756_v26 }
 0x11e   : > { %v1280_v61 = vld.sshfl [vmem:[#allocation1 + $0x20] sm:$0xff pattern:$0x73625140]  ;;  %v1545_v7 = vrot.slane %v1543_v59, 4  ;;  %v1761_v9 = vsel %vm3640_vm6, %v3016_v5, %v1760_v6 }
 0x11f   : > { %1285 = vst [vmem:[#allocation1 + $0x20] ss:$4 sm:$0xff] %v1071_v4  ;;  %v1381_v39 = vsel %vm1161_vm11, %v1280_v61, 0.0  ;;  %vm3938_vm11 = vmand %vm1119_vm3, %vm1129_vm4  ;;  %vm4653_vm4 = vcmask 224448  }
 0x120   : > { %v3833_v56 = vld.sshfl [vmem:[#allocation1] sm:$0xff pattern:$0x73625140]  ;;  %v962_v23 = vpop.f32.mrf.mxu0  ;;  %vm1164_vm3 = vmand %vm3938_vm11, %vm1143_vm9 }
 0x121   : > { %2171 = vrot.lane.b32.xlu0 %v1507_v14, %s4647_s17  ;;  %1946 = vrot.lane.b32.xlu1 %v1507_v14, %s4645_s26  ;;  %1281 = vst [vmem:[#allocation1] ss:$4 sm:$0xff] %v1068_v52  ;;  %v1541_v52 = vsel %vm3667_vm8, %v1536_v45, %v1540_v49  ;;  %v1380_v20 = vsel %vm1193_vm1, %v3833_v56, 0.0  ;;  %vm2063_vm1 = vcmask 191648  }
 0x122   : > { %1282 = vst [vmem:[#allocation1 + $0x1] ss:$4 sm:$0xff] %v1069_v53  ;;  %v1410_v56 = vpack.c.bf16 %v1380_v20, %v1380_v20 }
 0x123   : > { %1646 = vrot.lane.b32.xlu2 %v1507_v14, %s4643_s24  ;;  %1283 = vst [vmem:[#allocation1 + $0x2] ss:$4 sm:$0xff] %v1070_v54 }
 0x124   : > { %1284 = vst [vmem:[#allocation1 + $0x3] ss:$4 sm:$0xff] %v999_v60  ;;  %v1546_v60 = vshll.u32 %v3815_v37, 16 }
 0x126   : > { %v3889_v40 = vld.sshfl [vmem:[#allocation1 + $0x20] sm:$0xff pattern:$0x73625140]  ;;  %v1548_v1 = vrot.slane %v1546_v60, 5 }
 0x128   : > { %v964_v47 = vpop.f32.mrf.mxu0 }
 0x129   : > { %2246 = vrot.lane.b32.xlu0 %v1750_v41, %s4639_s29  ;;  %2021 = vrot.lane.b32.xlu1 %v1750_v41, %s3315_s25  ;;  %v965_v48 = vadd.f32 %v3583_v27, %v964_v47 }
 0x12b   : > { %1796 = vrot.lane.b32.xlu2 %v1750_v41, %s4654_s18  ;;  %v1286_v25 = vld.sshfl [vmem:[#allocation1] sm:$0xff pattern:$0x73625140]  ;;  %v3891_v41 = vpack.c.bf16 %v1381_v39, %v1381_v39  ;;  %v1562_v39 = vshll.u32 %v1410_v56, 16 }
 0x12c   : > { %v1382_v29 = vsel %vm3869_vm10, %v1286_v25, 0.0  ;;  %1288 = vst [vmem:[#allocation1] ss:$4 sm:$0xff] %v1072_v18 }
 0x12d   : > { %v3876_v31 = vpack.c.bf16 %v1382_v29, %v1382_v29  ;;  %1289 = vst [vmem:[#allocation1 + $0x1] ss:$4 sm:$0xff] %v1073_v42  ;;  %v1762_v29 = vrot.slane %v1760_v6, 4  ;;  %v1564_v49 = vrot.slane %v1562_v39, 5  ;;  %v2329_v6 = vld [vmem:[%s4630_s2 + $0x10] sm:$0x3] }
 0x12e   : > { %1437 = vst.msk [vmem:[#allocation2 + $0x28] sm:$0xf] %vm1426_vm12, %v3891_v41 }
 0x12f   : > { %1438 = vst.msk [vmem:[#allocation2 + $0x2c] sm:$0xf] %vm1426_vm12, %v3876_v31 }
 0x130   : > { %v967_v35 = vpop.f32.mrf.mxu0 }
 0x131   : > { %1861 = vrot.lane.b32.xlu0 %v3761_v62, %s3313_s21  ;;  %2173 = vrot.lane.b32.xlu1 %v1517_v51, %s4647_s17 }
 0x133   : > { %2086 = vrot.lane.b32.xlu2 %v3761_v62, %s4641_s28  ;;  %v1526_v62 = vrot.slane %v1525_v10, 4  ;;  %v1549_v10 = vor.u32 %v1548_v1, %v1545_v7  ;;  %v2383_v7 = vunpack.c.l.b16 %v2329_v6 }
 0x135   : > { %v1531_v17 = vsel %vm3667_vm8, %v1526_v62, %v1530_v13  ;;  %v1552_v13 = vshll.u32 %v3808_v34, 16  ;;  %v1550_v18 = vrot.slane %v1549_v10, 4  ;;  %v2386_v1 = vpack.c.b16 %v2383_v7, %v2383_v7 }
 0x137   : > { %v1554_v30 = vrot.slane %v1552_v13, 5  ;;  %v2415_v10 = vsel %vm4650_vm0, %v2386_v1, 0  ;;  %v1567_v13 = vshrl.u32 %v3891_v41, 16 }
 0x138   : > { %2422 = vmatpush.bf16.msra.mxu1 %v2415_v10 }
 0x139   : > { %1648 = vrot.lane.b32.xlu0 %v1517_v51, %s4643_s24  ;;  %1863 = vrot.lane.b32.xlu1 %v3776_v15, %s3313_s21  ;;  %v1569_v20 = vrot.slane %v1567_v13, 4 }
 0x13b   : > { %1948 = vrot.lane.b32.xlu2 %v1517_v51, %s4645_s26  ;;  %v1001_v51 = vmax.f32 %v965_v48, 0.0 }
 0x13d   : > { %1294 = vst [vmem:[#allocation1 + $0x22] ss:$4 sm:$0xff] %v1001_v51  ;;  %v1077_v54 = vrot.slane %v1001_v51, 2  ;;  %v1079_v0 = vrot.slane %v1001_v51, 6  ;;  %v1078_v62 = vrot.slane %v1001_v51, 4 }
 0x13e   : > { %v3853_v11 = vpop.permute.xlu2 %1853 }
 0x13f   : > { %1295 = vst [vmem:[#allocation1 + $0x23] ss:$4 sm:$0xff] %v1077_v54  ;;  %v3985_v54 = vld [vmem:[%s4633_s5] ss:$0 sm:$0xff] }
 0x141   : > { %2088 = vrot.lane.b32.xlu0 %v3776_v15, %s4641_s28  ;;  %2023 = vrot.lane.b32.xlu1 %v1754_v8, %s3315_s25  ;;  %v963_v15 = vadd.f32 %v3583_v27, %v962_v23  ;;  %v1556_v23 = vshrl.u32 %v3808_v34, 16 }
 0x143   : > { %1798 = vrot.lane.b32.xlu2 %v1754_v8, %s4654_s18  ;;  %v1000_v14 = vmax.f32 %v963_v15, 0.0 }
 0x145   : > { %v1075_v36 = vrot.slane %v1000_v14, 4  ;;  %v1076_v38 = vrot.slane %v1000_v14, 6  ;;  %1290 = vst [vmem:[#allocation1 + $0x2] ss:$4 sm:$0xff] %v1000_v14  ;;  %v1074_v19 = vrot.slane %v1000_v14, 2  ;;  %v1558_v14 = vrot.slane %v1556_v23, 4 }
 0x147   : > { %1292 = vst [vmem:[#allocation1 + $0x20] ss:$4 sm:$0xff] %v1075_v36 }
 0x148   : > { %1293 = vst [vmem:[#allocation1 + $0x21] ss:$4 sm:$0xff] %v1076_v38  ;;  %v1559_v38 = vor.u32 %v1558_v14, %v1554_v30 }
 0x149   : > { %2248 = vrot.lane.b32.xlu0 %v1754_v8, %s4639_s29  ;;  %2175 = vrot.lane.b32.xlu1 %v1531_v17, %s4647_s17  ;;  %1291 = vst [vmem:[#allocation1 + $0x3] ss:$4 sm:$0xff] %v1074_v19  ;;  %v968_v19 = vadd.f32 %v3583_v27, %v967_v35 }
 0x14a   : > { %v1560_v48 = vrot.slane %v1559_v38, 4 }
 0x14b   : > { %1950 = vrot.lane.b32.xlu2 %v1531_v17, %s4645_s26  ;;  %v1002_v45 = vmax.f32 %v968_v19, 0.0 }
 0x14d   : > { %v3867_v57 = vpop.permute.xlu2 %1855  ;;  %v1081_v51 = vrot.slane %v1002_v45, 4  ;;  %v1082_v27 = vrot.slane %v1002_v45, 6 }
 0x14f   : > { %v1297_v8 = vld.sshfl [vmem:[#allocation1 + $0x20] sm:$0xff pattern:$0x73625140] }
 0x150   : > { %1300 = vst [vmem:[#allocation1 + $0x20] ss:$4 sm:$0xff] %v1079_v0  ;;  %v1385_v42 = vsel %vm3938_vm11, %v1297_v8, 0.0 }
 0x151   : > { %1650 = vrot.lane.b32.xlu0 %v1531_v17, %s4643_s24  ;;  %2250 = vrot.lane.b32.xlu1 %v1757_v32, %s4639_s29  ;;  %v1296_v17 = vld.sshfl [vmem:[#allocation1] sm:$0xff pattern:$0x73625140]  ;;  %v3946_v22 = vpack.c.bf16 %v1385_v42, %v1385_v42  ;;  %1301 = vst [vmem:[#allocation1 + $0x21] ss:$4 sm:$0xff] %v1002_v45 }
 0x152   : > { %1298 = vst [vmem:[#allocation1] ss:$4 sm:$0xff] %v1078_v62  ;;  %v1384_v28 = vsel %vm1164_vm3, %v1296_v17, 0.0  ;;  %v1570_v62 = vshll.u32 %v3891_v41, 16  ;;  %vm2219_vm3 = vcmask 257248  }
 0x153   : > { %2025 = vrot.lane.b32.xlu2 %v1757_v32, %s3315_s25  ;;  %1440 = vst.msk [vmem:[#allocation2 + $0x34] sm:$0xf] %vm1426_vm12, %v3946_v22 }
 0x154   : > { %1303 = vst [vmem:[#allocation1 + $0x23] ss:$4 sm:$0xff] %v1081_v51 }
 0x155   : > { %v3893_v44 = vpop.permute.xlu2 %2015  ;;  %v1787_v50 = vpop.permute.xlu1 %1786 }
 0x159   : > { %1800 = vrot.lane.b32.xlu0 %v1757_v32, %s4654_s18  ;;  %1865 = vrot.lane.b32.xlu1 %v3815_v37, %s3313_s21  ;;  %v1763_v32 = vrot.slane %v1410_v56, 5  ;;  %v3988_v59 = vld.sshfl [vmem:[#allocation1] sm:$0xff pattern:$0x73625140]  ;;  %v1767_v56 = vrot.slane %v3876_v31, 5 }
 0x15a   : > { %1305 = vst [vmem:[#allocation1] ss:$4 sm:$0xff] %v1082_v27 }
 0x15b   : > { %v1639_v53 = vpop.permute.xlu0 %1638  ;;  %2177 = vrot.lane.b32.xlu2 %v1541_v52, %s4647_s17  ;;  %v1764_v36 = vsel %vm3640_vm6, %v1762_v29, %v1763_v32 }
 0x15c   : > { %1687 = vst.msk [vmem:[#allocation2] sm:$0xf] %vm4652_vm13, %v1639_v53  ;;  %v1565_v53 = vsel %vm3667_vm8, %v1560_v48, %v1564_v49  ;;  %v1580_v48 = vshrl.u32 %v3876_v31, 16 }
 0x15d   : > { %1835 = vst.msk [vmem:[#allocation2] sm:$0xf] %vm4651_vm15, %v1787_v50  ;;  %v1645_v58 = vpop.permute.xlu2 %1644  ;;  %v1789_v61 = vpop.permute.xlu1 %1788  ;;  %v1080_v50 = vrot.slane %v1002_v45, 2 }
 0x15e   : > { %1690 = vst.msk [vmem:[#allocation2 + $0xc] sm:$0xf] %vm4652_vm13, %v1645_v58  ;;  %v1582_v27 = vrot.slane %v1580_v48, 4 }
 0x15f   : > { %1902 = vst.msk [vmem:[#allocation2] sm:$0xf] %vm1901_vm2, %v3853_v11 }
 0x160   : > { %1302 = vst [vmem:[#allocation1 + $0x22] ss:$4 sm:$0xff] %v1080_v50 }
 0x161   : > { %2090 = vrot.lane.b32.xlu0 %v3815_v37, %s4641_s28  ;;  %1652 = vrot.lane.b32.xlu1 %v1541_v52, %s4643_s24 }
 0x163   : > { %v1641_v63 = vpop.permute.xlu0 %1640  ;;  %1867 = vrot.lane.b32.xlu2 %v3808_v34, %s3313_s21 }
 0x164   : > { %1688 = vst.msk [vmem:[#allocation2 + $0x4] sm:$0xf] %vm4652_vm13, %v1641_v63 }
 0x165   : > { %1836 = vst.msk [vmem:[#allocation2 + $0x4] sm:$0xf] %vm4651_vm15, %v1789_v61  ;;  %v1858_v4 = vpop.permute.xlu2 %1857 }
 0x166   : > { %1903 = vst.msk [vmem:[#allocation2 + $0x4] sm:$0xf] %vm1901_vm2, %v3867_v57  ;;  %v1555_v57 = vsel %vm3667_vm8, %v1550_v18, %v1554_v30  ;;  %v3017_v18 = vrot.slane %v3891_v41, 9  ;;  %v1572_v30 = vrot.slane %v1570_v62, 5 }
 0x169   : > { %1952 = vrot.lane.b32.xlu0 %v1541_v52, %s4645_s26  ;;  %2092 = vrot.lane.b32.xlu1 %v3808_v34, %s4641_s28  ;;  %v3962_v34 = vpack.c.bf16 %v1384_v28, %v1384_v28  ;;  %v969_v52 = vpop.f32.mrf.mxu0  ;;  %v1576_v28 = vshll.u32 %v3876_v31, 16  ;;  %s4683_s28 = smov 16  }
 0x16a   : > { %v970_v58 = vadd.f32 %v3985_v54, %v969_v52 }
 0x16b   : > { %v1791_v11 = vpop.permute.xlu0 %1790  ;;  %v1643_v37 = vpop.permute.xlu1 %1642  ;;  %2027 = vrot.lane.b32.xlu2 %v1761_v9, %s3315_s25  ;;  %1439 = vst.msk [vmem:[#allocation2 + $0x30] sm:$0xf] %vm1426_vm12, %v3962_v34  ;;  %v1594_v10 = vshll.u32 %v3962_v34, 16  ;;  %v3018_v13 = vrot.slane %v3962_v34, 9 }
 0x16c   : > { %1689 = vst.msk [vmem:[#allocation2 + $0x8] sm:$0xf] %vm4652_vm13, %v1643_v37  ;;  %v1003_v63 = vmax.f32 %v970_v58, 0.0 }
 0x16d   : > { %1837 = vst.msk [vmem:[#allocation2 + $0x8] sm:$0xf] %vm4651_vm15, %v1791_v11  ;;  %v2085_v3 = vpop.permute.xlu2 %2084  ;;  %v3103_v11 = vld [vmem:[%s4630_s2 + $0x8] sm:$0xff] }
 0x16e   : > { %1904 = vst.msk [vmem:[#allocation2 + $0x8] sm:$0xf] %vm1901_vm2, %v1858_v4  ;;  %v1083_v4 = vrot.slane %v1003_v63, 2  ;;  %v1084_v5 = vrot.slane %v1003_v63, 4  ;;  %2423 = vmatpush.bf16.msra.mxu1 %v3103_v11  ;;  %v1085_v23 = vrot.slane %v1003_v63, 6 }
 0x16f   : > { %1306 = vst [vmem:[#allocation1 + $0x1] ss:$4 sm:$0xff] %v1003_v63 }
 0x170   : > { %1307 = vst [vmem:[#allocation1 + $0x2] ss:$4 sm:$0xff] %v1083_v4 }
 0x171   : > { %1802 = vrot.lane.b32.xlu0 %v1761_v9, %s4654_s18  ;;  %2252 = vrot.lane.b32.xlu1 %v1761_v9, %s4639_s29  ;;  %1308 = vst [vmem:[#allocation1 + $0x3] ss:$4 sm:$0xff] %v1084_v5 }
 0x172   : > { %2424 = vmatpush.bf16.msra.mxu1 %v3102_v16  ;;  %v1596_v16 = vrot.slane %v1594_v10, 5 }
 0x173   : > { %v1943_v25 = vpop.permute.xlu0 %1942  ;;  %v1793_v26 = vpop.permute.xlu1 %1792  ;;  %2179 = vrot.lane.b32.xlu2 %v1555_v57, %s4647_s17 }
 0x174   : > { %1991 = vst.msk [vmem:[#allocation2] sm:$0xf] %vm1990_vm14, %v1943_v25  ;;  %v1573_v25 = vor.u32 %v1572_v30, %v1569_v20  ;;  %v1600_v30 = vshll.u32 %v3946_v22, 16 }
 0x175   : > { %1838 = vst.msk [vmem:[#allocation2 + $0xc] sm:$0xf] %vm4651_vm15, %v1793_v26  ;;  %v3960_v15 = vpop.permute.xlu2 %2244  ;;  %v1107_v26 = vadd.s32 8, %v3594_v46 }
 0x176   : > { %2064 = vst.msk [vmem:[#allocation2] sm:$0xf] %vm2063_vm1, %v3893_v44  ;;  %v1574_v39 = vrot.slane %v1573_v25, 4 }
 0x178   : > { %v1310_v32 = vld.sshfl [vmem:[#allocation1] sm:$0xff pattern:$0x73625140] }
 0x179   : > { %1954 = vrot.lane.b32.xlu0 %v1555_v57, %s4645_s26  ;;  %1654 = vrot.lane.b32.xlu1 %v1555_v57, %s4643_s24  ;;  %v1106_v57 = vadd.s32 7, %v3594_v46 }
 0x17b   : > { %v2018_v43 = vpop.permute.xlu0 %2017  ;;  %v1945_v44 = vpop.permute.xlu1 %1944  ;;  %2254 = vrot.lane.b32.xlu2 %v1764_v36, %s4639_s29  ;;  %vm1120_vm0 = vcmp.ge.s32.totalorder %v1106_v57, 1  ;;  %s4684_s29 = smov 4  }
 0x17c   : > { %1992 = vst.msk [vmem:[#allocation2 + $0x4] sm:$0xf] %vm1990_vm14, %v1945_v44  ;;  %v1578_v44 = vrot.slane %v1576_v28, 5  ;;  %v1604_v28 = vshrl.u32 %v3946_v22, 16 }
 0x17d   : > { %2065 = vst.msk [vmem:[#allocation2 + $0x4] sm:$0xf] %vm2063_vm1, %v2018_v43  ;;  %v1647_v47 = vpop.permute.xlu2 %1646 }
 0x17e   : > { %1691 = vst.msk [vmem:[#allocation2 + $0x10] sm:$0xf] %vm4652_vm13, %v1647_v47  ;;  %v1579_v45 = vsel %vm3667_vm8, %v1574_v39, %v1578_v44  ;;  %v1606_v39 = vrot.slane %v1604_v28, 4 }
 0x17f   : > { %2132 = vst.msk [vmem:[#allocation2 + $0x4] sm:$0xf] %vm4653_vm4, %v2085_v3 }
 0x181   : > { %2029 = vrot.lane.b32.xlu0 %v1764_v36, %s3315_s25  ;;  %1804 = vrot.lane.b32.xlu1 %v1764_v36, %s4654_s18 }
 0x183   : > { %v1860_v60 = vpop.permute.xlu0 %1859  ;;  %v2083_v61 = vpop.permute.xlu1 %2082  ;;  %1656 = vrot.lane.b32.xlu2 %v1565_v53, %s4643_s24  ;;  %s4681_s24 = smov 32  }
 0x184   : > { %1905 = vst.msk [vmem:[#allocation2 + $0xc] sm:$0xf] %vm1901_vm2, %v1860_v60 }
 0x185   : > { %2131 = vst.msk [vmem:[#allocation2] sm:$0xf] %vm4653_vm4, %v2083_v61  ;;  %v3993_v0 = vpop.permute.xlu2 %1796 }
 0x189   : > { %2181 = vrot.lane.b32.xlu0 %v1565_v53, %s4647_s17  ;;  %1956 = vrot.lane.b32.xlu1 %v1565_v53, %s4645_s26  ;;  %s4678_s17 = smov 24   ;;  %s4682_s26 = smov 28   ;;  %v1583_v53 = vor.u32 %v1582_v27, %v1578_v44 }
 0x18b   : > { %v2020_v8 = vpop.permute.xlu0 %2019  ;;  %v1795_v9 = vpop.permute.xlu1 %1794  ;;  %1869 = vrot.lane.b32.xlu2 %v3891_v41, %s3313_s21  ;;  %v1584_v63 = vrot.slane %v1583_v53, 4 }
 0x18c   : > { %1839 = vst.msk [vmem:[#allocation2 + $0x10] sm:$0xf] %vm4651_vm15, %v1795_v9  ;;  %vm1130_vm15 = vcmp.le.s32.totalorder %v1106_v57, 16  ;;  %v1591_v9 = vshrl.u32 %v3962_v34, 16 }
 0x18d   : > { %v2087_v37 = vpop.permute.xlu2 %2086  ;;  %vm4029_vm13 = vmand %vm1120_vm0, %vm1130_vm15  ;;  %vm4686_vm15 = vcmask 93248  }
 0x18e   : > { %vm1196_vm0 = vmand %vm3869_vm10, %vm1178_vm7  ;;  %v1388_v38 = vsel %vm4029_vm13, %v1310_v32, 0.0  ;;  %vm2389_vm10 = vcmask 293888   ;;  %v1593_v62 = vrot.slane %v1591_v9, 4 }
 0x18f   : > { %v4051_v19 = vpack.c.bf16 %v1388_v38, %v1388_v38  ;;  %v1383_v24 = vsel %vm1196_vm0, %v3889_v40, 0.0  ;;  %v1769_v40 = vrot.slane %v1767_v56, 4  ;;  %vm1199_vm0 = vmand %vm3938_vm11, %vm1178_vm7  ;;  %v972_v38 = vpop.f32.mrf.mxu0 }
 0x190   : > { %v1413_v47 = vpack.c.bf16 %v1383_v24, %v1383_v24  ;;  %v1597_v20 = vor.u32 %v1596_v16, %v1593_v62 }
 0x191   : > { %1871 = vrot.lane.b32.xlu0 %v3876_v31, %s3313_s21  ;;  %2094 = vrot.lane.b32.xlu1 %v3891_v41, %s4678_s17  ;;  %v1768_v41 = vsel %vm3640_vm6, %v3017_v18, %v1767_v56  ;;  %1442 = vst.msk [vmem:[#allocation2 + $0x3c] sm:$0xf] %vm1426_vm12, %v4051_v19 }
 0x192   : > { %v1770_v51 = vrot.slane %v1413_v47, 5  ;;  %v1586_v58 = vshll.u32 %v1413_v47, 16  ;;  %v1598_v57 = vrot.slane %v1597_v20, 4 }
 0x193   : > { %v2172_v17 = vpop.permute.xlu0 %2171  ;;  %v1947_v3 = vpop.permute.xlu1 %1946  ;;  %2096 = vrot.lane.b32.xlu2 %v3876_v31, %s4678_s17 }
 0x194   : > { %2220 = vst.msk [vmem:[#allocation2] sm:$0xf] %vm2219_vm3, %v2172_v17  ;;  %v1771_v31 = vsel %vm3640_vm6, %v1769_v40, %v1770_v51  ;;  %v1588_v4 = vrot.slane %v1586_v58, 5 }
 0x195   : > { %2293 = vst.msk [vmem:[#allocation2] sm:$0xf] %vm2292_vm5, %v3960_v15  ;;  %v1949_v42 = vpop.permute.xlu2 %1948  ;;  %v1304_v15 = vld.sshfl [vmem:[#allocation1 + $0x20] sm:$0xff pattern:$0x73625140] }
 0x196   : > { %1993 = vst.msk [vmem:[#allocation2 + $0x8] sm:$0xf] %vm1990_vm14, %v1947_v3  ;;  %v1589_v7 = vsel %vm3667_vm8, %v1584_v63, %v1588_v4  ;;  %v1774_v3 = vrot.slane %v3946_v22, 5 }
 0x197   : > { %2066 = vst.msk [vmem:[#allocation2 + $0x8] sm:$0xf] %vm2063_vm1, %v2020_v8  ;;  %v974_v40 = vpop.f32.mrf.mxu0 }
 0x198   : > { %2133 = vst.msk [vmem:[#allocation2 + $0x8] sm:$0xf] %vm4653_vm4, %v2087_v37  ;;  %vm1167_vm4 = vmand %vm4029_vm13, %vm1143_vm9  ;;  %v1775_v18 = vsel %vm3640_vm6, %v3018_v13, %v1774_v3 }
 0x199   : > { %1994 = vst.msk [vmem:[#allocation2 + $0xc] sm:$0xf] %vm1990_vm14, %v1949_v42  ;;  %2031 = vrot.lane.b32.xlu0 %v1768_v41, %s3315_s25  ;;  %1806 = vrot.lane.b32.xlu1 %v1768_v41, %s4654_s18  ;;  %v1387_v29 = vsel %vm1167_vm4, %v1304_v15, 0.0  ;;  %vm4687_vm4 = vcmask 224448  }
 0x19a   : > { %1309 = vst [vmem:[#allocation1 + $0x20] ss:$4 sm:$0xff] %v1085_v23  ;;  %v4046_v36 = vpack.c.bf16 %v1387_v29, %v1387_v29  ;;  %v1386_v23 = vsel %vm1199_vm0, %v3988_v59, 0.0  ;;  %v1776_v59 = vrot.slane %v1774_v3, 4  ;;  %vm4688_vm11 = vmmov %vm4687_vm4 }
 0x19b   : > { %v2247_v14 = vpop.permute.xlu0 %2246  ;;  %v2022_v35 = vpop.permute.xlu1 %2021  ;;  %2256 = vrot.lane.b32.xlu2 %v1768_v41, %s4681_s24  ;;  %v1602_v41 = vrot.slane %v1600_v30, 5  ;;  %v1416_v25 = vpack.c.bf16 %v1386_v23, %v1386_v23  ;;  %vm4690_vm0 = vmmov %vm4686_vm15  ;;  %v1624_v23 = vshll.u32 %v4051_v19, 16 }
 0x19c   : > { %2067 = vst.msk [vmem:[#allocation2 + $0xc] sm:$0xf] %vm2063_vm1, %v2022_v35  ;;  %v3019_v3 = vrot.slane %v4046_v36, 9 }
 0x19d   : > { %v4053_v43 = vpop.permute.xlu2 %1798  ;;  %1441 = vst.msk [vmem:[#allocation2 + $0x38] sm:$0xf] %vm1426_vm12, %v4046_v36  ;;  %vm4685_vm12 = vcmask 60448   ;;  %v1603_v21 = vsel %vm3667_vm8, %v1598_v57, %v1602_v41  ;;  %v1777_v32 = vrot.slane %v1416_v25, 5  ;;  %v1607_v44 = vor.u32 %v1606_v39, %v1602_v41 }
 0x19f   : > { %v1778_v24 = vsel %vm3640_vm6, %v1776_v59, %v1777_v32  ;;  %v1608_v51 = vrot.slane %v1607_v44, 4 }
 0x1a1   : > { %2183 = vrot.lane.b32.xlu0 %v1579_v45, %s4682_s26  ;;  %1958 = vrot.lane.b32.xlu1 %v1579_v45, %s4683_s28  ;;  %v1311_v9 = vld.sshfl [vmem:[#allocation1 + $0x20] sm:$0xff pattern:$0x73625140] }
 0x1a3   : > { %v1862_v49 = vpop.permute.xlu0 %1861  ;;  %v2174_v50 = vpop.permute.xlu1 %2173  ;;  %1658 = vrot.lane.b32.xlu2 %v1579_v45, %s4684_s29  ;;  %v1610_v45 = vshll.u32 %v1416_v25, 16 }
 0x1a4   : > { %1906 = vst.msk [vmem:[#allocation2 + $0x10] sm:$0xf] %vm1901_vm2, %v1862_v49 }
 0x1a5   : > { %2221 = vst.msk [vmem:[#allocation2 + $0x4] sm:$0xf] %vm2219_vm3, %v2174_v50  ;;  %v1951_v52 = vpop.permute.xlu2 %1950  ;;  %v1612_v27 = vrot.slane %v1610_v45, 5 }
 0x1a6   : > { %2294 = vst.msk [vmem:[#allocation2 + $0x4] sm:$0xf] %vm2292_vm5, %v2247_v14 }
 0x1a7   : > { %1995 = vst.msk [vmem:[#allocation2 + $0x10] sm:$0xf] %vm1990_vm14, %v1951_v52 }
 0x1a9   : > { %2258 = vrot.lane.b32.xlu0 %v1771_v31, %s4681_s24  ;;  %2033 = vrot.lane.b32.xlu1 %v1771_v31, %s3315_s25 }
 0x1ab   : > { %v1649_v60 = vpop.permute.xlu0 %1648  ;;  %v1864_v61 = vpop.permute.xlu1 %1863  ;;  %1808 = vrot.lane.b32.xlu2 %v1771_v31, %s4654_s18  ;;  %v975_v31 = vadd.f32 %v3985_v54, %v974_v40 }
 0x1ac   : > { %1692 = vst.msk [vmem:[#allocation2 + $0x14] sm:$0xf] %vm4685_vm12, %v1649_v60  ;;  %v977_v60 = vpop.f32.mrf.mxu2 }
 0x1ad   : > { %1840 = vst.msk [vmem:[#allocation2 + $0x14] sm:$0xf] %vm4686_vm15, %v3993_v0  ;;  %v4078_v5 = vpop.permute.xlu2 %2025  ;;  %v3094_v6 = vld [vmem:[#allocation2] sm:$0xff]  ;;  %v1005_v58 = vmax.f32 %v975_v31, 0.0  ;;  %v1628_v31 = vshrl.u32 %v4051_v19, 16 }
 0x1ae   : > { %1907 = vst.msk [vmem:[#allocation2 + $0x14] sm:$0xf] %vm1901_vm2, %v1864_v61  ;;  %3062 = vmatmul.msk.bf16.vlgmr.msra.gmra.mxu1 %vm2389_vm10, %v3094_v6  ;;  %v1613_v61 = vsel %vm3667_vm8, %v1608_v51, %v1612_v27 }
 0x1af   : > { %1316 = vst [vmem:[#allocation1 + $0x20] ss:$4 sm:$0xff] %v1005_v58 }
 0x1b1   : > { %1660 = vrot.lane.b32.xlu0 %v1589_v7, %s4684_s29  ;;  %2185 = vrot.lane.b32.xlu1 %v1589_v7, %s4682_s26 }
 0x1b3   : > { %v2089_v1 = vpop.permute.xlu0 %2088  ;;  %v2024_v8 = vpop.permute.xlu1 %2023  ;;  %1960 = vrot.lane.b32.xlu2 %v1589_v7, %s4683_s28  ;;  %v1089_v7 = vrot.slane %v1005_v58, 2 }
 0x1b4   : > { %2134 = vst.msk [vmem:[#allocation2 + $0xc] sm:$0xf] %vm4687_vm4, %v2089_v1  ;;  %vm4689_vm4 = vmmov %vm4685_vm12  ;;  %v1090_v1 = vrot.slane %v1005_v58, 4  ;;  %v979_v10 = vpop.f32.mrf.mxu2 }
 0x1b5   : > { %2068 = vst.msk [vmem:[#allocation2 + $0x10] sm:$0xf] %vm2063_vm1, %v2024_v8  ;;  %v2178_v0 = vpop.permute.xlu2 %2177  ;;  %v978_v8 = vadd.f32 %v3985_v54, %v977_v60 }
 0x1b6   : > { %2223 = vst.msk [vmem:[#allocation2 + $0xc] sm:$0xf] %vm2219_vm3, %v2178_v0  ;;  %v1091_v0 = vrot.slane %v1005_v58, 6 }
 0x1b7   : > { %1317 = vst [vmem:[#allocation1 + $0x21] ss:$4 sm:$0xff] %v1089_v7 }
 0x1b8   : > { %1318 = vst [vmem:[#allocation1 + $0x22] ss:$4 sm:$0xff] %v1090_v1 }
 0x1b9   : > { %1873 = vrot.lane.b32.xlu0 %v3962_v34, %s3313_s21  ;;  %1875 = vrot.lane.b32.xlu1 %v3946_v22, %s3313_s21  ;;  %1319 = vst [vmem:[#allocation1 + $0x23] ss:$4 sm:$0xff] %v1091_v0 }
 0x1bb   : > { %v2249_v11 = vpop.permute.xlu0 %2248  ;;  %v2176_v37 = vpop.permute.xlu1 %2175  ;;  %2098 = vrot.lane.b32.xlu2 %v3962_v34, %s4678_s17 }
 0x1bc   : > { %2222 = vst.msk [vmem:[#allocation2 + $0x8] sm:$0xf] %vm2219_vm3, %v2176_v37  ;;  %v1006_v37 = vmax.f32 %v978_v8, 0.0 }
 0x1bd   : > { %2295 = vst.msk [vmem:[#allocation2 + $0x8] sm:$0xf] %vm2292_vm5, %v2249_v11  ;;  %v1868_v17 = vpop.permute.xlu2 %1867  ;;  %v1618_v11 = vshll.u32 %v4046_v36, 16 }
 0x1be   : > { %v1092_v28 = vrot.slane %v1006_v37, 2  ;;  %v1093_v59 = vrot.slane %v1006_v37, 4  ;;  %v1094_v32 = vrot.slane %v1006_v37, 6 }
 0x1bf   : > { %v1620_v30 = vrot.slane %v1618_v11, 5 }
 0x1c1   : > { %2100 = vrot.lane.b32.xlu0 %v3946_v22, %s4678_s17  ;;  %2035 = vrot.lane.b32.xlu1 %v1775_v18, %s3315_s25 }
 0x1c3   : > { %v1651_v34 = vpop.permute.xlu0 %1650  ;;  %v2251_v42 = vpop.permute.xlu1 %2250  ;;  %1810 = vrot.lane.b32.xlu2 %v1775_v18, %s4654_s18 }
 0x1c4   : > { %1693 = vst.msk [vmem:[#allocation2 + $0x18] sm:$0xf] %vm4685_vm12, %v1651_v34  ;;  %vm4691_vm12 = vmmov %vm4688_vm11  ;;  %v982_v34 = vpop.f32.mrf.mxu2 }
 0x1c5   : > { %1841 = vst.msk [vmem:[#allocation2 + $0x18] sm:$0xf] %vm4686_vm15, %v4053_v43  ;;  %v4116_v56 = vpop.permute.xlu2 %2027  ;;  %v973_v43 = vadd.f32 %v3985_v54, %v972_v38  ;;  %vm4692_vm15 = vmmov %vm4689_vm4  ;;  %v1321_v38 = vld.sshfl [vmem:[#allocation1 + $0x20] sm:$0xff pattern:$0x73625140] }
 0x1c6   : > { %2296 = vst.msk [vmem:[#allocation2 + $0xc] sm:$0xf] %vm2292_vm5, %v2251_v42 }
 0x1c7   : > { %v1004_v22 = vmax.f32 %v973_v43, 0.0  ;;  %1324 = vst [vmem:[#allocation1 + $0x20] ss:$4 sm:$0xff] %v1092_v28 }
 0x1c8   : > { %1325 = vst [vmem:[#allocation1 + $0x21] ss:$4 sm:$0xff] %v1093_v59 }
 0x1c9   : > { %2260 = vrot.lane.b32.xlu0 %v1775_v18, %s4681_s24  ;;  %2187 = vrot.lane.b32.xlu1 %v1603_v21, %s4682_s26  ;;  %1312 = vst [vmem:[#allocation1] ss:$4 sm:$0xff] %v1004_v22  ;;  %v1086_v50 = vrot.slane %v1004_v22, 2  ;;  %v1087_v52 = vrot.slane %v1004_v22, 4  ;;  %v1088_v53 = vrot.slane %v1004_v22, 6  ;;  %v1781_v18 = vrot.slane %v4051_v19, 5 }
 0x1ca   : > { %1326 = vst [vmem:[#allocation1 + $0x22] ss:$4 sm:$0xff] %v1094_v32 }
 0x1cb   : > { %v1801_v15 = vpop.permute.xlu0 %1800  ;;  %v1866_v29 = vpop.permute.xlu1 %1865  ;;  %1962 = vrot.lane.b32.xlu2 %v1603_v21, %s4683_s28  ;;  %1313 = vst [vmem:[#allocation1 + $0x1] ss:$4 sm:$0xff] %v1086_v50  ;;  %v1782_v42 = vsel %vm3640_vm6, %v3019_v3, %v1781_v18  ;;  %v1783_v51 = vrot.slane %v1781_v18, 4 }
 0x1cc   : > { %1908 = vst.msk [vmem:[#allocation2 + $0x18] sm:$0xf] %vm1901_vm2, %v1866_v29  ;;  %v4182_v29 = vrot.slane %v1624_v23, 5  ;;  %v984_v39 = vpop.f32.mrf.mxu2 }
 0x1cd   : > { %v3095_v14 = vld [vmem:[#allocation2 + $0x8] sm:$0xff]  ;;  %v2180_v35 = vpop.permute.xlu2 %2179  ;;  %1314 = vst [vmem:[#allocation1 + $0x2] ss:$4 sm:$0xff] %v1087_v52 }
 0x1ce   : > { %3063 = vmatmul.msk.bf16.gmra.mxu1 %vm2389_vm10, %v3095_v14  ;;  %1315 = vst [vmem:[#allocation1 + $0x3] ss:$4 sm:$0xff] %v1088_v53 }
 0x1d1   : > { %1662 = vrot.lane.b32.xlu0 %v1603_v21, %s4684_s29  ;;  %2262 = vrot.lane.b32.xlu1 %v1778_v24, %s4681_s24 }
 0x1d3   : > { %v2091_v47 = vpop.permute.xlu0 %2090  ;;  %v1653_v48 = vpop.permute.xlu1 %1652  ;;  %2037 = vrot.lane.b32.xlu2 %v1778_v24, %s3315_s25 }
 0x1d4   : > { %2135 = vst.msk [vmem:[#allocation2 + $0x10] sm:$0xf] %vm4688_vm11, %v2091_v47  ;;  %vm1202_vm11 = vmand %vm4029_vm13, %vm1178_vm7  ;;  %vm1121_vm13 = vcmp.ge.s32.totalorder %v1107_v26, 1 }
 0x1d5   : > { %2224 = vst.msk [vmem:[#allocation2 + $0x10] sm:$0xf] %vm2219_vm3, %v2180_v35  ;;  %v4136_v49 = vpop.permute.xlu2 %2254  ;;  %v1389_v14 = vsel %vm1202_vm11, %v1311_v9, 0.0 }
 0x1d6   : > { %1694 = vst.msk [vmem:[#allocation2 + $0x1c] sm:$0xf] %vm4689_vm4, %v1653_v48 }
 0x1d7   : > { %1842 = vst.msk [vmem:[#allocation2 + $0x1c] sm:$0xf] %vm4690_vm0, %v1801_v15 }
 0x1d8   : > { %1909 = vst.msk [vmem:[#allocation2 + $0x1c] sm:$0xf] %vm1901_vm2, %v1868_v17  ;;  %v4162_v17 = vld.sshfl [vmem:[#allocation1] sm:$0xff pattern:$0x73625140] }
 0x1d9   : > { %1812 = vrot.lane.b32.xlu0 %v1778_v24, %s4654_s18  ;;  %1877 = vrot.lane.b32.xlu1 %v4046_v36, %s3313_s21  ;;  %1322 = vst [vmem:[#allocation1] ss:$4 sm:$0xff] %v1006_v37  ;;  %v1419_v24 = vpack.c.bf16 %v1389_v14, %v1389_v14 }
 0x1db   : > { %v1953_v63 = vpop.permute.xlu0 %1952  ;;  %v2093_v4 = vpop.permute.xlu1 %2092  ;;  %2189 = vrot.lane.b32.xlu2 %v1613_v61, %s4682_s26  ;;  %v1784_v27 = vrot.slane %v1419_v24, 5  ;;  %v1634_v8 = vshll.u32 %v1419_v24, 16 }
 0x1dc   : > { %1996 = vst.msk [vmem:[#allocation2 + $0x14] sm:$0xf] %vm1990_vm14, %v1953_v63 }
 0x1dd   : > { %2069 = vst.msk [vmem:[#allocation2 + $0x14] sm:$0xf] %vm2063_vm1, %v4078_v5  ;;  %v1657_v6 = vpop.permute.xlu2 %1656  ;;  %v1615_v5 = vshrl.u32 %v4046_v36, 16  ;;  %v1785_v53 = vsel %vm3640_vm6, %v1783_v51, %v1784_v27 }
 0x1de   : > { %2136 = vst.msk [vmem:[#allocation2 + $0x14] sm:$0xf] %vm4691_vm12, %v2093_v4  ;;  %vm1131_vm12 = vcmp.le.s32.totalorder %v1107_v26, 16 }
 0x1df   : > { %1696 = vst.msk [vmem:[#allocation2 + $0x24] sm:$0xf] %vm4692_vm15, %v1657_v6  ;;  %v1617_v20 = vrot.slane %v1615_v5, 4  ;;  %vm4693_vm15 = vmmov %vm4690_vm0  ;;  %v1636_v5 = vrot.slane %v1634_v8, 5 }
 0x1e0   : > { %v4197_v40 = vld.sshfl [vmem:[#allocation1] sm:$0xff pattern:$0x73625140]  ;;  %vm4199_vm11 = vmand %vm1121_vm13, %vm1131_vm12  ;;  %vm4697_vm13 = vcmask 60448  }
 0x1e1   : > { %2102 = vrot.lane.b32.xlu0 %v4046_v36, %s4678_s17  ;;  %1664 = vrot.lane.b32.xlu1 %v1613_v61, %s4684_s29  ;;  %v1621_v57 = vor.u32 %v1620_v30, %v1617_v20  ;;  %v980_v36 = vadd.f32 %v3985_v54, %v979_v10  ;;  %v1391_v11 = vsel %vm4199_vm11, %v1321_v38, 0.0 }
 0x1e3   : > { %v1803_v13 = vpop.permute.xlu0 %1802  ;;  %v2253_v62 = vpop.permute.xlu1 %2252  ;;  %1879 = vrot.lane.b32.xlu2 %v4051_v19, %s3313_s21  ;;  %v1622_v15 = vrot.slane %v1621_v57, 4  ;;  %v1007_v35 = vmax.f32 %v980_v36, 0.0 }
 0x1e4   : > { %2297 = vst.msk [vmem:[#allocation2 + $0x10] sm:$0xf] %vm2292_vm5, %v2253_v62 }
 0x1e5   : > { %v1870_v16 = vpop.permute.xlu2 %1869  ;;  %v1627_v43 = vsel %vm3667_vm8, %v1622_v15, %v4182_v29  ;;  %v1095_v22 = vrot.slane %v1007_v35, 2  ;;  %v1096_v47 = vrot.slane %v1007_v35, 4  ;;  %1327 = vst [vmem:[#allocation1 + $0x23] ss:$4 sm:$0xff] %v1007_v35 }
 0x1e7   : > { %1329 = vst [vmem:[#allocation1] ss:$4 sm:$0xff] %v1095_v22  ;;  %v2490_v22 = vld [vmem:[%s4631_s3] sm:$0x3] }
 0x1e8   : > { %1330 = vst [vmem:[#allocation1 + $0x1] ss:$4 sm:$0xff] %v1096_v47 }
 0x1e9   : > { %1964 = vrot.lane.b32.xlu0 %v1613_v61, %s4683_s28  ;;  %2104 = vrot.lane.b32.xlu1 %v4051_v19, %s4678_s17  ;;  %v1630_v61 = vrot.slane %v1628_v31, 4 }
 0x1eb   : > { %v1955_v41 = vpop.permute.xlu0 %1954  ;;  %v1655_v21 = vpop.permute.xlu1 %1654  ;;  %2039 = vrot.lane.b32.xlu2 %v1782_v42, %s3315_s25  ;;  %v1631_v1 = vor.u32 %v1630_v61, %v4182_v29 }
 0x1ec   : > { %1997 = vst.msk [vmem:[#allocation2 + $0x18] sm:$0xf] %vm1990_vm14, %v1955_v41  ;;  %v4221_v7 = vld.sshfl [vmem:[#allocation1 + $0x20] sm:$0xff pattern:$0x73625140] }
 0x1ed   : > { %2070 = vst.msk [vmem:[#allocation2 + $0x18] sm:$0xf] %vm2063_vm1, %v4116_v56  ;;  %v2097_v25 = vpop.permute.xlu2 %2096  ;;  %v983_v56 = vadd.f32 %v3985_v54, %v982_v34  ;;  %v1097_v54 = vrot.slane %v1007_v35, 6  ;;  %v1632_v10 = vrot.slane %v1631_v1, 4  ;;  %v1108_v34 = vadd.s32 9, %v3594_v46 }
 0x1ee   : > { %1695 = vst.msk [vmem:[#allocation2 + $0x20] sm:$0xf] %vm4689_vm4, %v1655_v21  ;;  %vm1170_vm4 = vmand %vm4199_vm11, %vm1143_vm9 }
 0x1ef   : > { %1843 = vst.msk [vmem:[#allocation2 + $0x20] sm:$0xf] %vm4690_vm0, %v1803_v13  ;;  %v1008_v50 = vmax.f32 %v983_v56, 0.0  ;;  %v1390_v19 = vsel %vm1170_vm4, %v4162_v17, 0.0  ;;  %vm4696_vm0 = vcmask 224448   ;;  %v4237_v13 = vpack.c.bf16 %v1391_v11, %v1391_v11  ;;  %vm1205_vm4 = vmand %vm4199_vm11, %vm1178_vm7 }
 0x1f0   : > { %1910 = vst.msk [vmem:[#allocation2 + $0x20] sm:$0xf] %vm1901_vm2, %v1870_v16  ;;  %v4219_v6 = vpack.c.bf16 %v1390_v19, %v1390_v19  ;;  %vm4698_vm12 = vmmov %vm4696_vm0  ;;  %v1637_v62 = vsel %vm3667_vm8, %v1632_v10, %v1636_v5  ;;  %v3194_v19 = vld [vmem:[%s3452_s20 + $0x14] sm:$0x1] }
 0x1f1   : > { %1814 = vrot.lane.b32.xlu0 %v1782_v42, %s4654_s18  ;;  %2264 = vrot.lane.b32.xlu1 %v1782_v42, %s4681_s24  ;;  %1331 = vst [vmem:[#allocation1 + $0x2] ss:$4 sm:$0xff] %v1097_v54  ;;  %v1098_v4 = vrot.slane %v1008_v50, 2  ;;  %v1928_v20 = vshll.u32 %v4237_v13, 16  ;;  %v1932_v30 = vshrl.u32 %v4237_v13, 16  ;;  %v2010_v14 = vrot.slane %v4237_v13, 5 }
 0x1f2   : > { %1332 = vst [vmem:[#allocation1 + $0x3] ss:$4 sm:$0xff] %v1008_v50  ;;  %v1919_v16 = vshrl.u32 %v4219_v6, 16  ;;  %v1922_v17 = vshll.u32 %v4219_v6, 16  ;;  %v3020_v32 = vrot.slane %v4219_v6, 9  ;;  %v2588_v61 = vshll.u32 %v3194_v19, 16 }
 0x1f3   : > { %v2030_v44 = vpop.permute.xlu0 %2029  ;;  %v1805_v45 = vpop.permute.xlu1 %1804  ;;  %2191 = vrot.lane.b32.xlu2 %v1627_v43, %s4682_s26  ;;  %1333 = vst [vmem:[#allocation1 + $0x20] ss:$4 sm:$0xff] %v1098_v4  ;;  %v1930_v41 = vrot.slane %v1928_v20, 5  ;;  %v1934_v21 = vrot.slane %v1932_v30, 4 }
 0x1f4   : > { %1844 = vst.msk [vmem:[#allocation2 + $0x24] sm:$0xf] %vm4693_vm15, %v1805_v45  ;;  %v1921_v42 = vrot.slane %v1919_v16, 4  ;;  %v1924_v57 = vrot.slane %v1922_v17, 5  ;;  %v2011_v39 = vsel %vm3640_vm6, %v3020_v32, %v2010_v14  ;;  %v3192_v45 = vld [vmem:[%s3452_s20 + $0xc] sm:$0xf] }
 0x1f5   : > { %v4195_v48 = vpop.permute.xlu2 %2256  ;;  %v1935_v59 = vor.u32 %v1934_v21, %v1930_v41  ;;  %v2571_v47 = vshrl.u32 %v3192_v45, 16  ;;  %v2574_v54 = vshll.u32 %v3192_v45, 16 }
 0x1f6   : > { %v1925_v36 = vor.u32 %v1924_v57, %v1921_v42 }
 0x1f7   : > { %v1936_v38 = vrot.slane %v1935_v59, 4 }
 0x1f8   : > { %v1926_v26 = vrot.slane %v1925_v36, 4 }
 0x1f9   : > { %1966 = vrot.lane.b32.xlu0 %v1627_v43, %s4683_s28  ;;  %1666 = vrot.lane.b32.xlu1 %v1627_v43, %s4684_s29  ;;  %v1334_v24 = vld.sshfl [vmem:[#allocation1] sm:$0xff pattern:$0x73625140] }
 0x1fa   : > { %v1931_v55 = vsel %vm3667_vm8, %v1926_v26, %v1930_v41  ;;  %v1335_v16 = vld.sshfl [vmem:[#allocation1 + $0x20] sm:$0xff pattern:$0x73625140]  ;;  %v2012_v41 = vrot.slane %v2010_v14, 4 }
 0x1fb   : > { %v2182_v58 = vpop.permute.xlu0 %2181  ;;  %v1957_v60 = vpop.permute.xlu1 %1956  ;;  %2266 = vrot.lane.b32.xlu2 %v1785_v53, %s4681_s24 }
 0x1fc   : > { %2225 = vst.msk [vmem:[#allocation2 + $0x14] sm:$0xf] %vm2219_vm3, %v2182_v58  ;;  %v2573_v58 = vrot.slane %v2571_v47, 4 }
 0x1fd   : > { %2298 = vst.msk [vmem:[#allocation2 + $0x14] sm:$0xf] %vm2292_vm5, %v4136_v49  ;;  %v1659_v63 = vpop.permute.xlu2 %1658 }
 0x1fe   : > { %1998 = vst.msk [vmem:[#allocation2 + $0x1c] sm:$0xf] %vm1990_vm14, %v1957_v60  ;;  %v2576_v60 = vrot.slane %v2574_v54, 5 }
 0x1ff   : > { %2071 = vst.msk [vmem:[#allocation2 + $0x1c] sm:$0xf] %vm2063_vm1, %v2030_v44  ;;  %v2739_v44 = vld [vmem:[%s4632_s4] sm:$0x3] }
 0x200   : > { %2138 = vst.msk [vmem:[#allocation2 + $0x1c] sm:$0xf] %vm4696_vm0, %v2097_v25  ;;  %vm1122_vm0 = vcmp.ge.s32.totalorder %v1108_v34, 1  ;;  %v1392_v25 = vsel %vm1205_vm4, %v4197_v40, 0.0  ;;  %v3193_v40 = vld [vmem:[%s3452_s20 + $0x10] sm:$0xf]  ;;  %v2577_v8 = vor.u32 %v2576_v60, %v2573_v58 }
 0x201   : > { %1697 = vst.msk [vmem:[#allocation2 + $0x28] sm:$0xf] %vm4697_vm13, %v1659_v63  ;;  %2041 = vrot.lane.b32.xlu0 %v1785_v53, %s3315_s25  ;;  %1816 = vrot.lane.b32.xlu1 %v1785_v53, %s4654_s18  ;;  %vm1132_vm13 = vcmp.le.s32.totalorder %v1108_v34, 16  ;;  %v4266_v29 = vpack.c.bf16 %v1392_v25, %v1392_v25  ;;  %v2579_v51 = vshll.u32 %v3193_v40, 16  ;;  %v2583_v27 = vshrl.u32 %v3193_v40, 16 }
 0x202   : > { %v2578_v10 = vrot.slane %v2577_v8, 4 }
 0x203   : > { %v1872_v49 = vpop.permute.xlu0 %1871  ;;  %v2095_v0 = vpop.permute.xlu1 %2094  ;;  %1881 = vrot.lane.b32.xlu2 %v4219_v6, %s3313_s21  ;;  %v1938_v56 = vshll.u32 %v4266_v29, 16  ;;  %v2013_v21 = vrot.slane %v4266_v29, 5 }
 0x204   : > { %1911 = vst.msk [vmem:[#allocation2 + $0x24] sm:$0xf] %vm1901_vm2, %v1872_v49  ;;  %v3096_v9 = vld [vmem:[#allocation2 + $0x10] sm:$0xff] }
 0x205   : > { %2137 = vst.msk [vmem:[#allocation2 + $0x18] sm:$0xf] %vm4698_vm12, %v2095_v0  ;;  %v4234_v37 = vpop.permute.xlu2 %1808  ;;  %3064 = vmatmul.msk.bf16.gmra.mxu1 %vm2389_vm10, %v3096_v9  ;;  %vm4260_vm12 = vmand %vm1122_vm0, %vm1132_vm13  ;;  %v1940_v63 = vrot.slane %v1938_v56, 5  ;;  %v2590_v9 = vrot.slane %v2588_v61, 5  ;;  %vm4705_vm13 = vcmask 93248  }
 0x206   : > { %vm1173_vm11 = vmand %vm4260_vm12, %vm1143_vm9  ;;  %vm4702_vm9 = vcmask 1041408   ;;  %v1394_v53 = vsel %vm4260_vm12, %v1334_v24, 0.0 }
 0x207   : > { %v1393_v43 = vsel %vm1173_vm11, %v4221_v7, 0.0  ;;  %vm4703_vm4 = vmmov %vm4702_vm9  ;;  %v2585_v7 = vrot.slane %v2583_v27, 4  ;;  %v4309_v49 = vpack.c.bf16 %v1394_v53, %v1394_v53  ;;  %v1941_v5 = vsel %vm3667_vm8, %v1936_v38, %v1940_v63  ;;  %v3195_v63 = vld [vmem:[%s3452_s20 + $0x18] sm:$0xf] }
 0x208   : > { %v2793_v50 = vsel %vm4703_vm4, %v2739_v44, 0  ;;  %v4305_v4 = vpack.c.bf16 %v1393_v43, %v1393_v43  ;;  %vm1208_vm0 = vmand %vm4260_vm12, %vm1178_vm7  ;;  %vm4704_vm7 = vcmask 60448   ;;  %vm4706_vm12 = vcmask 31744  }
 0x209   : > { %2193 = vrot.lane.b32.xlu0 %v1637_v62, %s4682_s26  ;;  %2106 = vrot.lane.b32.xlu1 %v4219_v6, %s4678_s17  ;;  %v2581_v6 = vrot.slane %v2579_v51, 5  ;;  %v2161_v20 = vshrl.u32 %v4309_v49, 16  ;;  %v1395_v57 = vsel %vm1208_vm0, %v1335_v16, 0.0  ;;  %v2239_v44 = vrot.slane %v4309_v49, 5  ;;  %vm4711_vm4 = vmmov %vm4706_vm12 }
 0x20a   : > { %2802 = vmatpush.bf16.msra.mxu3 %v2793_v50  ;;  %v2148_v11 = vshrl.u32 %v4305_v4, 16  ;;  %v1425_v59 = vpack.c.bf16 %v1395_v57, %v1395_v57  ;;  %v3021_v40 = vrot.slane %v4305_v4, 9 }
 0x20b   : > { %v2032_v3 = vpop.permute.xlu0 %2031  ;;  %v1807_v18 = vpop.permute.xlu1 %1806  ;;  %1668 = vrot.lane.b32.xlu2 %v1637_v62, %s4684_s29  ;;  %v2586_v0 = vor.u32 %v2585_v7, %v2581_v6  ;;  %v2163_v32 = vrot.slane %v2161_v20, 4  ;;  %v2241_v51 = vrot.slane %v2239_v44, 4  ;;  %v3196_v7 = vld [vmem:[%s3452_s20 + $0x1c] sm:$0xf] }
 0x20c   : > { %1845 = vst.msk [vmem:[#allocation2 + $0x28] sm:$0xf] %vm4693_vm15, %v1807_v18  ;;  %vm4701_vm15 = vcmask 224448   ;;  %v2157_v18 = vshll.u32 %v4309_v49, 16  ;;  %v2150_v36 = vrot.slane %v2148_v11, 4  ;;  %v2167_v14 = vshll.u32 %v1425_v59, 16 }
 0x20d   : > { %v1961_v23 = vpop.permute.xlu2 %1960  ;;  %v2587_v17 = vrot.slane %v2586_v0, 4  ;;  %v2242_v27 = vrot.slane %v1425_v59, 5  ;;  %vm4707_vm11 = vmmov %vm4701_vm15  ;;  %v2240_v19 = vsel %vm3640_vm6, %v3021_v40, %v2239_v44  ;;  %v2600_v8 = vshll.u32 %v3196_v7, 16 }
 0x20e   : > { %2000 = vst.msk [vmem:[#allocation2 + $0x24] sm:$0xf] %vm1990_vm14, %v1961_v23  ;;  %v2169_v24 = vrot.slane %v2167_v14, 5  ;;  %vm4712_vm0 = vmmov %vm4707_vm11 }
 0x20f   : > { %v2591_v30 = vsel %vm3667_vm8, %v2587_v17, %v2590_v9  ;;  %v2243_v61 = vsel %vm3640_vm6, %v2241_v51, %v2242_v27 }
 0x210   : > { %v2745_v23 = vunpack.c.l.b16 %v2591_v30 }
 0x211   : > { %1883 = vrot.lane.b32.xlu0 %v4237_v13, %s3313_s21  ;;  %1968 = vrot.lane.b32.xlu1 %v1637_v62, %s4683_s28  ;;  %v2151_v62 = vshll.u32 %v4305_v4, 16 }
 0x213   : > { %v2184_v28 = vpop.permute.xlu0 %2183  ;;  %v1959_v15 = vpop.permute.xlu1 %1958  ;;  %2108 = vrot.lane.b32.xlu2 %v4237_v13, %s4678_s17  ;;  %v2153_v25 = vrot.slane %v2151_v62, 5  ;;  %v2014_v13 = vsel %vm3640_vm6, %v2012_v41, %v2013_v21  ;;  %vm4709_vm6 = vmmov %vm4704_vm7 }
 0x214   : > { %2226 = vst.msk [vmem:[#allocation2 + $0x18] sm:$0xf] %vm2219_vm3, %v2184_v28 }
 0x215   : > { %2299 = vst.msk [vmem:[#allocation2 + $0x18] sm:$0xf] %vm2292_vm5, %v4195_v48  ;;  %v2099_v35 = vpop.permute.xlu2 %2098  ;;  %v2520_v48 = vsel %vm4702_vm9, %v2490_v22, 0  ;;  %v2154_v29 = vor.u32 %v2153_v25, %v2150_v36  ;;  %v4351_v22 = vld [vmem:[%s4634_s6] ss:$0 sm:$0xff]  ;;  %vm4710_vm9 = vmmov %vm4705_vm13 }
 0x216   : > { %1999 = vst.msk [vmem:[#allocation2 + $0x20] sm:$0xf] %vm1990_vm14, %v1959_v15  ;;  %2529 = vmatpush.bf16.msrb.mxu2 %v2520_v48  ;;  %v2159_v15 = vrot.slane %v2157_v18, 5 }
 0x217   : > { %2072 = vst.msk [vmem:[#allocation2 + $0x20] sm:$0xf] %vm2063_vm1, %v2032_v3  ;;  %v2582_v3 = vsel %vm3667_vm8, %v2578_v10, %v2581_v6  ;;  %v2155_v56 = vrot.slane %v2154_v29, 4  ;;  %v2595_v6 = vshll.u32 %v3195_v63, 16 }
 0x218   : > { %2139 = vst.msk [vmem:[#allocation2 + $0x20] sm:$0xf] %vm4701_vm15, %v2099_v35  ;;  %v2744_v2 = vunpack.c.l.b16 %v2582_v3  ;;  %vm4708_vm15 = vmmov %vm4706_vm12  ;;  %v3197_v3 = vld [vmem:[%s3452_s20 + $0x20] sm:$0x1] }
 0x219   : > { %2043 = vrot.lane.b32.xlu0 %v2011_v39, %s3315_s25  ;;  %1970 = vrot.lane.b32.xlu1 %v1931_v55, %s4683_s28  ;;  %v2160_v45 = vsel %vm3667_vm8, %v2155_v56, %v2159_v15  ;;  %v2597_v10 = vrot.slane %v2595_v6, 5  ;;  %v2609_v18 = vshll.u32 %v3197_v3, 16 }
 0x21a   : > { %v2760_v28 = vpack.c.b16 %v2745_v23, %v2744_v2 }
 0x21b   : > { %v2259_v52 = vpop.permute.xlu0 %2258  ;;  %v2034_v31 = vpop.permute.xlu1 %2033  ;;  %2268 = vrot.lane.b32.xlu2 %v2011_v39, %s4681_s24 }
 0x21c   : > { %2073 = vst.msk [vmem:[#allocation2 + $0x24] sm:$0xf] %vm2063_vm1, %v2034_v31  ;;  %3078 = vmatmul.msk.bf16.vlgmr.msra.gmra.mxu3 %vm4706_vm12, %v2760_v28  ;;  %vm4715_vm12 = vmmov %vm4711_vm4 }
 0x21d   : > { %v4307_v1 = vpop.permute.xlu2 %1810 }
 0x221   : > { %2195 = vrot.lane.b32.xlu0 %v1931_v55, %s4682_s26  ;;  %2197 = vrot.lane.b32.xlu1 %v1941_v5, %s4682_s26 }
 0x223   : > { %v1661_v34 = vpop.permute.xlu0 %1660  ;;  %v2186_v42 = vpop.permute.xlu1 %2185  ;;  %2110 = vrot.lane.b32.xlu2 %v4305_v4, %s4678_s17  ;;  %v2592_v4 = vshrl.u32 %v3195_v63, 16 }
 0x224   : > { %1698 = vst.msk [vmem:[#allocation2 + $0x2c] sm:$0xf] %vm4704_vm7, %v1661_v34  ;;  %v2611_v34 = vrot.slane %v2609_v18, 5  ;;  %vm4713_vm7 = vmmov %vm4709_vm6 }
 0x225   : > { %1846 = vst.msk [vmem:[#allocation2 + $0x2c] sm:$0xf] %vm4705_vm13, %v4234_v37  ;;  %v1963_v46 = vpop.permute.xlu2 %1962  ;;  %v2164_v37 = vor.u32 %v2163_v32, %v2159_v15  ;;  %v2594_v9 = vrot.slane %v2592_v4, 4  ;;  %vm4714_vm13 = vmmov %vm4710_vm9 }
 0x226   : > { %2227 = vst.msk [vmem:[#allocation2 + $0x1c] sm:$0xf] %vm2219_vm3, %v2186_v42 }
 0x227   : > { %2300 = vst.msk [vmem:[#allocation2 + $0x1c] sm:$0xf] %vm2292_vm5, %v2259_v52  ;;  %v2165_v43 = vrot.slane %v2164_v37, 4  ;;  %v2598_v12 = vor.u32 %v2597_v10, %v2594_v9 }
 0x229   : > { %2270 = vrot.lane.b32.xlu0 %v2014_v13, %s4681_s24  ;;  %2045 = vrot.lane.b32.xlu1 %v2014_v13, %s3315_s25  ;;  %v2170_v47 = vsel %vm3667_vm8, %v2165_v43, %v2169_v24  ;;  %v2599_v30 = vrot.slane %v2598_v12, 4 }
 0x22b   : > { %v1874_v26 = vpop.permute.xlu0 %1873  ;;  %v1876_v35 = vpop.permute.xlu1 %1875  ;;  %1972 = vrot.lane.b32.xlu2 %v1941_v5, %s4683_s28  ;;  %v2602_v5 = vrot.slane %v2600_v8, 5  ;;  %s337_s28 = sand.u32 1, %s3286_s10  }
 0x22c   : > { %1912 = vst.msk [vmem:[#allocation2 + $0x28] sm:$0xf] %vm1901_vm2, %v1874_v26  ;;  %v2426_v38 = vpop.f32.mrf.mxu1  ;;  %s2995_s21 = sshll.u32 %s337_s28, 7 }
 0x22d   : > { %2001 = vst.msk [vmem:[#allocation2 + $0x28] sm:$0xf] %vm1990_vm14, %v1963_v46  ;;  %v4345_v39 = vpop.permute.xlu2 %2037  ;;  %v2427_v54 = vadd.f32 %v4351_v22, %v2426_v38  ;;  %v2603_v42 = vsel %vm3667_vm8, %v2599_v30, %v2602_v5  ;;  %s4480_s29 = scalar_lea.vmem [#allocation3], %s2995_s21  ;;  %s2894_s21 = scalar_lea.sflag [#allocation4], %s337_s28 }
 0x22e   : > { %1913 = vst.msk [vmem:[#allocation2 + $0x2c] sm:$0xf] %vm1901_vm2, %v1876_v35  ;;  %v3097_v55 = vld [vmem:[#allocation2 + $0x18] sm:$0xff]  ;;  %v2746_v23 = vunpack.c.l.b16 %v2603_v42 }
 0x22f   : > { %3065 = vmatmul.msk.bf16.gmra.mxu1 %vm2389_vm10, %v3097_v55  ;;  %v2466_v58 = vmax.f32 %v2427_v54, 0.0 }
 0x231   : > { %2112 = vrot.lane.b32.xlu0 %v4309_v49, %s4678_s17  ;;  %2199 = vrot.lane.b32.xlu1 %v2160_v45, %s4682_s26  ;;  %v2604_v49 = vshrl.u32 %v3196_v7, 16  ;;  %s3236_s17 = scalar_lea.hbm %s4637_s9, 512 }
 0x233   : > { %v2101_v48 = vpop.permute.xlu0 %2100  ;;  %v2036_v50 = vpop.permute.xlu1 %2035  ;;  %2201 = vrot.lane.b32.xlu2 %v2170_v47, %s4682_s26  ;;  %v2606_v11 = vrot.slane %v2604_v49, 4 }
 0x234   : > { %2140 = vst.msk [vmem:[#allocation2 + $0x24] sm:$0xf] %vm4707_vm11, %v2101_v48  ;;  %v2428_v52 = vpop.f32.mrf.mxu1  ;;  %vm4716_vm11 = vmmov %vm4712_vm0 }
 0x235   : > { %2074 = vst.msk [vmem:[#allocation2 + $0x28] sm:$0xf] %vm2063_vm1, %v2036_v50  ;;  %v2429_v31 = vadd.f32 %v4351_v22, %v2428_v52  ;;  %v2190_v53 = vpop.permute.xlu2 %2189  ;;  %v2607_v17 = vor.u32 %v2606_v11, %v2602_v5  ;;  %v3199_v52 = vld [vmem:[%s3452_s20 + $0x28] sm:$0xf] }
 0x236   : > { %2229 = vst.msk [vmem:[#allocation2 + $0x24] sm:$0xf] %vm2219_vm3, %v2190_v53  ;;  %v2625_v53 = vshrl.u32 %v3199_v52, 16 }
 0x237   : > { %v2467_v60 = vmax.f32 %v2429_v31, 0.0  ;;  %v2608_v2 = vrot.slane %v2607_v17, 4  ;;  %v2621_v31 = vshll.u32 %v3199_v52, 16 }
 0x238   : > { %v2627_v4 = vrot.slane %v2625_v53, 4 }
 0x239   : > { %v2482_v0 = vpack.c.bf16 %v2467_v60, %v2466_v58  ;;  %2272 = vrot.lane.b32.xlu0 %v2240_v19, %s4681_s24  ;;  %2274 = vrot.lane.b32.xlu1 %v2243_v61, %s4681_s24  ;;  %v2612_v57 = vsel %vm3667_vm8, %v2608_v2, %v2611_v34  ;;  %v3200_v58 = vld [vmem:[%s3452_s20 + $0x2c] sm:$0x1]  ;;  %v2623_v63 = vrot.slane %v2621_v31, 5 }
 0x23a   : > { %v2747_v41 = vunpack.c.l.b16 %v2612_v57  ;;  %v2630_v60 = vshll.u32 %v3200_v58, 16 }
 0x23b   : > { %v2261_v62 = vpop.permute.xlu0 %2260  ;;  %v2188_v16 = vpop.permute.xlu1 %2187  ;;  %3070 = vmatmul.msk.bf16.vlgmr.msrb.gmra.mxu2 %vm4708_vm15, %v2482_v0  ;;  %vm4717_vm15 = vmmov %vm4709_vm6  ;;  %v2628_v49 = vor.u32 %v2627_v4, %v2623_v63 }
 0x23c   : > { %2228 = vst.msk [vmem:[#allocation2 + $0x20] sm:$0xf] %vm2219_vm3, %v2188_v16  ;;  %v2761_v25 = vpack.c.b16 %v2747_v41, %v2746_v23  ;;  %v2632_v0 = vrot.slane %v2630_v60, 5 }
 0x23d   : > { %2301 = vst.msk [vmem:[#allocation2 + $0x20] sm:$0xf] %vm2292_vm5, %v2261_v62  ;;  %v1880_v20 = vpop.permute.xlu2 %1879  ;;  %v2629_v5 = vrot.slane %v2628_v49, 4 }
 0x23e   : > { %3079 = vmatmul.msk.bf16.gmra.mxu3 %vm4711_vm4, %v2761_v25  ;;  %vm4718_vm4 = vmmov %vm4710_vm9 }
 0x23f   : > { %v2633_v62 = vsel %vm3667_vm8, %v2629_v5, %v2632_v0  ;;  %v3204_v5 = vld [vmem:[%s3452_s20 + $0x3c] sm:$0xf] }
 0x240   : > { %v2749_v12 = vunpack.c.l.b16 %v2633_v62  ;;  %v2658_v62 = vshll.u32 %v3204_v5, 16 }
 0x243   : > { %v1663_v21 = vpop.permute.xlu0 %1662  ;;  %v2263_v36 = vpop.permute.xlu1 %2262 }
 0x244   : > { %1699 = vst.msk [vmem:[#allocation2 + $0x30] sm:$0xf] %vm4709_vm6, %v1663_v21 }
 0x245   : > { %1847 = vst.msk [vmem:[#allocation2 + $0x30] sm:$0xf] %vm4710_vm9, %v4307_v1  ;;  %v2040_v46 = vpop.permute.xlu2 %2039 }
 0x246   : > { %2302 = vst.msk [vmem:[#allocation2 + $0x24] sm:$0xf] %vm2292_vm5, %v2263_v36 }
 0x24b   : > { %v1813_v28 = vpop.permute.xlu0 %1812  ;;  %v1878_v15 = vpop.permute.xlu1 %1877 }
 0x24c   : > { %v2431_v59 = vpop.f32.mrf.mxu1  ;;  %1914 = vst.msk [vmem:[#allocation2 + $0x30] sm:$0xf] %vm1901_vm2, %v1878_v15 }
 0x24d   : > { %v3098_v32 = vld [vmem:[#allocation2 + $0x20] sm:$0xff]  ;;  %v2192_v13 = vpop.permute.xlu2 %2191  ;;  %v2432_v29 = vadd.f32 %v4351_v22, %v2431_v59 }
 0x24e   : > { %3066 = vmatmul.msk.bf16.gmra.mxu1 %vm2389_vm10, %v3098_v32 }
 0x24f   : > { %v2468_v38 = vmax.f32 %v2432_v29, 0.0 }
 0x253   : > { %v2103_v37 = vpop.permute.xlu0 %2102  ;;  %v1665_v14 = vpop.permute.xlu1 %1664 }
 0x254   : > { %2141 = vst.msk [vmem:[#allocation2 + $0x28] sm:$0xf] %vm4712_vm0, %v2103_v37  ;;  %v2433_v1 = vpop.f32.mrf.mxu1  ;;  %vm4719_vm0 = vmmov %vm4715_vm12 }
 0x255   : > { %2230 = vst.msk [vmem:[#allocation2 + $0x28] sm:$0xf] %vm2219_vm3, %v2192_v13  ;;  %v2434_v26 = vadd.f32 %v4351_v22, %v2433_v1  ;;  %v2267_v35 = vpop.permute.xlu2 %2266  ;;  %v3201_v13 = vld [vmem:[%s3452_s20 + $0x30] sm:$0xf] }
 0x256   : > { %1700 = vst.msk [vmem:[#allocation2 + $0x34] sm:$0xf] %vm4713_vm7, %v1665_v14  ;;  %vm4720_vm7 = vmmov %vm4716_vm11  ;;  %v2634_v29 = vshrl.u32 %v3201_v13, 16  ;;  %v2637_v37 = vshll.u32 %v3201_v13, 16  ;;  %v3202_v14 = vld [vmem:[%s3452_s20 + $0x34] sm:$0xf] }
 0x257   : > { %v2469_v56 = vmax.f32 %v2434_v26, 0.0  ;;  %1848 = vst.msk [vmem:[#allocation2 + $0x34] sm:$0xf] %vm4714_vm13, %v1813_v28  ;;  %vm4721_vm13 = vmmov %vm4720_vm7  ;;  %v2642_v1 = vshll.u32 %v3202_v14, 16  ;;  %v2646_v26 = vshrl.u32 %v3202_v14, 16 }
 0x258   : > { %1915 = vst.msk [vmem:[#allocation2 + $0x34] sm:$0xf] %vm1901_vm2, %v1880_v20 }
 0x259   : > { %v2483_v55 = vpack.c.bf16 %v2469_v56, %v2468_v38  ;;  %v2636_v38 = vrot.slane %v2634_v29, 4  ;;  %v2639_v56 = vrot.slane %v2637_v37, 5 }
 0x25b   : > { %v1965_v43 = vpop.permute.xlu0 %1964  ;;  %3071 = vmatmul.msk.bf16.gmra.mxu2 %vm4715_vm12, %v2483_v55  ;;  %v2105_v24 = vpop.permute.xlu1 %2104  ;;  %vm4723_vm12 = vmmov %vm4719_vm0  ;;  %v2644_v55 = vrot.slane %v2642_v1, 5 }
 0x25c   : > { %2002 = vst.msk [vmem:[#allocation2 + $0x2c] sm:$0xf] %vm1990_vm14, %v1965_v43  ;;  %v2648_v43 = vrot.slane %v2646_v26, 4 }
 0x25d   : > { %2075 = vst.msk [vmem:[#allocation2 + $0x2c] sm:$0xf] %vm2063_vm1, %v4345_v39  ;;  %v1882_v44 = vpop.permute.xlu2 %1881  ;;  %v3198_v39 = vld [vmem:[%s3452_s20 + $0x24] sm:$0xf] }
 0x25e   : > { %2142 = vst.msk [vmem:[#allocation2 + $0x2c] sm:$0xf] %vm4716_vm11, %v2105_v24  ;;  %v2613_v51 = vshrl.u32 %v3198_v39, 16  ;;  %v2616_v27 = vshll.u32 %v3198_v39, 16  ;;  %vm4728_vm11 = vmmov %vm4719_vm0 }
 0x260   : > { %v2615_v19 = vrot.slane %v2613_v51, 4  ;;  %v2618_v61 = vrot.slane %v2616_v27, 5 }
 0x262   : > { %v2619_v8 = vor.u32 %v2618_v61, %v2615_v19 }
 0x263   : > { %v1815_v45 = vpop.permute.xlu0 %1814  ;;  %v2265_v47 = vpop.permute.xlu1 %2264 }
 0x264   : > { %2303 = vst.msk [vmem:[#allocation2 + $0x28] sm:$0xf] %vm2292_vm5, %v2265_v47  ;;  %v2620_v10 = vrot.slane %v2619_v8, 4  ;;  %v2640_v47 = vor.u32 %v2639_v56, %v2636_v38 }
 0x265   : > { %v1669_v54 = vpop.permute.xlu2 %1668 }
 0x266   : > { %1702 = vst.msk [vmem:[#allocation2 + $0x3c] sm:$0xf] %vm4717_vm15, %v1669_v54  ;;  %v2624_v11 = vsel %vm3667_vm8, %v2620_v10, %v2623_v63  ;;  %v2649_v54 = vor.u32 %v2648_v43, %v2644_v55  ;;  %vm4729_vm15 = vmmov %vm4719_vm0 }
 0x267   : > { %v2748_v16 = vunpack.c.l.b16 %v2624_v11  ;;  %v2655_v11 = vshrl.u32 %v3204_v5, 16 }
 0x269   : > { %v2762_v17 = vpack.c.b16 %v2749_v12, %v2748_v16  ;;  %v3205_v16 = vld [vmem:[%s3452_s20 + $0x40] sm:$0xf] }
 0x26a   : > { %v2663_v12 = vshll.u32 %v3205_v16, 16 }
 0x26b   : > { %v1967_v48 = vpop.permute.xlu0 %1966  ;;  %v1667_v50 = vpop.permute.xlu1 %1666  ;;  %3080 = vmatmul.msk.bf16.gmra.mxu3 %vm4719_vm0, %v2762_v17  ;;  %v4462_v17 = vld [vmem:[%s4636_s8] ss:$0 sm:$0xff] }
 0x26c   : > { %2003 = vst.msk [vmem:[#allocation2 + $0x30] sm:$0xf] %vm1990_vm14, %v1967_v48 }
 0x26d   : > { %2076 = vst.msk [vmem:[#allocation2 + $0x30] sm:$0xf] %vm2063_vm1, %v2040_v46  ;;  %v2109_v40 = vpop.permute.xlu2 %2108 }
 0x26e   : > { %1701 = vst.msk [vmem:[#allocation2 + $0x38] sm:$0xf] %vm4709_vm6, %v1667_v50  ;;  %v2641_v50 = vrot.slane %v2640_v47, 4  ;;  %vm4730_vm6 = vmmov %vm4719_vm0 }
 0x26f   : > { %1849 = vst.msk [vmem:[#allocation2 + $0x38] sm:$0xf] %vm4710_vm9, %v1815_v45  ;;  %vm4731_vm9 = vmmov %vm4719_vm0 }
 0x270   : > { %1916 = vst.msk [vmem:[#allocation2 + $0x38] sm:$0xf] %vm1901_vm2, %v1882_v44  ;;  %v3203_v44 = vld [vmem:[%s3452_s20 + $0x38] sm:$0x1]  ;;  %v2645_v39 = vsel %vm3667_vm8, %v2641_v50, %v2644_v55 }
 0x271   : > { %v2651_v45 = vshll.u32 %v3203_v44, 16  ;;  %v2750_v27 = vunpack.c.l.b16 %v2645_v39 }
 0x273   : > { %v2042_v6 = vpop.permute.xlu0 %2041  ;;  %v1817_v7 = vpop.permute.xlu1 %1816  ;;  %v2653_v48 = vrot.slane %v2651_v45, 5 }
 0x274   : > { %1850 = vst.msk [vmem:[#allocation2 + $0x3c] sm:$0xf] %vm4718_vm4, %v1817_v7  ;;  %vm4732_vm4 = vmmov %vm4719_vm0 }
 0x275   : > { %v2269_v9 = vpop.permute.xlu2 %2268 }
 0x27b   : > { %v2194_v3 = vpop.permute.xlu0 %2193  ;;  %v2107_v18 = vpop.permute.xlu1 %2106 }
 0x27c   : > { %2231 = vst.msk [vmem:[#allocation2 + $0x2c] sm:$0xf] %vm2219_vm3, %v2194_v3  ;;  %v2667_v3 = vshrl.u32 %v3205_v16, 16  ;;  %v3209_v16 = vld [vmem:[%s3452_s20 + $0x50] sm:$0x1] }
 0x27d   : > { %2304 = vst.msk [vmem:[#allocation2 + $0x2c] sm:$0xf] %vm2292_vm5, %v2267_v35  ;;  %v2111_v20 = vpop.permute.xlu2 %2110 }
 0x27e   : > { %2143 = vst.msk [vmem:[#allocation2 + $0x30] sm:$0xf] %vm4720_vm7, %v2107_v18 }
 0x282   : > { %v2436_v2 = vpop.f32.mrf.mxu1 }
 0x283   : > { %v1884_v30 = vpop.permute.xlu0 %1883  ;;  %v1969_v34 = vpop.permute.xlu1 %1968  ;;  %v2437_v23 = vadd.f32 %v4351_v22, %v2436_v2  ;;  %v2665_v2 = vrot.slane %v2663_v12, 5  ;;  %v2693_v12 = vshll.u32 %v3209_v16, 16 }
 0x284   : > { %1917 = vst.msk [vmem:[#allocation2 + $0x3c] sm:$0xf] %vm1901_vm2, %v1884_v30  ;;  %v3099_v42 = vld [vmem:[#allocation2 + $0x28] sm:$0xff]  ;;  %vm4722_vm2 = vmmov %vm4720_vm7  ;;  %v2660_v30 = vrot.slane %v2658_v62, 5 }
 0x285   : > { %2004 = vst.msk [vmem:[#allocation2 + $0x34] sm:$0xf] %vm1990_vm14, %v1969_v34  ;;  %v1973_v57 = vpop.permute.xlu2 %1972  ;;  %3067 = vmatmul.msk.bf16.gmra.mxu1 %vm2389_vm10, %v3099_v42  ;;  %v2470_v46 = vmax.f32 %v2437_v23, 0.0  ;;  %v4467_v34 = vld [vmem:[%s4635_s7] ss:$0 sm:$0xff]  ;;  %v2669_v42 = vrot.slane %v2667_v3, 4 }
 0x286   : > { %2077 = vst.msk [vmem:[#allocation2 + $0x34] sm:$0xf] %vm2063_vm1, %v2042_v6 }
 0x287   : > { %2144 = vst.msk [vmem:[#allocation2 + $0x34] sm:$0xf] %vm4721_vm13, %v2109_v40  ;;  %v2650_v40 = vrot.slane %v2649_v54, 4 }
 0x288   : > { %2006 = vst.msk [vmem:[#allocation2 + $0x3c] sm:$0xf] %vm1990_vm14, %v1973_v57  ;;  %v3206_v57 = vld [vmem:[%s3452_s20 + $0x44] sm:$0x1] }
 0x289   : > { %v2654_v51 = vsel %vm3667_vm8, %v2650_v40, %v2653_v48  ;;  %v2672_v23 = vshll.u32 %v3206_v57, 16 }
 0x28a   : > { %v2438_v21 = vpop.f32.mrf.mxu1  ;;  %v2751_v52 = vunpack.c.l.b16 %v2654_v51 }
 0x28b   : > { %v2044_v41 = vpop.permute.xlu0 %2043  ;;  %v2439_v36 = vadd.f32 %v4351_v22, %v2438_v21  ;;  %v1971_v25 = vpop.permute.xlu1 %1970 }
 0x28c   : > { %2005 = vst.msk [vmem:[#allocation2 + $0x38] sm:$0xf] %vm1990_vm14, %v1971_v25  ;;  %vm4724_vm14 = vmmov %vm4722_vm2  ;;  %v2763_v19 = vpack.c.b16 %v2751_v52, %v2750_v27  ;;  %v2674_v25 = vrot.slane %v2672_v23, 5 }
 0x28d   : > { %v2471_v28 = vmax.f32 %v2439_v36, 0.0  ;;  %2078 = vst.msk [vmem:[#allocation2 + $0x38] sm:$0xf] %vm2063_vm1, %v2044_v41  ;;  %v2202_v58 = vpop.permute.xlu2 %2201  ;;  %v2670_v36 = vor.u32 %v2669_v42, %v2665_v2 }
 0x28e   : > { %2145 = vst.msk [vmem:[#allocation2 + $0x38] sm:$0xf] %vm4722_vm2, %v2111_v20  ;;  %v2657_v20 = vrot.slane %v2655_v11, 4 }
 0x28f   : > { %v2484_v15 = vpack.c.bf16 %v2471_v28, %v2470_v46 }
 0x290   : > { %v2661_v41 = vor.u32 %v2660_v30, %v2657_v20  ;;  %v2695_v20 = vrot.slane %v2693_v12, 5 }
 0x291   : > { %3072 = vmatmul.msk.bf16.gmra.mxu2 %vm4723_vm12, %v2484_v15 }
 0x292   : > { %v2662_v28 = vrot.slane %v2661_v41, 4 }
 0x293   : > { %v2196_v59 = vpop.permute.xlu0 %2195  ;;  %v2198_v32 = vpop.permute.xlu1 %2197 }
 0x294   : > { %2232 = vst.msk [vmem:[#allocation2 + $0x30] sm:$0xf] %vm2219_vm3, %v2196_v59  ;;  %v2671_v59 = vrot.slane %v2670_v36, 4 }
 0x295   : > { %2305 = vst.msk [vmem:[#allocation2 + $0x30] sm:$0xf] %vm2292_vm5, %v2269_v9 }
 0x296   : > { %2233 = vst.msk [vmem:[#allocation2 + $0x34] sm:$0xf] %vm2219_vm3, %v2198_v32  ;;  %v2666_v32 = vsel %vm3667_vm8, %v2662_v28, %v2665_v2  ;;  %v2675_v29 = vsel %vm3667_vm8, %v2671_v59, %v2674_v25  ;;  %v3210_v25 = vld [vmem:[%s3452_s20 + $0x54] sm:$0xf] }
 0x297   : > { %v2752_v37 = vunpack.c.l.b16 %v2666_v32  ;;  %v2753_v1 = vunpack.c.l.b16 %v2675_v29  ;;  %v2700_v28 = vshll.u32 %v3210_v25, 16 }
 0x29b   : > { %v2271_v35 = vpop.permute.xlu0 %2270  ;;  %v2046_v24 = vpop.permute.xlu1 %2045 }
 0x29c   : > { %2306 = vst.msk [vmem:[#allocation2 + $0x34] sm:$0xf] %vm2292_vm5, %v2271_v35  ;;  %v2764_v35 = vpack.c.b16 %v2753_v1, %v2752_v37  ;;  %v2702_v37 = vrot.slane %v2700_v28, 5 }
 0x29d   : > { %2079 = vst.msk [vmem:[#allocation2 + $0x3c] sm:$0xf] %vm2063_vm1, %v2046_v24  ;;  %vm4725_vm1 = vmmov %vm4719_vm0 }
 0x29e   : > { %3081 = vmatmul.msk.bf16.gmra.mxu3 %vm4725_vm1, %v2763_v19 }
 0x29f   : > { %v2804_v10 = vpop.f32.mrf.mxu3 }
 0x2a0   : > { %v2805_v21 = vadd.f32 %v4462_v17, %v2804_v10 }
 0x2a3   : > { %v2113_v31 = vpop.permute.xlu0 %2112  ;;  %v3100_v53 = vld [vmem:[#allocation2 + $0x30] sm:$0xff]  ;;  %v2200_v60 = vpop.permute.xlu1 %2199 }
 0x2a4   : > { %2146 = vst.msk [vmem:[#allocation2 + $0x3c] sm:$0xf] %vm4724_vm14, %v2113_v31  ;;  %3068 = vmatmul.msk.bf16.gmra.mxu1 %vm2389_vm10, %v3100_v53 }
 0x2a5   : > { %2235 = vst.msk [vmem:[#allocation2 + $0x3c] sm:$0xf] %vm2219_vm3, %v2202_v58 }
 0x2a6   : > { %2234 = vst.msk [vmem:[#allocation2 + $0x38] sm:$0xf] %vm2219_vm3, %v2200_v60  ;;  %vm2876_vm3 = vcmask 130048  }
 0x2a7   : > { %v2806_v14 = vpop.f32.mrf.mxu3 }
 0x2a8   : > { %v2807_v38 = vadd.f32 %v4462_v17, %v2806_v14 }
 0x2ab   : > { %v2273_v61 = vpop.permute.xlu0 %2272  ;;  %v2275_v63 = vpop.permute.xlu1 %2274 }
 0x2ac   : > { %2307 = vst.msk [vmem:[#allocation2 + $0x38] sm:$0xf] %vm2292_vm5, %v2273_v61  ;;  %v2441_v4 = vpop.f32.mrf.mxu1 }
 0x2ad   : > { %2308 = vst.msk [vmem:[#allocation2 + $0x3c] sm:$0xf] %vm2292_vm5, %v2275_v63  ;;  %v2442_v6 = vadd.f32 %v4351_v22, %v2441_v4  ;;  %vm4726_vm5 = vmmov %vm4719_vm0 }
 0x2af   : > { %v2472_v0 = vmax.f32 %v2442_v6, 0.0  ;;  %v3207_v6 = vld [vmem:[%s3452_s20 + $0x48] sm:$0xf] }
 0x2b4   : > { %v3101_v7 = vld [vmem:[#allocation2 + $0x38] sm:$0xff]  ;;  %v2443_v8 = vpop.f32.mrf.mxu1 }
 0x2b5   : > { %v2444_v49 = vadd.f32 %v4351_v22, %v2443_v8  ;;  %3069 = vmatmul.msk.bf16.gmra.mxu1 %vm2389_vm10, %v3101_v7  ;;  %vm4727_vm10 = vmmov %vm4719_vm0  ;;  %v2676_v7 = vshrl.u32 %v3207_v6, 16  ;;  %v2679_v8 = vshll.u32 %v3207_v6, 16 }
 0x2b6   : > { %3082 = vmatmul.msk.bf16.gmra.mxu3 %vm4727_vm10, %v2764_v35 }
 0x2b7   : > { %v2473_v9 = vmax.f32 %v2444_v49, 0.0  ;;  %v3208_v49 = vld [vmem:[%s3452_s20 + $0x4c] sm:$0xf]  ;;  %v2678_v10 = vrot.slane %v2676_v7, 4  ;;  %v2681_v5 = vrot.slane %v2679_v8, 5 }
 0x2b8   : > { %v3215_v7 = vld [vmem:[%s3452_s20 + $0x68] sm:$0x1] }
 0x2b9   : > { %v2485_v18 = vpack.c.bf16 %v2473_v9, %v2472_v0  ;;  %v2684_v0 = vshll.u32 %v3208_v49, 16  ;;  %v2688_v9 = vshrl.u32 %v3208_v49, 16  ;;  %v2682_v3 = vor.u32 %v2681_v5, %v2678_v10 }
 0x2ba   : > { %v2735_v8 = vshll.u32 %v3215_v7, 16 }
 0x2bb   : > { %3073 = vmatmul.msk.bf16.gmra.mxu2 %vm4726_vm5, %v2485_v18  ;;  %v2686_v11 = vrot.slane %v2684_v0, 5  ;;  %v2690_v62 = vrot.slane %v2688_v9, 4  ;;  %v2683_v30 = vrot.slane %v2682_v3, 4 }
 0x2bc   : > { %v2737_v3 = vrot.slane %v2735_v8, 5 }
 0x2bd   : > { %v2691_v18 = vor.u32 %v2690_v62, %v2686_v11  ;;  %v2687_v42 = vsel %vm3667_vm8, %v2683_v30, %v2686_v11 }
 0x2be   : > { %v2531_v46 = vpop.f32.mrf.mxu2  ;;  %v2754_v23 = vunpack.c.l.b16 %v2687_v42 }
 0x2bf   : > { %v2532_v15 = vadd.f32 %v4467_v34, %v2531_v46  ;;  %v2692_v2 = vrot.slane %v2691_v18, 4  ;;  %v2697_v46 = vshrl.u32 %v3210_v25, 16 }
 0x2c1   : > { %v2844_v13 = vadd.f32 %v2805_v21, %v2532_v15  ;;  %v2809_v40 = vpop.f32.mrf.mxu3  ;;  %v2696_v57 = vsel %vm3667_vm8, %v2692_v2, %v2695_v20  ;;  %v3211_v15 = vld [vmem:[%s3452_s20 + $0x58] sm:$0xf]  ;;  %v2699_v29 = vrot.slane %v2697_v46, 4 }
 0x2c2   : > { %v2810_v51 = vadd.f32 %v4462_v17, %v2809_v40  ;;  %v2755_v41 = vunpack.c.l.b16 %v2696_v57  ;;  %v2705_v59 = vshll.u32 %v3211_v15, 16  ;;  %v2709_v32 = vshrl.u32 %v3211_v15, 16 }
 0x2c3   : > { %v2860_v26 = vmax.f32 %v2844_v13, 0.0 }
 0x2c4   : > { %v2765_v21 = vpack.c.b16 %v2755_v41, %v2754_v23  ;;  %v2707_v14 = vrot.slane %v2705_v59, 5 }
 0x2c5   : > { %2877 = vst.msk [vmem:[%s4480_s29] sm:$0xff] %vm2876_vm3, %v2860_v26  ;;  %v2711_v26 = vrot.slane %v2709_v32, 4 }
 0x2c6   : > { %v2533_v56 = vpop.f32.mrf.mxu2  ;;  %3083 = vmatmul.msk.bf16.gmra.mxu3 %vm4729_vm15, %v2765_v21 }
 0x2c7   : > { %v2534_v55 = vadd.f32 %v4467_v34, %v2533_v56  ;;  %v3212_v56 = vld [vmem:[%s3452_s20 + $0x5c] sm:$0x1] }
 0x2c9   : > { %v2845_v43 = vadd.f32 %v2807_v38, %v2534_v55  ;;  %v2811_v53 = vpop.f32.mrf.mxu3  ;;  %v2703_v38 = vor.u32 %v2702_v37, %v2699_v29  ;;  %v2714_v55 = vshll.u32 %v3212_v56, 16 }
 0x2ca   : > { %v2812_v60 = vadd.f32 %v4462_v17, %v2811_v53 }
 0x2cb   : > { %v2861_v24 = vmax.f32 %v2845_v43, 0.0  ;;  %v2446_v44 = vpop.f32.mrf.mxu1  ;;  %v2712_v43 = vor.u32 %v2711_v26, %v2707_v14 }
 0x2cc   : > { %v2447_v45 = vadd.f32 %v4351_v22, %v2446_v44 }
 0x2cd   : > { %2878 = vst.msk [vmem:[%s4480_s29 + $0x8] sm:$0xff] %vm2876_vm3, %v2861_v24 }
 0x2ce   : > { %v2474_v48 = vmax.f32 %v2447_v45, 0.0  ;;  %v2704_v45 = vrot.slane %v2703_v38, 4 }
 0x2d0   : > { %v2708_v40 = vsel %vm3667_vm8, %v2704_v45, %v2707_v14 }
 0x2d3   : > { %v2448_v47 = vpop.f32.mrf.mxu1 }
 0x2d4   : > { %v2449_v54 = vadd.f32 %v4351_v22, %v2448_v47  ;;  %v2716_v47 = vrot.slane %v2714_v55, 5 }
 0x2d6   : > { %v2475_v50 = vmax.f32 %v2449_v54, 0.0 }
 0x2d8   : > { %v2486_v39 = vpack.c.bf16 %v2475_v50, %v2474_v48  ;;  %v2713_v48 = vrot.slane %v2712_v43, 4 }
 0x2da   : > { %3074 = vmatmul.msk.bf16.gmra.mxu2 %vm4728_vm11, %v2486_v39  ;;  %v2717_v39 = vsel %vm3667_vm8, %v2713_v48, %v2716_v47 }
 0x2de   : > { %v2536_v27 = vpop.f32.mrf.mxu2 }
 0x2df   : > { %v2537_v52 = vadd.f32 %v4467_v34, %v2536_v27  ;;  %v2757_v27 = vunpack.c.l.b16 %v2717_v39 }
 0x2e1   : > { %v2846_v31 = vadd.f32 %v2810_v51, %v2537_v52  ;;  %v2756_v51 = vunpack.c.l.b16 %v2708_v40 }
 0x2e3   : > { %v2862_v58 = vmax.f32 %v2846_v31, 0.0  ;;  %v2766_v31 = vpack.c.b16 %v2757_v27, %v2756_v51 }
 0x2e5   : > { %2879 = vst.msk [vmem:[%s4480_s29 + $0x10] sm:$0xff] %vm2876_vm3, %v2862_v58  ;;  %3084 = vmatmul.msk.bf16.gmra.mxu3 %vm4731_vm9, %v2766_v31 }
 0x2e6   : > { %v2538_v19 = vpop.f32.mrf.mxu2 }
 0x2e7   : > { %v2539_v61 = vadd.f32 %v4467_v34, %v2538_v19 }
 0x2e9   : > { %v2847_v63 = vadd.f32 %v2812_v60, %v2539_v61  ;;  %v3213_v60 = vld [vmem:[%s3452_s20 + $0x60] sm:$0xf] }
 0x2ea   : > { %v2718_v19 = vshrl.u32 %v3213_v60, 16  ;;  %v2721_v61 = vshll.u32 %v3213_v60, 16 }
 0x2eb   : > { %v2863_v4 = vmax.f32 %v2847_v63, 0.0  ;;  %v3214_v63 = vld [vmem:[%s3452_s20 + $0x64] sm:$0xf]  ;;  %s3104_s20 = sshll.u32 %s3294_s12, 4  ;;  %s2909_s12 = sshll.u32 %s4480_s29, 4  ;;  %s2910_s12 = int_to_ptr.vmem [resolvable:$true] %s2909_s12 }
 0x2ec   : > { %v2730_v6 = vshrl.u32 %v3214_v63, 16  ;;  %v2720_v0 = vrot.slane %v2718_v19, 4  ;;  %v2723_v9 = vrot.slane %v2721_v61, 5  ;;  %s2906_s18 = sadd.s32 %s3104_s20, %s3089_s0 }
 0x2ed   : > { %2880 = vst.msk [vmem:[%s4480_s29 + $0x18] sm:$0xff] %vm2876_vm3, %v2863_v4  ;;  %v2726_v4 = vshll.u32 %v3214_v63, 16  ;;  %s3090_s25 = sshll.u32 %s2906_s18, 3 }
 0x2ee   : > { %v2814_v54 = vpop.f32.mrf.mxu3  ;;  %v2732_v11 = vrot.slane %v2730_v6, 4  ;;  %v2724_v16 = vor.u32 %v2723_v9, %v2720_v0  ;;  %s2908_s26 = scalar_lea.hbm %s4637_s9, %s3090_s25 }
 0x2ef   : > { %v2815_v52 = vadd.f32 %v4462_v17, %v2814_v54  ;;  %v2728_v10 = vrot.slane %v2726_v4, 5  ;;  %s2911_s13 = sshll.u32 %s2908_s26, 4  ;;  %s2912_s13 = int_to_ptr.hbm [resolvable:$true] %s2911_s13 }
 0x2f0   : > { %v2725_v20 = vrot.slane %v2724_v16, 4  ;;  %s3230_s20 = sshra.s32 %s2912_s13, 4  ;;  %s3231_s20 = int_to_ptr.hbm [resolvable:$true] %s3230_s20 }
 0x2f1   : > { %v2733_v12 = vor.u32 %v2732_v11, %v2728_v10  ;;  %s3232_s0 = scalar_lea.hbm %s3231_s20, 128  ;;  %p3237_p2 = scmp.lt.s32.totalorder %s3231_s20, %s4637_s9 }
 0x2f2   : > { %v2729_v57 = vsel %vm3667_vm8, %v2725_v20, %v2728_v10  ;;  %p3233_p13 = scmp.ne.s32.totalorder %s3231_s20, %s3232_s0  ;;  %p3238_p4 = scmp.lt.s32.totalorder %s3236_s17, %s3232_s0 }
 0x2f3   : > { %v2734_v2 = vrot.slane %v2733_v12, 4  ;;  %v2758_v41 = vunpack.c.l.b16 %v2729_v57 }
 0x2f4   : > { %p3234_p0 = pnand %p3233_p13, %p3422_p3  ;;  %p3239_p5 = por %p3238_p4, %p3237_p2 }
 0x2f5   : > { %v2738_v23 = vsel %vm3667_vm8, %v2734_v2, %v2737_v3  ;;  %vm4733_vm8 = vmmov %vm4719_vm0 }
 0x2f6   : > { %v2816_v5 = vpop.f32.mrf.mxu3  ;;  %p3235_p1 = pneg %p3234_p0 }
 0x2f7   : > { %v2817_v18 = vadd.f32 %v4462_v17, %v2816_v5 }
 0x2f8   : > { %p3240_p6 = pnand %p3239_p5, %p3235_p1 }
 0x302   : > { %v2451_v36 = vpop.f32.mrf.mxu1 }
 0x303   : > { %v2452_v13 = vadd.f32 %v4351_v22, %v2451_v36  ;;  %v2759_v36 = vunpack.c.l.b16 %v2738_v23 }
 0x305   : > { %v2476_v24 = vmax.f32 %v2452_v13, 0.0  ;;  %v2767_v28 = vpack.c.b16 %v2759_v36, %v2758_v41 }
 0x307   : > { %3085 = vmatmul.msk.bf16.gmra.mxu3 %vm4732_vm4, %v2767_v28 }
 0x30a   : > { %v2453_v1 = vpop.f32.mrf.mxu1 }
 0x30b   : > { %v2454_v35 = vadd.f32 %v4351_v22, %v2453_v1 }
 0x30d   : > { %v2477_v44 = vmax.f32 %v2454_v35, 0.0 }
 0x30f   : > { %v2487_v50 = vpack.c.bf16 %v2477_v44, %v2476_v24 }
 0x311   : > { %3075 = vmatmul.msk.bf16.gmra.mxu2 %vm4730_vm6, %v2487_v50 }
 0x314   : > { %v2541_v53 = vpop.f32.mrf.mxu2 }
 0x315   : > { %v2542_v58 = vadd.f32 %v4467_v34, %v2541_v53 }
 0x317   : > { %v2848_v49 = vadd.f32 %v2815_v52, %v2542_v58 }
 0x319   : > { %v2864_v62 = vmax.f32 %v2848_v49, 0.0 }
 0x31b   : > { %2881 = vst.msk [vmem:[%s4480_s29 + $0x20] sm:$0xff] %vm2876_vm3, %v2864_v62 }
 0x31c   : > { %v2543_v30 = vpop.f32.mrf.mxu2 }
 0x31d   : > { %v2544_v42 = vadd.f32 %v4467_v34, %v2543_v30 }
 0x31f   : > { %v2849_v21 = vadd.f32 %v2817_v18, %v2544_v42 }
 0x321   : > { %v2865_v25 = vmax.f32 %v2849_v21, 0.0  ;;  %v2456_v46 = vpop.f32.mrf.mxu1  ;;  %v2819_v14 = vpop.f32.mrf.mxu3 }
 0x322   : > { %v2457_v15 = vadd.f32 %v4351_v22, %v2456_v46  ;;  %v2820_v55 = vadd.f32 %v4462_v17, %v2819_v14 }
 0x323   : > { %2882 = vst.msk [vmem:[%s4480_s29 + $0x28] sm:$0xff] %vm2876_vm3, %v2865_v25 }
 0x324   : > { %v2478_v13 = vmax.f32 %v2457_v15, 0.0 }
 0x329   : > { %v2458_v59 = vpop.f32.mrf.mxu1  ;;  %v2821_v47 = vpop.f32.mrf.mxu3 }
 0x32a   : > { %v2459_v32 = vadd.f32 %v4351_v22, %v2458_v59  ;;  %v2822_v48 = vadd.f32 %v4462_v17, %v2821_v47 }
 0x32c   : > { %v2479_v29 = vmax.f32 %v2459_v32, 0.0 }
 0x32e   : > { %v2488_v37 = vpack.c.bf16 %v2479_v29, %v2478_v13 }
 0x330   : > { %3076 = vmatmul.msk.bf16.gmra.mxu2 %vm4719_vm0, %v2488_v37 }
 0x332   : > { %v2461_v33 = vpop.f32.mrf.mxu1 }
 0x333   : > { %v2462_v1 = vadd.f32 %v4351_v22, %v2461_v33 }
 0x335   : > { %v2480_v38 = vmax.f32 %v2462_v1, 0.0 }
 0x339   : > { %v2824_v51 = vpop.f32.mrf.mxu3 }
 0x33a   : > { %v2463_v26 = vpop.f32.mrf.mxu1  ;;  %v2825_v27 = vadd.f32 %v4462_v17, %v2824_v51 }
 0x33b   : > { %v2464_v35 = vadd.f32 %v4351_v22, %v2463_v26 }
 0x33d   : > { %v2481_v56 = vmax.f32 %v2464_v35, 0.0 }
 0x33e   : > { %v2546_v43 = vpop.f32.mrf.mxu2 }
 0x33f   : > { %v2489_v24 = vpack.c.bf16 %v2481_v56, %v2480_v38  ;;  %v2547_v44 = vadd.f32 %v4467_v34, %v2546_v43 }
 0x341   : > { %v2850_v45 = vadd.f32 %v2820_v55, %v2547_v44  ;;  %3077 = vmatmul.msk.bf16.gmra.mxu2 %vm4733_vm8, %v2489_v24  ;;  %v2826_v58 = vpop.f32.mrf.mxu3 }
 0x342   : > { %v2827_v19 = vadd.f32 %v4462_v17, %v2826_v58 }
 0x343   : > { %v2866_v54 = vmax.f32 %v2850_v45, 0.0 }
 0x345   : > { %2883 = vst.msk [vmem:[%s4480_s29 + $0x30] sm:$0xff] %vm2876_vm3, %v2866_v54 }
 0x346   : > { %v2548_v22 = vpop.f32.mrf.mxu2 }
 0x347   : > { %v2549_v50 = vadd.f32 %v4467_v34, %v2548_v22 }
 0x349   : > { %v2851_v40 = vadd.f32 %v2822_v48, %v2549_v50  ;;  %v2829_v7 = vpop.f32.mrf.mxu3 }
 0x34a   : > { %v2830_v8 = vadd.f32 %v4462_v17, %v2829_v7 }
 0x34b   : > { %v2867_v39 = vmax.f32 %v2851_v40, 0.0 }
 0x34d   : > { %2884 = vst.msk [vmem:[%s4480_s29 + $0x38] sm:$0xff] %vm2876_vm3, %v2867_v39 }
 0x351   : > { %v2831_v10 = vpop.f32.mrf.mxu3 }
 0x352   : > { %v2832_v11 = vadd.f32 %v4462_v17, %v2831_v10 }
 0x35d   : > { %v2551_v52 = vpop.f32.mrf.mxu2 }
 0x35e   : > { %v2552_v31 = vadd.f32 %v4467_v34, %v2551_v52 }
 0x360   : > { %v2852_v53 = vadd.f32 %v2825_v27, %v2552_v31 }
 0x362   : > { %v2868_v60 = vmax.f32 %v2852_v53, 0.0 }
 0x364   : > { %2885 = vst.msk [vmem:[%s4480_s29 + $0x40] sm:$0xff] %vm2876_vm3, %v2868_v60 }
 0x365   : > { %v2553_v61 = vpop.f32.mrf.mxu2 }
 0x366   : > { %v2554_v63 = vadd.f32 %v4467_v34, %v2553_v61 }
 0x368   : > { %v2853_v4 = vadd.f32 %v2827_v19, %v2554_v63  ;;  %v2834_v18 = vpop.f32.mrf.mxu3 }
 0x369   : > { %v2835_v20 = vadd.f32 %v4462_v17, %v2834_v18 }
 0x36a   : > { %v2869_v6 = vmax.f32 %v2853_v4, 0.0 }
 0x36c   : > { %2886 = vst.msk [vmem:[%s4480_s29 + $0x48] sm:$0xff] %vm2876_vm3, %v2869_v6 }
 0x370   : > { %v2836_v57 = vpop.f32.mrf.mxu3 }
 0x371   : > { %v2837_v21 = vadd.f32 %v4462_v17, %v2836_v57 }
 0x38a   : > { %v2839_v28 = vpop.f32.mrf.mxu3 }
 0x38b   : > { %v2840_v15 = vadd.f32 %v4462_v17, %v2839_v28 }
 0x392   : > { %v2841_v37 = vpop.f32.mrf.mxu3 }
 0x393   : > { %v2842_v14 = vadd.f32 %v4462_v17, %v2841_v37 }
 0x394   : > { %v2556_v49 = vpop.f32.mrf.mxu2 }
 0x395   : > { %v2557_v0 = vadd.f32 %v4467_v34, %v2556_v49 }
 0x397   : > { %v2854_v9 = vadd.f32 %v2830_v8, %v2557_v0 }
 0x399   : > { %v2870_v5 = vmax.f32 %v2854_v9, 0.0 }
 0x39b   : > { %2887 = vst.msk [vmem:[%s4480_s29 + $0x50] sm:$0xff] %vm2876_vm3, %v2870_v5 }
 0x39c   : > { %v2558_v62 = vpop.f32.mrf.mxu2 }
 0x39d   : > { %v2559_v16 = vadd.f32 %v4467_v34, %v2558_v62 }
 0x39f   : > { %v2855_v12 = vadd.f32 %v2832_v11, %v2559_v16 }
 0x3a1   : > { %v2871_v3 = vmax.f32 %v2855_v12, 0.0 }
 0x3a3   : > { %2888 = vst.msk [vmem:[%s4480_s29 + $0x58] sm:$0xff] %vm2876_vm3, %v2871_v3 }
 0x3b3   : > { %v2561_v30 = vpop.f32.mrf.mxu2 }
 0x3b4   : > { %v2562_v2 = vadd.f32 %v4467_v34, %v2561_v30 }
 0x3b6   : > { %v2856_v42 = vadd.f32 %v2835_v20, %v2562_v2 }
 0x3b8   : > { %v2872_v23 = vmax.f32 %v2856_v42, 0.0 }
 0x3ba   : > { %2889 = vst.msk [vmem:[%s4480_s29 + $0x60] sm:$0xff] %vm2876_vm3, %v2872_v23 }
 0x3bb   : > { %v2563_v41 = vpop.f32.mrf.mxu2 }
 0x3bc   : > { %v2564_v36 = vadd.f32 %v4467_v34, %v2563_v41 }
 0x3be   : > { %v2857_v25 = vadd.f32 %v2837_v21, %v2564_v36 }
 0x3c0   : > { %v2873_v46 = vmax.f32 %v2857_v25, 0.0 }
 0x3c2   : > { %2890 = vst.msk [vmem:[%s4480_s29 + $0x68] sm:$0xff] %vm2876_vm3, %v2873_v46 }
 0x3c4   : > { %v2566_v59 = vpop.f32.mrf.mxu2 }
 0x3c5   : > { %v2567_v32 = vadd.f32 %v4467_v34, %v2566_v59 }
 0x3c7   : > { %v2858_v13 = vadd.f32 %v2840_v15, %v2567_v32 }
 0x3c9   : > { %v2874_v29 = vmax.f32 %v2858_v13, 0.0 }
 0x3cb   : > { %2891 = vst.msk [vmem:[%s4480_s29 + $0x70] sm:$0xff] %vm2876_vm3, %v2874_v29 }
 0x3cc   : > { %v2568_v33 = vpop.f32.mrf.mxu2 }
 0x3cd   : > { %v2569_v1 = vadd.f32 %v4467_v34, %v2568_v33 }
 0x3cf   : > { %v2859_v26 = vadd.f32 %v2842_v14, %v2569_v1 }
 0x3d1   : > { %v2875_v35 = vmax.f32 %v2859_v26, 0.0 }
 0x3d3   : > { %2892 = vst.msk [vmem:[%s4480_s29 + $0x78] sm:$0xff] %vm2876_vm3, %v2875_v35 }
 0x3d4   : > { %3243 = shalt.err (!%p3240_p6)
}
 0x3d5   : > { %s3320_s28 = smov 128   ;;  %s4734_s29 = smov 8  }
 0x3d6   : > { %3107 = dma.vmem_to_hbm [thread:$0]  (%p3422_p3), %s2910_s12, 2048, %s2912_s13, %s2894_s21, %s3320_s28, %s3320_s28, %s4734_s29  }
 0x3d7 PF: > { %p3113_p7 = scmp.ge.s32.totalorder %s3310_s16, 2  ;;  %s2926_s18 = sand.u32 1, %s3282_s30  }
 0x3d8   : > { %s2927_s25 = scalar_lea.sflag [#allocation4], %s2926_s18 }
 0x3d9   : > { %p3110_p9 = pnand %p3113_p7, %p3431_p8 }
 0x3db   : > { %p3111_p10 = pneg %p3110_p9 }
 0x3dd   : > { %3277 = dma.done.wait (%p3111_p10), %s2927_s25, 2048  }
 0x3de   : > { %3279 = vsyncadd (%p3111_p10), %s2927_s25, 4294965248  ;;  %s22_s16 = sadd.s32 1, %s3310_s16   ;;  %s4735_s22 = sld [smem:[#allocation6_spill]] }
 0x3df   : > { %p19_p11 = scmp.ge.s32.totalorder %s22_s16, 6   ;;  %s4736_s30 = smov %s3286_s10 }
 0x3e0   : > { %s4737_s10 = smov %s3290_s11  ;;  %s4738_s11 = smov %s3440_s27 }
 0x3e1   : > { %s4739_s12 = smov %s3302_s14  ;;  %s4740_s13 = smov %s3306_s15 }
 0x3e2   : > { %s4741_s14 = smov %s4744_s19  ;;  %21 = sbr.rel (!%p19_p11) target bundleno = 7 (0x7), region = 106 }
 0x3e4   : > { %s4742_s15 = smov %s4735_s22 }
 0x3e7   :  { %2933 = vsyncpa [#allocation4], 1 }
 0x3e8   :  { %2935 = vsyncpa [#allocation4 + $0x1], 1 }

</bundles_post_ra>
